<compile_context>
chip_gen: v7x
topology: tpu7x:2x2x1
jax: 0.10.0
libtpu: 0.0.40
codegen_flags: <defaults>
</compile_context>

<pallas_src>
import functools

import jax
import jax.numpy as jnp
from jax.experimental import pallas as pl
from jax.experimental.pallas import tpu as pltpu


def _round_up(x, m):
    return -(-x // m) * m


def _vmem_limit_bytes():
    cap = 64 * 1024 * 1024                     # conservative default (v7x: 64 MiB / TC)
    try:
        cap = int(pltpu.get_tpu_info().vmem_capacity_bytes)
    except Exception:
        pass
    # ~3/4 of physical VMEM, capped: ~48 MiB on v7x, 96-100 MiB on v5e/v6e.
    return int(min(cap * 3 // 4, 100 * 1024 * 1024))


def _resblock_kernel(x_ref, w1_ref, b1_ref, w2_ref, b2_ref, wsc_ref, bsc_ref, out_ref,
                     *, s, TH, Wo, Cin, Cp, Ho, conv1_concat, compute_dtype):
    """One (batch, row-tile) step of the fused ResBlock.

    x_ref  : (1, s*s, Hq2, Wq2, Cin)  stride-de-interleaved, zero-padded input slab
                                      (whole image; resident across the row-tile axis)
    w1_ref : (9*Cin, Cp) or (9, Cin, Cp)   conv1 weights, Cout zero-padded to Cp
    w2_ref : (9, Cp, Cp)                   conv2 weights (both channel dims padded)
    wsc_ref: (Cin, Cp)                     1x1 shortcut (identity matrix if downsample==1)
    out_ref: (1, TH, Wo, Cp)               lane-dense (Cp = k*128) output tile
    """
    t = pl.program_id(1)
    e = 2 // s                                # extra halo q-rows/cols from kh//s, kw//s
    TH2, Wo2 = TH + 2, Wo + 2
    row0 = t * TH

    # Per-phase halo window of this row tile: one dynamic slice per stride phase; every
    # conv tap below is a static slice of it (no strided loads, no halo copies in HBM).
    slabs = [x_ref[0, p, pl.ds(row0, TH2 + e), :, :] for p in range(s * s)]

    # ---- conv1 over TH+2 rows x Wo+2 cols (conv2's halo ring computed in place)
    taps1 = []
    for kh in range(3):
        for kw in range(3):
            p = (kh % s) * s + (kw % s)
            taps1.append(slabs[p][kh // s:kh // s + TH2, kw // s:kw // s + Wo2, :])
    if conv1_concat:
        # small Cin: single im2col matmul, K = 9*Cin
        cols1 = jnp.concatenate(taps1, axis=-1).reshape(TH2 * Wo2, 9 * Cin)
        h = jnp.dot(cols1, w1_ref[...], preferred_element_type=jnp.float32)
    else:
        # large Cin: 9 accumulating MXU dots, no lane-axis concat / big im2col buffer
        h = jnp.zeros((TH2 * Wo2, Cp), jnp.float32)
        for k in range(9):
            h = h + jnp.dot(taps1[k].reshape(TH2 * Wo2, Cin), w1_ref[k],
                            preferred_element_type=jnp.float32)
    h = jnp.maximum(h + b1_ref[...], 0.0).reshape(TH2, Wo2, Cp)

    # One combined validity select supplies conv2's zero padding: rows outside the image
    # (tile halo rows / bottom rows of a masked last tile) and the left/right halo cols.
    ri = jax.lax.broadcasted_iota(jnp.int32, (TH2, Wo2, 1), 0) + (row0 - 1)
    ci = jax.lax.broadcasted_iota(jnp.int32, (TH2, Wo2, 1), 1) - 1
    h = jnp.where((ri >= 0) & (ri < Ho) & (ci >= 0) & (ci < Wo), h, 0.0)
    hc = h.astype(compute_dtype)              # cast once; the dots below slice from it

    # ---- conv2 (3x3, stride 1): 9 accumulating dots, K = Cp each (no im2col buffer)
    acc = jnp.zeros((TH * Wo, Cp), jnp.float32)
    for kh in range(3):
        for kw in range(3):
            tap = hc[kh:kh + TH, kw:kw + Wo, :].reshape(TH * Wo, Cp)
            acc = acc + jnp.dot(tap, w2_ref[kh * 3 + kw],
                                preferred_element_type=jnp.float32)
    acc = acc + b2_ref[...]

    # ---- residual from the already-resident slab (1x1 shortcut matmul; the identity
    #      residual path passes an eye() shortcut so the kernel stays uniform)
    pr = (1 % s) * s + (1 % s)
    r0 = 1 + 1 // s
    res = slabs[pr][r0:r0 + TH, r0:r0 + Wo, :].reshape(TH * Wo, Cin)
    acc = acc + jnp.dot(res, wsc_ref[...], preferred_element_type=jnp.float32) + bsc_ref[...]

    out_ref[...] = jnp.maximum(acc, 0.0).reshape(1, TH, Wo, Cp).astype(out_ref.dtype)


def _pick_block_rows(Ho, Wo, Wq2, Cin, Cp, s, itemsize, out_itemsize, budget_bytes):
    """Largest row tile whose per-step working set fits the VMEM budget.
    Prefers TH == Ho (no halo recompute), then multiples of 8 (sublane-aligned M);
    a masked last tile is supported, so TH need not divide Ho."""
    e = 2 // s
    Wo2 = Wo + 2

    def fits(th):
        nt = -(-Ho // th)
        hq2 = nt * th + e + 2
        slab = 2 * s * s * hq2 * Wq2 * Cin * itemsize        # double-buffered input slab
        th2 = th + 2
        h_b = th2 * Wo2 * Cp * (4 + itemsize)                # f32 conv1 act + cast copy
        col = th2 * Wo2 * 9 * Cin * itemsize                 # conv1 im2col (upper bound)
        acc = th * Wo * Cp * 4
        outb = 2 * th * Wo * Cp * out_itemsize               # double-buffered output tile
        return slab + h_b + col + acc + outb <= budget_bytes

    cands = [Ho] + list(range((Ho // 8) * 8, 0, -8)) + list(range(min(Ho, 7), 0, -1))
    for th in cands:
        if 0 < th <= Ho and fits(th):
            return th
    return 1


def resblock_forward(x_nchw, params, downsample, *, compute_dtype=jnp.bfloat16,
                     block_rows=None, conv1_concat_max_cin=96):
    """ResBlock forward. Input/output are NCHW to match the PyTorch module."""
    w1, b1 = params["w1"], params["b1"]
    w2, b2 = params["w2"], params["b2"]

    N, Cin, H, W = x_nchw.shape
    Cout = w1.shape[0]
    s = int(downsample)
    if s < 1:
        raise ValueError("downsample (stride) must be >= 1")
    Ho = (H - 1) // s + 1
    Wo = (W - 1) // s + 1
    use_shortcut = s > 1                      # same gating as the PyTorch forward
    if not use_shortcut and Cin != Cout:
        raise ValueError("identity residual requires Cin == Cout")

    Cp = _round_up(Cout, 128)                 # lane-dense / MXU-width padded channels
    e = 2 // s
    Wq2 = Wo + e + 2

    itemsize = jnp.dtype(compute_dtype).itemsize
    out_itemsize = jnp.dtype(x_nchw.dtype).itemsize
    vmem_limit = _vmem_limit_bytes()

    if block_rows is None:
        TH = _pick_block_rows(Ho, Wo, Wq2, Cin, Cp, s, itemsize, out_itemsize,
                              budget_bytes=vmem_limit // 3)
    else:
        TH = max(1, min(int(block_rows), Ho))
    nT = -(-Ho // TH)                         # masked last tile if TH doesn't divide Ho
    Hq2 = nT * TH + e + 2

    conv1_concat = Cin <= conv1_concat_max_cin

    # ---- input: NHWC cast, ONE combined pad (conv pad + halo + stride alignment),
    #      then de-interleave H/W by the stride so every conv tap is a contiguous slice.
    # TODO(synk): for images too large to keep a whole de-interleaved slab in VMEM,
    # switch the input to memory_space=pl.ANY + manual make_async_copy row windows.
    x = jnp.transpose(x_nchw, (0, 2, 3, 1)).astype(compute_dtype)        # NHWC
    x_pad = jnp.pad(x, ((0, 0),
                        (1 + s, Hq2 * s - H - 1 - s),
                        (1 + s, Wq2 * s - W - 1 - s),
                        (0, 0)))
    x_ds = x_pad.reshape(N, Hq2, s, Wq2, s, Cin).transpose(0, 2, 4, 1, 3, 5)
    x_ds = x_ds.reshape(N, s * s, Hq2, Wq2, Cin)
    # x_ds[n, rh*s+rw, qh, qw, c] == x_pad[n, qh*s+rh, qw*s+rw, c]

    # ---- weights: im2col layouts, output channels zero-padded to Cp (lane-dense)
    zc = Cp - Cout
    w1t = jnp.pad(jnp.transpose(w1, (2, 3, 1, 0)), ((0, 0), (0, 0), (0, 0), (0, zc)))
    w1k = (w1t.reshape(9 * Cin, Cp) if conv1_concat
           else w1t.reshape(9, Cin, Cp)).astype(compute_dtype)
    w2t = jnp.pad(jnp.transpose(w2, (2, 3, 1, 0)),
                  ((0, 0), (0, 0), (0, zc), (0, zc)))
    w2k = w2t.reshape(9, Cp, Cp).astype(compute_dtype)
    b1k = jnp.pad(b1, (0, zc)).reshape(1, Cp).astype(jnp.float32)
    b2k = jnp.pad(b2, (0, zc)).reshape(1, Cp).astype(jnp.float32)
    if use_shortcut:
        wsct = jnp.transpose(params["wsc"], (2, 3, 1, 0)).reshape(Cin, Cout)
        bsct = params["bsc"]
    else:                                     # identity residual as padded-identity matmul
        wsct = jnp.eye(Cin, dtype=jnp.float32)
        bsct = jnp.zeros((Cout,), jnp.float32)
    wsck = jnp.pad(wsct, ((0, 0), (0, zc))).astype(compute_dtype)
    bsck = jnp.pad(bsct, (0, zc)).reshape(1, Cp).astype(jnp.float32)

    kernel = functools.partial(_resblock_kernel, s=s, TH=TH, Wo=Wo, Cin=Cin, Cp=Cp,
                               Ho=Ho, conv1_concat=conv1_concat,
                               compute_dtype=compute_dtype)

    # TODO(synk): weight BlockSpecs could use pipeline_mode=pl.Buffered(1) to save VMEM
    # for very large Cout on v7x; skipped here for portability.
    in_specs = [
        pl.BlockSpec((1, s * s, Hq2, Wq2, Cin), lambda b, t: (b, 0, 0, 0, 0)),
        pl.BlockSpec(w1k.shape, lambda b, t: (0,) * w1k.ndim),
        pl.BlockSpec((1, Cp), lambda b, t: (0, 0)),
        pl.BlockSpec((9, Cp, Cp), lambda b, t: (0, 0, 0)),
        pl.BlockSpec((1, Cp), lambda b, t: (0, 0)),
        pl.BlockSpec((Cin, Cp), lambda b, t: (0, 0)),
        pl.BlockSpec((1, Cp), lambda b, t: (0, 0)),
    ]
    out = pl.pallas_call(
        kernel,
        out_shape=jax.ShapeDtypeStruct((N, nT * TH, Wo, Cp), x_nchw.dtype),
        grid_spec=pltpu.PrefetchScalarGridSpec(
            num_scalar_prefetch=0,
            grid=(N, nT),
            in_specs=in_specs,
            out_specs=pl.BlockSpec((1, TH, Wo, Cp), lambda b, t: (b, t, 0, 0)),
        ),
        compiler_params=pltpu.CompilerParams(
            dimension_semantics=("parallel", "parallel"),
            vmem_limit_bytes=vmem_limit),
    )(x_ds, w1k, b1k, w2k, b2k, wsck, bsck)

    out = out[:, :Ho, :, :Cout]               # drop masked rows + channel padding
    return jnp.transpose(out, (0, 3, 1, 2))   # back to NCHW (fused with slice by XLA)


def ref_resblock(x_nchw, params, downsample):
    """Plain-JAX reference matching the PyTorch forward (for verification)."""
    dn = ("NCHW", "OIHW", "NCHW")

    def conv(x, w, strides, pad):
        return jax.lax.conv_general_dilated(
            x, w, window_strides=strides, padding=pad, dimension_numbers=dn)

    out = conv(x_nchw, params["w1"], (downsample, downsample),
               ((1, 1), (1, 1))) + params["b1"][None, :, None, None]
    out = jnp.maximum(out, 0.0)
    out = conv(out, params["w2"], (1, 1),
               ((1, 1), (1, 1))) + params["b2"][None, :, None, None]
    if downsample > 1:
        residual = conv(x_nchw, params["wsc"], (downsample, downsample),
                        ((0, 0), (0, 0))) + params["bsc"][None, :, None, None]
    else:
        residual = x_nchw
    return jnp.maximum(out + residual, 0.0)


def _make_case(key, N, Cin, Cout, H, W):
    ks = jax.random.split(key, 7)
    params = {
        "w1": jax.random.normal(ks[0], (Cout, Cin, 3, 3), jnp.float32) * 0.1,
        "b1": jax.random.normal(ks[1], (Cout,), jnp.float32) * 0.1,
        "w2": jax.random.normal(ks[2], (Cout, Cout, 3, 3), jnp.float32) * 0.1,
        "b2": jax.random.normal(ks[3], (Cout,), jnp.float32) * 0.1,
        "wsc": jax.random.normal(ks[4], (Cout, Cin, 1, 1), jnp.float32) * 0.1,
        "bsc": jax.random.normal(ks[5], (Cout,), jnp.float32) * 0.1,
    }
    x = jax.random.normal(ks[6], (N, Cin, H, W), jnp.float32)
    return x, params


if __name__ == "__main__":
    k1, k2 = jax.random.split(jax.random.PRNGKey(0))

    # --- Case 1: the module's configuration (downsample = Cout // Cin = 2).
    x, params = _make_case(k1, N=2, Cin=4, Cout=8, H=16, W=16)
    s = 8 // 4
    ref = ref_resblock(x, params, s)

    # (a) f32 compute, auto row tiling (single tile)
    out = jax.block_until_ready(
        resblock_forward(x, params, s, compute_dtype=jnp.float32))
    assert out.shape == ref.shape, (out.shape, ref.shape)
    assert jnp.allclose(out, ref, atol=1e-3, rtol=1e-3), float(jnp.max(jnp.abs(out - ref)))

    # (b) f32, 2 row tiles -> exercises the halo recompute across tiles
    out = jax.block_until_ready(
        resblock_forward(x, params, s, compute_dtype=jnp.float32, block_rows=4))
    assert jnp.allclose(out, ref, atol=1e-3, rtol=1e-3), float(jnp.max(jnp.abs(out - ref)))

    # (c) f32, non-divisor TH -> exercises the masked last tile
    out = jax.block_until_ready(
        resblock_forward(x, params, s, compute_dtype=jnp.float32, block_rows=5))
    assert jnp.allclose(out, ref, atol=1e-3, rtol=1e-3), float(jnp.max(jnp.abs(out - ref)))

    # (d) f32, force the 9-accumulating-dot conv1 path (large-Cin code path)
    out = jax.block_until_ready(
        resblock_forward(x, params, s, compute_dtype=jnp.float32,
                         conv1_concat_max_cin=0))
    assert jnp.allclose(out, ref, atol=1e-3, rtol=1e-3), float(jnp.max(jnp.abs(out - ref)))

    # (e) bf16 matmul path (performance default) -> looser tolerance vs f32 ref
    out = jax.block_until_ready(resblock_forward(x, params, s, block_rows=4))
    assert jnp.allclose(out, ref, atol=5e-2, rtol=5e-2), float(jnp.max(jnp.abs(out - ref)))

    # --- Case 2: identity-residual path (Cin == Cout -> downsample == 1), tiled.
    x2, params2 = _make_case(k2, N=2, Cin=4, Cout=4, H=16, W=16)
    ref2 = ref_resblock(x2, params2, 1)
    out2 = jax.block_until_ready(
        resblock_forward(x2, params2, 1, compute_dtype=jnp.float32, block_rows=8))
    assert jnp.allclose(out2, ref2, atol=1e-3, rtol=1e-3), float(jnp.max(jnp.abs(out2 - ref2)))

    print("KERNEL_OK")
</pallas_src>

<mosaic_0001>
module attributes {stable_mosaic.version = 11 : i64} {
  func.func @_resblock_kernel(%arg0: i32, %arg1: i32, %arg2: memref<1x4x11x11x4xf32, #tpu.memory_space<vmem>>, %arg3: memref<36x128xf32, #tpu.memory_space<vmem>>, %arg4: memref<1x128xf32, #tpu.memory_space<vmem>>, %arg5: memref<9x128x128xf32, #tpu.memory_space<vmem>>, %arg6: memref<1x128xf32, #tpu.memory_space<vmem>>, %arg7: memref<4x128xf32, #tpu.memory_space<vmem>>, %arg8: memref<1x128xf32, #tpu.memory_space<vmem>>, %arg9: memref<1x8x8x128xf32, #tpu.memory_space<vmem>>) attributes {dimension_semantics = [#tpu.dimension_semantics<parallel>, #tpu.dimension_semantics<parallel>], iteration_bounds = array<i64: 2, 1>, scalar_prefetch = 0 : i64, scratch_operands = 0 : i64, tpu.core_type = #tpu.core_type<tc>, window_params = [{transform_indices = @transform_0, window_bounds = array<i64: 1, 4, 11, 11, 4>}, {pipeline_mode = #tpu.pipeline_mode<synchronous>, transform_indices = @transform_1, window_bounds = array<i64: 36, 128>}, {pipeline_mode = #tpu.pipeline_mode<synchronous>, transform_indices = @transform_2, window_bounds = array<i64: 1, 128>}, {pipeline_mode = #tpu.pipeline_mode<synchronous>, transform_indices = @transform_3, window_bounds = array<i64: 9, 128, 128>}, {pipeline_mode = #tpu.pipeline_mode<synchronous>, transform_indices = @transform_4, window_bounds = array<i64: 1, 128>}, {pipeline_mode = #tpu.pipeline_mode<synchronous>, transform_indices = @transform_5, window_bounds = array<i64: 4, 128>}, {pipeline_mode = #tpu.pipeline_mode<synchronous>, transform_indices = @transform_6, window_bounds = array<i64: 1, 128>}, {transform_indices = @transform_7, window_bounds = array<i64: 1, 8, 8, 128>}]} {
    %c8_i32 = arith.constant 8 : i32
    %0 = arith.muli %arg1, %c8_i32 : i32
    %c0 = arith.constant 0 : index
    %c0_0 = arith.constant 0 : index
    %1 = arith.index_cast %0 : i32 to index
    %c0_1 = arith.constant 0 : index
    %c0_2 = arith.constant 0 : index
    %2 = vector.load %arg2[%c0, %c0_0, %1, %c0_1, %c0_2] : memref<1x4x11x11x4xf32, #tpu.memory_space<vmem>>, vector<1x1x11x11x4xf32>
    %3 = vector.shape_cast %2 : vector<1x1x11x11x4xf32> to vector<11x11x4xf32>
    %c0_3 = arith.constant 0 : index
    %c1 = arith.constant 1 : index
    %4 = arith.index_cast %0 : i32 to index
    %c0_4 = arith.constant 0 : index
    %c0_5 = arith.constant 0 : index
    %5 = vector.load %arg2[%c0_3, %c1, %4, %c0_4, %c0_5] : memref<1x4x11x11x4xf32, #tpu.memory_space<vmem>>, vector<1x1x11x11x4xf32>
    %6 = vector.shape_cast %5 : vector<1x1x11x11x4xf32> to vector<11x11x4xf32>
    %c0_6 = arith.constant 0 : index
    %c2 = arith.constant 2 : index
    %7 = arith.index_cast %0 : i32 to index
    %c0_7 = arith.constant 0 : index
    %c0_8 = arith.constant 0 : index
    %8 = vector.load %arg2[%c0_6, %c2, %7, %c0_7, %c0_8] : memref<1x4x11x11x4xf32, #tpu.memory_space<vmem>>, vector<1x1x11x11x4xf32>
    %9 = vector.shape_cast %8 : vector<1x1x11x11x4xf32> to vector<11x11x4xf32>
    %c0_9 = arith.constant 0 : index
    %c3 = arith.constant 3 : index
    %10 = arith.index_cast %0 : i32 to index
    %c0_10 = arith.constant 0 : index
    %c0_11 = arith.constant 0 : index
    %11 = vector.load %arg2[%c0_9, %c3, %10, %c0_10, %c0_11] : memref<1x4x11x11x4xf32, #tpu.memory_space<vmem>>, vector<1x1x11x11x4xf32>
    %12 = vector.shape_cast %11 : vector<1x1x11x11x4xf32> to vector<11x11x4xf32>
    %13 = vector.extract_strided_slice %3 {offsets = [0, 0, 0], sizes = [10, 10, 4], strides = [1, 1, 1]} : vector<11x11x4xf32> to vector<10x10x4xf32>
    %14 = vector.extract_strided_slice %6 {offsets = [0, 0, 0], sizes = [10, 10, 4], strides = [1, 1, 1]} : vector<11x11x4xf32> to vector<10x10x4xf32>
    %15 = vector.extract_strided_slice %3 {offsets = [0, 1, 0], sizes = [10, 10, 4], strides = [1, 1, 1]} : vector<11x11x4xf32> to vector<10x10x4xf32>
    %16 = vector.extract_strided_slice %9 {offsets = [0, 0, 0], sizes = [10, 10, 4], strides = [1, 1, 1]} : vector<11x11x4xf32> to vector<10x10x4xf32>
    %17 = vector.extract_strided_slice %12 {offsets = [0, 0, 0], sizes = [10, 10, 4], strides = [1, 1, 1]} : vector<11x11x4xf32> to vector<10x10x4xf32>
    %18 = vector.extract_strided_slice %9 {offsets = [0, 1, 0], sizes = [10, 10, 4], strides = [1, 1, 1]} : vector<11x11x4xf32> to vector<10x10x4xf32>
    %19 = vector.extract_strided_slice %3 {offsets = [1, 0, 0], sizes = [10, 10, 4], strides = [1, 1, 1]} : vector<11x11x4xf32> to vector<10x10x4xf32>
    %20 = vector.extract_strided_slice %6 {offsets = [1, 0, 0], sizes = [10, 10, 4], strides = [1, 1, 1]} : vector<11x11x4xf32> to vector<10x10x4xf32>
    %21 = vector.extract_strided_slice %3 {offsets = [1, 1, 0], sizes = [10, 10, 4], strides = [1, 1, 1]} : vector<11x11x4xf32> to vector<10x10x4xf32>
    %22 = tpu.concatenate %13, %14, %15, %16, %17, %18, %19, %20, %21 in 2 : vector<10x10x4xf32>, vector<10x10x4xf32>, vector<10x10x4xf32>, vector<10x10x4xf32>, vector<10x10x4xf32>, vector<10x10x4xf32>, vector<10x10x4xf32>, vector<10x10x4xf32>, vector<10x10x4xf32> -> vector<10x10x36xf32>
    %23 = vector.shape_cast %22 : vector<10x10x36xf32> to vector<100x36xf32>
    %c0_12 = arith.constant 0 : index
    %c0_13 = arith.constant 0 : index
    %24 = vector.load %arg3[%c0_12, %c0_13] : memref<36x128xf32, #tpu.memory_space<vmem>>, vector<36x128xf32>
    %cst = arith.constant dense<0.000000e+00> : vector<100x128xf32>
    %25 = tpu.matmul %23, %24, %cst {dimension_numbers = #tpu.dot_dimension_numbers<[1], [0], [0], [1], [0, 0, 1, 1], [], []>} : vector<100x36xf32>, vector<36x128xf32>, vector<100x128xf32> -> vector<100x128xf32>
    %c0_14 = arith.constant 0 : index
    %c0_15 = arith.constant 0 : index
    %26 = vector.load %arg4[%c0_14, %c0_15] : memref<1x128xf32, #tpu.memory_space<vmem>>, vector<1x128xf32>
    %27 = vector.broadcast %26 : vector<1x128xf32> to vector<100x128xf32>
    %28 = arith.addf %25, %27 : vector<100x128xf32>
    %cst_16 = arith.constant 0.000000e+00 : f32
    %29 = vector.broadcast %cst_16 : f32 to vector<100x128xf32>
    %30 = arith.maximumf %28, %29 : vector<100x128xf32>
    %31 = vector.shape_cast %30 : vector<100x128xf32> to vector<10x10x128xf32>
    %32 = tpu.iota {dimensions = array<i32: 0>} : vector<10x10x1xi32>
    %c1_i32 = arith.constant 1 : i32
    %33 = arith.subi %0, %c1_i32 : i32
    %34 = vector.broadcast %33 : i32 to vector<10x10x1xi32>
    %35 = arith.addi %32, %34 : vector<10x10x1xi32>
    %36 = tpu.iota {dimensions = array<i32: 1>} : vector<10x10x1xi32>
    %c1_i32_17 = arith.constant 1 : i32
    %37 = vector.broadcast %c1_i32_17 : i32 to vector<10x10x1xi32>
    %38 = arith.subi %36, %37 : vector<10x10x1xi32>
    %c0_i32 = arith.constant 0 : i32
    %39 = vector.broadcast %c0_i32 : i32 to vector<10x10x1xi32>
    %40 = arith.cmpi sge, %35, %39 : vector<10x10x1xi32>
    %c8_i32_18 = arith.constant 8 : i32
    %41 = vector.broadcast %c8_i32_18 : i32 to vector<10x10x1xi32>
    %42 = arith.cmpi slt, %35, %41 : vector<10x10x1xi32>
    %43 = arith.andi %40, %42 : vector<10x10x1xi1>
    %c0_i32_19 = arith.constant 0 : i32
    %44 = vector.broadcast %c0_i32_19 : i32 to vector<10x10x1xi32>
    %45 = arith.cmpi sge, %38, %44 : vector<10x10x1xi32>
    %46 = arith.andi %43, %45 : vector<10x10x1xi1>
    %c8_i32_20 = arith.constant 8 : i32
    %47 = vector.broadcast %c8_i32_20 : i32 to vector<10x10x1xi32>
    %48 = arith.cmpi slt, %38, %47 : vector<10x10x1xi32>
    %49 = arith.andi %46, %48 : vector<10x10x1xi1>
    %cst_21 = arith.constant 0.000000e+00 : f32
    %50 = vector.shape_cast %49 : vector<10x10x1xi1> to vector<10x10x1xi1>
    %51 = vector.broadcast %50 : vector<10x10x1xi1> to vector<10x10x128xi1>
    %52 = vector.broadcast %cst_21 : f32 to vector<10x10x128xf32>
    %53 = arith.select %51, %31, %52 : vector<10x10x128xi1>, vector<10x10x128xf32>
    %cst_22 = arith.constant 0.000000e+00 : f32
    %54 = vector.broadcast %cst_22 : f32 to vector<64x128xf32>
    %55 = vector.extract_strided_slice %53 {offsets = [0, 0, 0], sizes = [8, 8, 128], strides = [1, 1, 1]} : vector<10x10x128xf32> to vector<8x8x128xf32>
    %56 = vector.shape_cast %55 : vector<8x8x128xf32> to vector<64x128xf32>
    %c0_23 = arith.constant 0 : index
    %c0_24 = arith.constant 0 : index
    %c0_25 = arith.constant 0 : index
    %57 = vector.load %arg5[%c0_23, %c0_24, %c0_25] : memref<9x128x128xf32, #tpu.memory_space<vmem>>, vector<1x128x128xf32>
    %58 = vector.shape_cast %57 : vector<1x128x128xf32> to vector<128x128xf32>
    %cst_26 = arith.constant dense<0.000000e+00> : vector<64x128xf32>
    %59 = tpu.matmul %56, %58, %cst_26 {dimension_numbers = #tpu.dot_dimension_numbers<[1], [0], [0], [1], [0, 0, 1, 1], [], []>} : vector<64x128xf32>, vector<128x128xf32>, vector<64x128xf32> -> vector<64x128xf32>
    %60 = arith.addf %54, %59 : vector<64x128xf32>
    %61 = vector.extract_strided_slice %53 {offsets = [0, 1, 0], sizes = [8, 8, 128], strides = [1, 1, 1]} : vector<10x10x128xf32> to vector<8x8x128xf32>
    %62 = vector.shape_cast %61 : vector<8x8x128xf32> to vector<64x128xf32>
    %c1_27 = arith.constant 1 : index
    %c0_28 = arith.constant 0 : index
    %c0_29 = arith.constant 0 : index
    %63 = vector.load %arg5[%c1_27, %c0_28, %c0_29] : memref<9x128x128xf32, #tpu.memory_space<vmem>>, vector<1x128x128xf32>
    %64 = vector.shape_cast %63 : vector<1x128x128xf32> to vector<128x128xf32>
    %cst_30 = arith.constant dense<0.000000e+00> : vector<64x128xf32>
    %65 = tpu.matmul %62, %64, %cst_30 {dimension_numbers = #tpu.dot_dimension_numbers<[1], [0], [0], [1], [0, 0, 1, 1], [], []>} : vector<64x128xf32>, vector<128x128xf32>, vector<64x128xf32> -> vector<64x128xf32>
    %66 = arith.addf %60, %65 : vector<64x128xf32>
    %67 = vector.extract_strided_slice %53 {offsets = [0, 2, 0], sizes = [8, 8, 128], strides = [1, 1, 1]} : vector<10x10x128xf32> to vector<8x8x128xf32>
    %68 = vector.shape_cast %67 : vector<8x8x128xf32> to vector<64x128xf32>
    %c2_31 = arith.constant 2 : index
    %c0_32 = arith.constant 0 : index
    %c0_33 = arith.constant 0 : index
    %69 = vector.load %arg5[%c2_31, %c0_32, %c0_33] : memref<9x128x128xf32, #tpu.memory_space<vmem>>, vector<1x128x128xf32>
    %70 = vector.shape_cast %69 : vector<1x128x128xf32> to vector<128x128xf32>
    %cst_34 = arith.constant dense<0.000000e+00> : vector<64x128xf32>
    %71 = tpu.matmul %68, %70, %cst_34 {dimension_numbers = #tpu.dot_dimension_numbers<[1], [0], [0], [1], [0, 0, 1, 1], [], []>} : vector<64x128xf32>, vector<128x128xf32>, vector<64x128xf32> -> vector<64x128xf32>
    %72 = arith.addf %66, %71 : vector<64x128xf32>
    %73 = vector.extract_strided_slice %53 {offsets = [1, 0, 0], sizes = [8, 8, 128], strides = [1, 1, 1]} : vector<10x10x128xf32> to vector<8x8x128xf32>
    %74 = vector.shape_cast %73 : vector<8x8x128xf32> to vector<64x128xf32>
    %c3_35 = arith.constant 3 : index
    %c0_36 = arith.constant 0 : index
    %c0_37 = arith.constant 0 : index
    %75 = vector.load %arg5[%c3_35, %c0_36, %c0_37] : memref<9x128x128xf32, #tpu.memory_space<vmem>>, vector<1x128x128xf32>
    %76 = vector.shape_cast %75 : vector<1x128x128xf32> to vector<128x128xf32>
    %cst_38 = arith.constant dense<0.000000e+00> : vector<64x128xf32>
    %77 = tpu.matmul %74, %76, %cst_38 {dimension_numbers = #tpu.dot_dimension_numbers<[1], [0], [0], [1], [0, 0, 1, 1], [], []>} : vector<64x128xf32>, vector<128x128xf32>, vector<64x128xf32> -> vector<64x128xf32>
    %78 = arith.addf %72, %77 : vector<64x128xf32>
    %79 = vector.extract_strided_slice %53 {offsets = [1, 1, 0], sizes = [8, 8, 128], strides = [1, 1, 1]} : vector<10x10x128xf32> to vector<8x8x128xf32>
    %80 = vector.shape_cast %79 : vector<8x8x128xf32> to vector<64x128xf32>
    %c4 = arith.constant 4 : index
    %c0_39 = arith.constant 0 : index
    %c0_40 = arith.constant 0 : index
    %81 = vector.load %arg5[%c4, %c0_39, %c0_40] : memref<9x128x128xf32, #tpu.memory_space<vmem>>, vector<1x128x128xf32>
    %82 = vector.shape_cast %81 : vector<1x128x128xf32> to vector<128x128xf32>
    %cst_41 = arith.constant dense<0.000000e+00> : vector<64x128xf32>
    %83 = tpu.matmul %80, %82, %cst_41 {dimension_numbers = #tpu.dot_dimension_numbers<[1], [0], [0], [1], [0, 0, 1, 1], [], []>} : vector<64x128xf32>, vector<128x128xf32>, vector<64x128xf32> -> vector<64x128xf32>
    %84 = arith.addf %78, %83 : vector<64x128xf32>
    %85 = vector.extract_strided_slice %53 {offsets = [1, 2, 0], sizes = [8, 8, 128], strides = [1, 1, 1]} : vector<10x10x128xf32> to vector<8x8x128xf32>
    %86 = vector.shape_cast %85 : vector<8x8x128xf32> to vector<64x128xf32>
    %c5 = arith.constant 5 : index
    %c0_42 = arith.constant 0 : index
    %c0_43 = arith.constant 0 : index
    %87 = vector.load %arg5[%c5, %c0_42, %c0_43] : memref<9x128x128xf32, #tpu.memory_space<vmem>>, vector<1x128x128xf32>
    %88 = vector.shape_cast %87 : vector<1x128x128xf32> to vector<128x128xf32>
    %cst_44 = arith.constant dense<0.000000e+00> : vector<64x128xf32>
    %89 = tpu.matmul %86, %88, %cst_44 {dimension_numbers = #tpu.dot_dimension_numbers<[1], [0], [0], [1], [0, 0, 1, 1], [], []>} : vector<64x128xf32>, vector<128x128xf32>, vector<64x128xf32> -> vector<64x128xf32>
    %90 = arith.addf %84, %89 : vector<64x128xf32>
    %91 = vector.extract_strided_slice %53 {offsets = [2, 0, 0], sizes = [8, 8, 128], strides = [1, 1, 1]} : vector<10x10x128xf32> to vector<8x8x128xf32>
    %92 = vector.shape_cast %91 : vector<8x8x128xf32> to vector<64x128xf32>
    %c6 = arith.constant 6 : index
    %c0_45 = arith.constant 0 : index
    %c0_46 = arith.constant 0 : index
    %93 = vector.load %arg5[%c6, %c0_45, %c0_46] : memref<9x128x128xf32, #tpu.memory_space<vmem>>, vector<1x128x128xf32>
    %94 = vector.shape_cast %93 : vector<1x128x128xf32> to vector<128x128xf32>
    %cst_47 = arith.constant dense<0.000000e+00> : vector<64x128xf32>
    %95 = tpu.matmul %92, %94, %cst_47 {dimension_numbers = #tpu.dot_dimension_numbers<[1], [0], [0], [1], [0, 0, 1, 1], [], []>} : vector<64x128xf32>, vector<128x128xf32>, vector<64x128xf32> -> vector<64x128xf32>
    %96 = arith.addf %90, %95 : vector<64x128xf32>
    %97 = vector.extract_strided_slice %53 {offsets = [2, 1, 0], sizes = [8, 8, 128], strides = [1, 1, 1]} : vector<10x10x128xf32> to vector<8x8x128xf32>
    %98 = vector.shape_cast %97 : vector<8x8x128xf32> to vector<64x128xf32>
    %c7 = arith.constant 7 : index
    %c0_48 = arith.constant 0 : index
    %c0_49 = arith.constant 0 : index
    %99 = vector.load %arg5[%c7, %c0_48, %c0_49] : memref<9x128x128xf32, #tpu.memory_space<vmem>>, vector<1x128x128xf32>
    %100 = vector.shape_cast %99 : vector<1x128x128xf32> to vector<128x128xf32>
    %cst_50 = arith.constant dense<0.000000e+00> : vector<64x128xf32>
    %101 = tpu.matmul %98, %100, %cst_50 {dimension_numbers = #tpu.dot_dimension_numbers<[1], [0], [0], [1], [0, 0, 1, 1], [], []>} : vector<64x128xf32>, vector<128x128xf32>, vector<64x128xf32> -> vector<64x128xf32>
    %102 = arith.addf %96, %101 : vector<64x128xf32>
    %103 = vector.extract_strided_slice %53 {offsets = [2, 2, 0], sizes = [8, 8, 128], strides = [1, 1, 1]} : vector<10x10x128xf32> to vector<8x8x128xf32>
    %104 = vector.shape_cast %103 : vector<8x8x128xf32> to vector<64x128xf32>
    %c8 = arith.constant 8 : index
    %c0_51 = arith.constant 0 : index
    %c0_52 = arith.constant 0 : index
    %105 = vector.load %arg5[%c8, %c0_51, %c0_52] : memref<9x128x128xf32, #tpu.memory_space<vmem>>, vector<1x128x128xf32>
    %106 = vector.shape_cast %105 : vector<1x128x128xf32> to vector<128x128xf32>
    %cst_53 = arith.constant dense<0.000000e+00> : vector<64x128xf32>
    %107 = tpu.matmul %104, %106, %cst_53 {dimension_numbers = #tpu.dot_dimension_numbers<[1], [0], [0], [1], [0, 0, 1, 1], [], []>} : vector<64x128xf32>, vector<128x128xf32>, vector<64x128xf32> -> vector<64x128xf32>
    %108 = arith.addf %102, %107 : vector<64x128xf32>
    %c0_54 = arith.constant 0 : index
    %c0_55 = arith.constant 0 : index
    %109 = vector.load %arg6[%c0_54, %c0_55] : memref<1x128xf32, #tpu.memory_space<vmem>>, vector<1x128xf32>
    %110 = vector.broadcast %109 : vector<1x128xf32> to vector<64x128xf32>
    %111 = arith.addf %108, %110 : vector<64x128xf32>
    %112 = vector.extract_strided_slice %12 {offsets = [1, 1, 0], sizes = [8, 8, 4], strides = [1, 1, 1]} : vector<11x11x4xf32> to vector<8x8x4xf32>
    %113 = vector.shape_cast %112 : vector<8x8x4xf32> to vector<64x4xf32>
    %c0_56 = arith.constant 0 : index
    %c0_57 = arith.constant 0 : index
    %114 = vector.load %arg7[%c0_56, %c0_57] : memref<4x128xf32, #tpu.memory_space<vmem>>, vector<4x128xf32>
    %cst_58 = arith.constant dense<0.000000e+00> : vector<64x128xf32>
    %115 = tpu.matmul %113, %114, %cst_58 {dimension_numbers = #tpu.dot_dimension_numbers<[1], [0], [0], [1], [0, 0, 1, 1], [], []>} : vector<64x4xf32>, vector<4x128xf32>, vector<64x128xf32> -> vector<64x128xf32>
    %116 = arith.addf %111, %115 : vector<64x128xf32>
    %c0_59 = arith.constant 0 : index
    %c0_60 = arith.constant 0 : index
    %117 = vector.load %arg8[%c0_59, %c0_60] : memref<1x128xf32, #tpu.memory_space<vmem>>, vector<1x128xf32>
    %118 = vector.broadcast %117 : vector<1x128xf32> to vector<64x128xf32>
    %119 = arith.addf %116, %118 : vector<64x128xf32>
    %cst_61 = arith.constant 0.000000e+00 : f32
    %120 = vector.broadcast %cst_61 : f32 to vector<64x128xf32>
    %121 = arith.maximumf %119, %120 : vector<64x128xf32>
    %122 = vector.shape_cast %121 : vector<64x128xf32> to vector<1x8x8x128xf32>
    %c0_62 = arith.constant 0 : index
    %c0_63 = arith.constant 0 : index
    %c0_64 = arith.constant 0 : index
    %c0_65 = arith.constant 0 : index
    %123 = vector.load %arg9[%c0_62, %c0_63, %c0_64, %c0_65] : memref<1x8x8x128xf32, #tpu.memory_space<vmem>>, vector<1x8x8x128xf32>
    tpu.vector_store %arg9[%c0_62, %c0_63, %c0_64, %c0_65], %122 {strides = array<i32>} : memref<1x8x8x128xf32, #tpu.memory_space<vmem>>, vector<1x8x8x128xf32>,
    return
  }
  func.func @transform_0(%arg0: i32, %arg1: i32) -> (i32, i32, i32, i32, i32) {
    %c0_i32 = arith.constant 0 : i32
    %c0_i32_0 = arith.constant 0 : i32
    %c0_i32_1 = arith.constant 0 : i32
    %c0_i32_2 = arith.constant 0 : i32
    %c0_i32_3 = arith.constant 0 : i32
    return %arg0, %c0_i32, %c0_i32_0, %c0_i32_1, %c0_i32_2 : i32, i32, i32, i32, i32
  }
  func.func @transform_1(%arg0: i32, %arg1: i32) -> (i32, i32) {
    %c0_i32 = arith.constant 0 : i32
    %c0_i32_0 = arith.constant 0 : i32
    %c0_i32_1 = arith.constant 0 : i32
    return %c0_i32, %c0_i32_0 : i32, i32
  }
  func.func @transform_2(%arg0: i32, %arg1: i32) -> (i32, i32) {
    %c0_i32 = arith.constant 0 : i32
    %c0_i32_0 = arith.constant 0 : i32
    %c0_i32_1 = arith.constant 0 : i32
    return %c0_i32, %c0_i32_0 : i32, i32
  }
  func.func @transform_3(%arg0: i32, %arg1: i32) -> (i32, i32, i32) {
    %c0_i32 = arith.constant 0 : i32
    %c0_i32_0 = arith.constant 0 : i32
    %c0_i32_1 = arith.constant 0 : i32
    %c0_i32_2 = arith.constant 0 : i32
    return %c0_i32, %c0_i32_0, %c0_i32_1 : i32, i32, i32
  }
  func.func @transform_4(%arg0: i32, %arg1: i32) -> (i32, i32) {
    %c0_i32 = arith.constant 0 : i32
    %c0_i32_0 = arith.constant 0 : i32
    %c0_i32_1 = arith.constant 0 : i32
    return %c0_i32, %c0_i32_0 : i32, i32
  }
  func.func @transform_5(%arg0: i32, %arg1: i32) -> (i32, i32) {
    %c0_i32 = arith.constant 0 : i32
    %c0_i32_0 = arith.constant 0 : i32
    %c0_i32_1 = arith.constant 0 : i32
    return %c0_i32, %c0_i32_0 : i32, i32
  }
  func.func @transform_6(%arg0: i32, %arg1: i32) -> (i32, i32) {
    %c0_i32 = arith.constant 0 : i32
    %c0_i32_0 = arith.constant 0 : i32
    %c0_i32_1 = arith.constant 0 : i32
    return %c0_i32, %c0_i32_0 : i32, i32
  }
  func.func @transform_7(%arg0: i32, %arg1: i32) -> (i32, i32, i32, i32) {
    %c0_i32 = arith.constant 0 : i32
    %c0_i32_0 = arith.constant 0 : i32
    %c0_i32_1 = arith.constant 0 : i32
    return %arg0, %arg1, %c0_i32, %c0_i32_0 : i32, i32, i32, i32
  }
}

</mosaic_0001>

<bundles_post_ra>
// kernel: tpu_custom_call.1
= control target key start
LH: loop header
LB: loop body
LE: loop exit
PB: predicated region body
PF: predicated region fallthrough
CT: control target
= control target key end

     0   :  { %12 = vsyncpa [#allocation3], 0  ;;  %s7438_s0 = inlined_call_operand.vmem [shape: f32[2,4,11,11,4], index: 0, kind: input, shape index: {}]   ;;  %s7439_s1 = inlined_call_operand.vmem [shape: f32[36,128], index: 1, kind: input, shape index: {}]   ;;  %s7440_s2 = inlined_call_operand.vmem [shape: f32[1,128], index: 2, kind: input, shape index: {}]   ;;  %s7441_s3 = inlined_call_operand.vmem [shape: f32[9,128,128], index: 3, kind: input, shape index: {}]   ;;  %s7442_s4 = inlined_call_operand.vmem [shape: f32[1,128], index: 4, kind: input, shape index: {}]   ;;  %s7443_s5 = inlined_call_operand.vmem [shape: f32[4,128], index: 5, kind: input, shape index: {}]   ;;  %s7444_s6 = inlined_call_operand.vmem [shape: f32[1,128], index: 6, kind: input, shape index: {}]   ;;  %s7445_s7 = inlined_call_operand.hbm [shape: f32[2,8,8,128], index: 7, kind: output, shape index: {}]  }
   0x1   :  { %14 = vsyncpa [#allocation3 + $0x1], 0  ;;  %s5582_s24 = smov 0   ;;  %s5584_s25 = smov 0  }
   0x2   :  { %s5586_s26 = smov 0   ;;  %s5588_s27 = smov 0  }
   0x3   :  { %s5590_s28 = smov 0   ;;  %s5592_s29 = smov 0  }
   0x4 LB: > { %s4031_s30 = sadd.s32 4294967295, %s5526_s29   ;;  %s4032_s8 = sadd.s32 4294967294, %s5526_s29   ;;  %s5526_s29 = sphi %s5592_s29, %s20_s29   ;;  %s5522_s28 = sphi %s5590_s28, %s7458_s28   ;;  %s5518_s27 = sphi %s5588_s27, %s7457_s27   ;;  %s5514_s26 = sphi %s5586_s26, %s7456_s26   ;;  %s5510_s25 = sphi %s5584_s25, %s7455_s25   ;;  %s5506_s24 = sphi %s5582_s24, %s7454_s24  }
   0x5   : > { %s32_s9 = sadd.s32 1, %s5522_s28  ;;  %s193_s10 = sadd.s32 1, %s5514_s26 }
   0x6   : > { %p34_p0 = scmp.ge.s32.totalorder %s32_s9, 2  ;;  %p203_p1 = scmp.ne.s32.totalorder %s5514_s26, %s5510_s25 }
   0x7   : > { %p204_p2 = scmp.eq.s32.totalorder %s4031_s30, 1  ;;  %p209_p3 = scmp.ne.s32.totalorder %s5510_s25, %s5506_s24 }
   0x8   : > { %s7460_s9 = smov (%p34_p0, %s32_s9), 0  ;;  %p210_p5 = scmp.eq.s32.totalorder %s4032_s8, 1 }
   0x9   : > { %p5622_p4 = por %p204_p2, %p203_p1  ;;  %s188_s12 = ssub.s32 %s5522_s28, %s7460_s9 }
   0xa   : > { %p4035_p6 = scmp.ge.s32.totalorder %s5526_s29, 1  ;;  %p191_p7 = scmp.eq.s32.totalorder %s188_s12, 0 }
   0xb   : > { %p5629_p8 = por %p210_p5, %p209_p3  ;;  %p254_p9 = scmp.lt.s32.totalorder %s5526_s29, 3 }
   0xc   : > { %s5635_s14 = scalar_select %p191_p7, %s5514_s26, %s193_s10  }
   0xd   : > { %p255_p10 = pnand %p4035_p6, %p254_p9 }
   0xe   : > { %p286_p11 = scmp.lt.s32.totalorder (!%p255_p10), %s5518_s27, 1  ;;  %s5528_s20 = smov (!%p255_p10), 12   ;;  %vm485_vm0 = vcmask (!%p255_p10), 1046528   ;;  %v5532_v14 = vmov (!%p255_p10), 0.0|0.0   ;;  %v1441_v19 = vld [vmem:[%s7439_s1] sm:$0xff] (!%p255_p10)  ;;  %v1442_v20 = vld [vmem:[%s7439_s1 + $0x8] sm:$0xff] (!%p255_p10) }
   0xf   : > { %258 = sbr.rel (%p255_p10) target bundleno = 1032 (0x408), region = 48  ;;  %s5529_s21 = smov (!%p255_p10), 4   ;;  %4986 = vmatprep.subr.bf16.mxu0 (!%p255_p10), %v5532_v14  ;;  %v4987_v21 = vpack.c.bf16 (!%p255_p10), %v1442_v20, %v1441_v19  ;;  %v1443_v22 = vld [vmem:[%s7439_s1 + $0x10] sm:$0xff] (!%p255_p10)  ;;  %v1444_v25 = vld [vmem:[%s7439_s1 + $0x18] sm:$0xff] (!%p255_p10)  ;;  %vm5537_vm1 = vmmov (!%p255_p10), 0   ;;  %v5538_v26 = vmov (!%p255_p10), 0.0  }
  0x10   : > { %s5530_s22 = smov (!%p255_p10), 16   ;;  %s5531_s23 = smov (!%p255_p10), 8   ;;  %4537 = vmatprep.mubr.msk.f32.mxu0 (!%p255_p10), %vm5537_vm1, %v5538_v26  ;;  %v4990_v27 = vpack.c.bf16 (!%p255_p10), %v1444_v25, %v1443_v22  ;;  %v1445_v32 = vld [vmem:[%s7439_s1 + $0x20] sm:$0xf] (!%p255_p10)  ;;  %vm1692_vm2 = vcmask (!%p255_p10), 1043456   ;;  %vm1013_vm3 = vcmask (!%p255_p10), 31744  }
  0x11   : > { %s7448_s30 = smov (!%p255_p10), 24   ;;  %s5534_s8 = smov (!%p255_p10), 20   ;;  %4988 = vmatpush3.bf16.msra.mxu0 (!%p255_p10), %v4987_v21  ;;  %vm1034_vm4 = vcmask (!%p255_p10), 64512   ;;  %vm1055_vm5 = vcmask (!%p255_p10), 97280   ;;  %vm1076_vm6 = vcmask (!%p255_p10), 130048   ;;  %vm1097_vm7 = vcmask (!%p255_p10), 162816  }
  0x12   : > { %s7446_s10 = smov (!%p255_p10), 28   ;;  %s5536_s18 = smov (!%p255_p10), 32   ;;  %4989 = vmatprep.subr.bf16.mxu0 (!%p255_p10), %v5532_v14  ;;  %v5539_v21 = vmov (!%p255_p10), 1983009808   ;;  %vm1118_vm8 = vcmask (!%p255_p10), 195584   ;;  %vm1139_vm9 = vcmask (!%p255_p10), 228352  }
  0x13   : > { %s7453_s17 = smov (!%p255_p10), 28   ;;  %v1203_v22 = vunpack.c.l.s4 (!%p255_p10), %v5539_v21  ;;  %vm1160_vm10 = vcmask (!%p255_p10), 261120   ;;  %vm1665_vm11 = vcmask (!%p255_p10), 293888   ;;  %vm2765_vm14 = vcmask (!%p255_p10), 1045504   ;;  %s5540_s12 = smov (!%p255_p10), [#allocation2]  }
  0x15   : > { %4991 = vmatpush3.bf16.msra.mxu0 (!%p255_p10), %v4990_v27 }
  0x16   : > { %s287_s15 = scalar_select %p286_p11, %s5518_s27, 1  ;;  %4535 = vmatprep.subr.mxu0 %v5538_v26 }
  0x18   : > { %s5362_s16 = smul.u32 704, %s287_s15  ;;  %s5452_s15 = sshll.u32 %s5540_s12, 4  ;;  %s5453_s15 = int_to_ptr.vmem [resolvable:$false] %s5452_s15 }
  0x19   : > { %4536 = vmatpush3.msk.msra.mxu0 %vm1692_vm2, %v1445_v32 }
  0x1a   : > { %s5642_s19 = scalar_lea.vmem %s7438_s0, %s5362_s16  ;;  %s7452_s16 = smov 24  }
  0x1b   : > { %v4060_v0 = vld [vmem:[%s5642_s19 + $0x160] sm:$0xff]  ;;  %v4038_v1 = vld [vmem:[%s5642_s19 + $0xb0] sm:$0xff]  ;;  %v5652_v3 = vld [vmem:[%s5642_s19 + $0x8] sm:$0x7] }
  0x1c   : > { %596 = vrot.lane.b32.xlu1 %v4060_v0, %s5528_s20  ;;  %405 = vrot.lane.b32.xlu0 %v4038_v1, %s5529_s21  ;;  %v5649_v2 = vld [vmem:[%s5642_s19] sm:$0xff]  ;;  %v736_v4 = vrot.slane %v4060_v0, 1  ;;  %v4080_v5 = vld [vmem:[%s5642_s19 + $0x210] sm:$0xff]  ;;  %v487_v7 = vrot.slane %v5652_v3, 1 }
  0x1d   : > { %v486_v6 = vrot.slane %v5649_v2, 1  ;;  %v5658_v8 = vld [vmem:[%s5642_s19 + $0x168] sm:$0x7]  ;;  %v5665_v11 = vld [vmem:[%s5642_s19 + $0x10] sm:$0xff]  ;;  %v5671_v13 = vld [vmem:[%s5642_s19 + $0x18] sm:$0x7] }
  0x1e   : > { %v737_v9 = vrot.slane %v5658_v8, 1  ;;  %v489_v15 = vrot.slane %v5665_v11, 1  ;;  %v4040_v16 = vld [vmem:[%s5642_s19 + $0xc0] sm:$0xff]  ;;  %v5679_v17 = vrot.slane %v5671_v13, 1  ;;  %v4062_v23 = vld [vmem:[%s5642_s19 + $0x170] sm:$0xff] }
  0x1f   : > { %v488_v10 = vsel %vm485_vm0, %v486_v6, %v487_v7  ;;  %v4039_v24 = vld [vmem:[%s5642_s19 + $0xb8] sm:$0x7]  ;;  %v4082_v28 = vld [vmem:[%s5642_s19 + $0x220] sm:$0xff]  ;;  %v5710_v30 = vld [vmem:[%s5642_s19 + $0x28] sm:$0x7]  ;;  %v739_v33 = vrot.slane %v4062_v23, 1 }
  0x20   : > { %676 = vrot.lane.b32.xlu1 %v4080_v5, %s5530_s22  ;;  %516 = vrot.lane.b32.xlu0 %v488_v10, %s5531_s23  ;;  %v738_v12 = vsel %vm485_vm0, %v736_v4, %v737_v9  ;;  %v491_v18 = vsel %vm485_vm0, %v489_v15, %v5679_v17  ;;  %v5707_v29 = vld [vmem:[%s5642_s19 + $0x20] sm:$0xff]  ;;  %v4063_v31 = vld [vmem:[%s5642_s19 + $0x178] sm:$0x7]  ;;  %v493_v36 = vrot.slane %v5710_v30, 1 }
  0x21   : > { %v4042_v34 = vld [vmem:[%s5642_s19 + $0xd0] sm:$0xff]  ;;  %v492_v35 = vrot.slane %v5707_v29, 1  ;;  %v740_v37 = vrot.slane %v4063_v31, 1  ;;  %v4081_v40 = vld [vmem:[%s5642_s19 + $0x218] sm:$0x7]  ;;  %v4064_v41 = vld [vmem:[%s5642_s19 + $0x180] sm:$0xff] }
  0x22   : > { %v4041_v42 = vld [vmem:[%s5642_s19 + $0xc8] sm:$0x7]  ;;  %v4084_v43 = vld [vmem:[%s5642_s19 + $0x230] sm:$0xff]  ;;  %v742_v45 = vrot.slane %v4064_v41, 1  ;;  %v4044_v50 = vld [vmem:[%s5642_s19 + $0xe0] sm:$0xff] }
  0x23   : > { %v494_v38 = vsel %vm485_vm0, %v492_v35, %v493_v36  ;;  %v741_v39 = vsel %vm485_vm0, %v739_v33, %v740_v37  ;;  %v4065_v44 = vld [vmem:[%s5642_s19 + $0x188] sm:$0x7]  ;;  %v5757_v49 = vld [vmem:[%s5642_s19 + $0x30] sm:$0xff]  ;;  %v4043_v51 = vld [vmem:[%s5642_s19 + $0xd8] sm:$0x7] }
  0x24   : > { %828 = vrot.lane.b32.xlu1 %v5665_v11, %s7448_s30  ;;  %766 = vrot.lane.b32.xlu0 %v738_v12, %s5534_s8  ;;  %v743_v46 = vrot.slane %v4065_v44, 1  ;;  %v4083_v48 = vld [vmem:[%s5642_s19 + $0x228] sm:$0x7]  ;;  %v5766_v52 = vld [vmem:[%s5642_s19 + $0x38] sm:$0x7]  ;;  %v495_v53 = vrot.slane %v5757_v49, 1 }
  0x25   : > { %v5772_v54 = vrot.slane %v5766_v52, 1  ;;  %v4066_v56 = vld [vmem:[%s5642_s19 + $0x190] sm:$0xff]  ;;  %v4085_v57 = vld [vmem:[%s5642_s19 + $0x238] sm:$0x7]  ;;  %v4086_v58 = vld [vmem:[%s5642_s19 + $0x240] sm:$0xff]  ;;  %s5454_s30 = scalar_lea.vmem %s5453_s15, 2048 }
  0x26   : > { %v744_v47 = vsel %vm485_vm0, %v742_v45, %v743_v46  ;;  %v4067_v59 = vld [vmem:[%s5642_s19 + $0x198] sm:$0x7]  ;;  %v745_v60 = vrot.slane %v4066_v56, 1  ;;  %v4046_v61 = vld [vmem:[%s5642_s19 + $0xf0] sm:$0xff]  ;;  %v4045_v62 = vld [vmem:[%s5642_s19 + $0xe8] sm:$0x7] }
  0x27   : > { %v497_v55 = vsel %vm485_vm0, %v495_v53, %v5772_v54  ;;  %v746_v63 = vrot.slane %v4067_v59, 1  ;;  %v5796_v0 = vld [vmem:[%s5642_s19 + $0x40] sm:$0xff]  ;;  %v5799_v1 = vld [vmem:[%s5642_s19 + $0x48] sm:$0x7]  ;;  %v4088_v12 = vld [vmem:[%s5642_s19 + $0x250] sm:$0xff] }
  0x28   : > { %890 = vrot.lane.b32.xlu1 %v4040_v16, %s7446_s10  ;;  %409 = vrot.lane.b32.xlu0 %v4040_v16, %s5529_s21  ;;  %v498_v5 = vrot.slane %v5796_v0, 1  ;;  %v5806_v6 = vrot.slane %v5799_v1, 1  ;;  %v4087_v14 = vld [vmem:[%s5642_s19 + $0x248] sm:$0x7]  ;;  %s4283_s10 = sshll.u32 %s5518_s27, 10 }
  0x29   : > { %v747_v4 = vsel %vm485_vm0, %v745_v60, %v746_v63 }
  0x2c   : > { %953 = vrot.lane.b32.xlu1 %v491_v18, %s5536_s18  ;;  %520 = vrot.lane.b32.xlu0 %v491_v18, %s5531_s23  ;;  %v5829_v18 = vld [vmem:[%s5642_s19 + $0x1a8] sm:$0x7] }
  0x2d   : > { %v749_v25 = vrot.slane %v5829_v18, 1 }
  0x30   : > { %600 = vrot.lane.b32.xlu1 %v4062_v23, %s5528_s20  ;;  %407 = vrot.lane.b32.xlu0 %v4039_v24, %s5529_s21  ;;  %v1205_v23 = vlaneseq }
  0x32   : > { %v5840_v32 = vshrl.u32 %v1205_v23, 7 }
  0x34   : > { %680 = vrot.lane.b32.xlu1 %v4082_v28, %s5530_s22  ;;  %518 = vrot.lane.b32.xlu0 %v487_v7, %s5531_s23  ;;  %v500_v7 = vsel %vm485_vm0, %v498_v5, %v5806_v6 }
  0x38   : > { %598 = vrot.lane.b32.xlu1 %v5658_v8, %s5528_s20  ;;  %413 = vrot.lane.b32.xlu0 %v4042_v34, %s5529_s21  ;;  %v4068_v8 = vld [vmem:[%s5642_s19 + $0x1a0] sm:$0xff] }
  0x39   : > { %v748_v24 = vrot.slane %v4068_v8, 1 }
  0x3b   : > { %v750_v33 = vsel %vm485_vm0, %v748_v24, %v749_v25 }
  0x3c   : > { %524 = vrot.lane.b32.xlu1 %v494_v38, %s5531_s23  ;;  %770 = vrot.lane.b32.xlu0 %v741_v39, %s5534_s8  ;;  %v5855_v39 = vld [vmem:[%s5642_s19 + $0x50] sm:$0xff] }
  0x40   : > { %832 = vrot.lane.b32.xlu1 %v5707_v29, %s7452_s16  ;;  %678 = vrot.lane.b32.xlu0 %v4081_v40, %s5530_s22 }
  0x44   : > { %604 = vrot.lane.b32.xlu1 %v4064_v41, %s5528_s20  ;;  %411 = vrot.lane.b32.xlu0 %v4041_v42, %s5529_s21 }
  0x48   : > { %894 = vrot.lane.b32.xlu1 %v4042_v34, %s7453_s17  ;;  %768 = vrot.lane.b32.xlu0 %v737_v9, %s5534_s8 }
  0x4c   : > { %684 = vrot.lane.b32.xlu1 %v4084_v43, %s5530_s22  ;;  %522 = vrot.lane.b32.xlu0 %v5679_v17, %s5531_s23  ;;  %v5861_v43 = vld [vmem:[%s5642_s19 + $0x58] sm:$0x7] }
  0x50   : > { %957 = vrot.lane.b32.xlu1 %v494_v38, %s5536_s18  ;;  %830 = vrot.lane.b32.xlu0 %v5671_v13, %s7452_s16 }
  0x54   : > { %774 = vrot.lane.b32.xlu1 %v744_v47, %s5534_s8  ;;  %602 = vrot.lane.b32.xlu0 %v4063_v31, %s5528_s20  ;;  %v1204_v31 = vunpack.c.0.s8 %v1203_v22  ;;  %v501_v47 = vrot.slane %v5855_v39, 1  ;;  %v4050_v22 = vld [vmem:[%s5642_s19 + $0x110] sm:$0xff] }
  0x58   : > { %682 = vrot.lane.b32.xlu1 %v4083_v48, %s5530_s22  ;;  %892 = vrot.lane.b32.xlu0 %v4041_v42, %s7453_s17  ;;  %v4047_v48 = vld [vmem:[%s5642_s19 + $0xf8] sm:$0x7] }
  0x5c   : > { %955 = vrot.lane.b32.xlu1 %v5679_v17, %s5536_s18  ;;  %836 = vrot.lane.b32.xlu0 %v5757_v49, %s7452_s16 }
  0x60   : > { %417 = vrot.lane.b32.xlu1 %v4044_v50, %s5529_s21  ;;  %415 = vrot.lane.b32.xlu0 %v4043_v51, %s5529_s21 }
  0x64   : > { %898 = vrot.lane.b32.xlu1 %v4044_v50, %s7453_s17  ;;  %772 = vrot.lane.b32.xlu0 %v740_v37, %s5534_s8  ;;  %v5851_v37 = vsub.s32 %v1204_v31, %v5840_v32  ;;  %v4048_v50 = vld [vmem:[%s5642_s19 + $0x100] sm:$0xff] }
  0x68   : > { %528 = vrot.lane.b32.xlu1 %v497_v55, %s5531_s23  ;;  %526 = vrot.lane.b32.xlu0 %v493_v36, %s5531_s23 }
  0x6c   : > { %961 = vrot.lane.b32.xlu1 %v497_v55, %s5536_s18  ;;  %834 = vrot.lane.b32.xlu0 %v5710_v30, %s7452_s16 }
  0x70   : > { %608 = vrot.lane.b32.xlu1 %v4066_v56, %s5528_s20  ;;  %606 = vrot.lane.b32.xlu0 %v4065_v44, %s5528_s20 }
  0x74   : > { %686 = vrot.lane.b32.xlu1 %v4085_v57, %s5530_s22  ;;  %896 = vrot.lane.b32.xlu0 %v4043_v51, %s7453_s17  ;;  %v5873_v51 = vrot.slane %v5861_v43, 1 }
  0x78   : > { %959 = vrot.lane.b32.xlu1 %v493_v36, %s5536_s18  ;;  %688 = vrot.lane.b32.xlu0 %v4086_v58, %s5530_s22 }
  0x7c   : > { %421 = vrot.lane.b32.xlu1 %v4046_v61, %s5529_s21  ;;  %419 = vrot.lane.b32.xlu0 %v4045_v62, %s5529_s21 }
  0x80   : > { %778 = vrot.lane.b32.xlu1 %v747_v4, %s5534_s8  ;;  %776 = vrot.lane.b32.xlu0 %v743_v46, %s5534_s8 }
  0x84   : > { %532 = vrot.lane.b32.xlu1 %v500_v7, %s5531_s23  ;;  %530 = vrot.lane.b32.xlu0 %v5772_v54, %s5531_s23 }
  0x88   : > { %840 = vrot.lane.b32.xlu1 %v5796_v0, %s7452_s16  ;;  %838 = vrot.lane.b32.xlu0 %v5766_v52, %s7452_s16 }
  0x8c   : > { %612 = vrot.lane.b32.xlu1 %v4068_v8, %s5528_s20  ;;  %610 = vrot.lane.b32.xlu0 %v4067_v59, %s5528_s20  ;;  %v503_v59 = vsel %vm485_vm0, %v501_v47, %v5873_v51  ;;  %v4072_v47 = vld [vmem:[%s5642_s19 + $0x1c0] sm:$0xff] }
  0x8e   : > { %v597_v9 = vpop.permute.xlu1 %596  ;;  %v406_v10 = vpop.permute.xlu0 %405 }
  0x8f   : > { %v1014_v15 = vsel %vm1013_vm3, %v5649_v2, %v406_v10 }
  0x90   : > { %902 = vrot.lane.b32.xlu1 %v4046_v61, %s7453_s17  ;;  %900 = vrot.lane.b32.xlu0 %v4045_v62, %s7453_s17 }
  0x92   : > { %v677_v16 = vpop.permute.xlu1 %676  ;;  %v517_v17 = vpop.permute.xlu0 %516 }
  0x93   : > { %v1035_v19 = vsel %vm1034_vm4, %v1014_v15, %v517_v17  ;;  %v5905_v17 = vld [vmem:[%s5642_s19 + $0x60] sm:$0xff] }
  0x94   : > { %v1056_v20 = vsel %vm1055_vm5, %v1035_v19, %v597_v9  ;;  %692 = vrot.lane.b32.xlu1 %v4088_v12, %s5530_s22  ;;  %690 = vrot.lane.b32.xlu0 %v4087_v14, %s5530_s22  ;;  %v4070_v9 = vld [vmem:[%s5642_s19 + $0x1b0] sm:$0xff]  ;;  %v4090_v14 = vld [vmem:[%s5642_s19 + $0x260] sm:$0xff]  ;;  %v504_v23 = vrot.slane %v5905_v17, 1 }
  0x95   : > { %v1077_v28 = vsel %vm1076_vm6, %v1056_v20, %v677_v16  ;;  %v5908_v19 = vld [vmem:[%s5642_s19 + $0x68] sm:$0x7]  ;;  %v5911_v20 = vld [vmem:[%s5642_s19 + $0x1b8] sm:$0x7]  ;;  %v751_v21 = vrot.slane %v4070_v9, 1 }
  0x96   : > { %v829_v2 = vpop.permute.xlu1 %828  ;;  %v767_v27 = vpop.permute.xlu0 %766  ;;  %v5919_v24 = vrot.slane %v5908_v19, 1 }
  0x97   : > { %v1098_v34 = vsel %vm1097_vm7, %v1077_v28, %v767_v27 }
  0x98   : > { %965 = vrot.lane.b32.xlu1 %v500_v7, %s5536_s18  ;;  %963 = vrot.lane.b32.xlu0 %v5772_v54, %s5536_s18  ;;  %v1119_v38 = vsel %vm1118_vm8, %v1098_v34, %v829_v2  ;;  %v752_v2 = vrot.slane %v5911_v20, 1 }
  0x9a   : > { %v891_v35 = vpop.permute.xlu1 %890  ;;  %v5846_v36 = vpop.permute.xlu0 %409  ;;  %v753_v31 = vsel %vm485_vm0, %v751_v21, %v752_v2 }
  0x9b   : > { %v1140_v40 = vsel %vm1139_vm9, %v1119_v38, %v891_v35  ;;  %v4089_v35 = vld [vmem:[%s5642_s19 + $0x258] sm:$0x7]  ;;  %v1016_v38 = vsel %vm1013_vm3, %v5665_v11, %v5846_v36 }
  0x9c   : > { %782 = vrot.lane.b32.xlu1 %v750_v33, %s5534_s8  ;;  %780 = vrot.lane.b32.xlu0 %v746_v63, %s5534_s8 }
  0x9e   : > { %v954_v41 = vpop.permute.xlu1 %953  ;;  %v5858_v42 = vpop.permute.xlu0 %520 }
  0x9f   : > { %v1161_v44 = vsel %vm1160_vm10, %v1140_v40, %v954_v41 }
  0xa0   : > { %v1201_v45 = vcombine.high %v1161_v44, %v1161_v44  ;;  %v1208_v46 = vrot.slane %v1161_v44, %v5851_v37  ;;  %844 = vrot.lane.b32.xlu1 %v5855_v39, %s7452_s16  ;;  %842 = vrot.lane.b32.xlu0 %v5799_v1, %s7452_s16  ;;  %v1037_v44 = vsel %vm1034_vm4, %v1016_v38, %v5858_v42 }
  0xa2   : > { %v1215_v53 = vrot.slane %v1201_v45, %v5851_v37  ;;  %v1216_v54 = vcombine.high %v1208_v46, %v1208_v46  ;;  %v601_v55 = vpop.permute.xlu1 %600  ;;  %v5876_v56 = vpop.permute.xlu0 %407 }
  0xa3   : > { %v1058_v45 = vsel %vm1055_vm5, %v1037_v44, %v601_v55 }
  0xa4   : > { %v1217_v57 = vcombine.high %v1215_v53, %v1215_v53  ;;  %v1453_v58 = vcombine.low %v1208_v46, %v1216_v54  ;;  %904 = vrot.lane.b32.xlu1 %v4047_v48, %s7453_s17  ;;  %425 = vrot.lane.b32.xlu0 %v4048_v50, %s5529_s21 }
  0xa6   : > { %v1454_v60 = vcombine.low %v1215_v53, %v1217_v57  ;;  %v681_v61 = vpop.permute.xlu1 %680  ;;  %v5882_v62 = vpop.permute.xlu0 %518  ;;  %v1461_v63 = vrot.slane %v1453_v58, %v5851_v37  ;;  %v1015_v58 = vsel %vm1013_vm3, %v5652_v3, %v5876_v56  ;;  %v5977_v3 = vld [vmem:[%s5642_s19 + $0x1c8] sm:$0x7] }
  0xa7   : > { %v1079_v46 = vsel %vm1076_vm6, %v1058_v45, %v681_v61  ;;  %v1036_v61 = vsel %vm1034_vm4, %v1015_v58, %v5882_v62  ;;  %v754_v62 = vrot.slane %v4072_v47, 1  ;;  %v4051_v58 = vld [vmem:[%s5642_s19 + $0x118] sm:$0x7] }
  0xa8   : > { %v1468_v4 = vrot.slane %v1454_v60, %v5851_v37  ;;  %536 = vrot.lane.b32.xlu1 %v503_v59, %s5531_s23  ;;  %906 = vrot.lane.b32.xlu0 %v4048_v50, %s7453_s17 }
  0xaa   : > { %v5888_v5 = vpop.permute.xlu1 %598  ;;  %v5890_v7 = vpop.permute.xlu0 %413  ;;  %v1469_v8 = vcombine.low %v1461_v63, %v1468_v4  ;;  %v4092_v63 = vld [vmem:[%s5642_s19 + $0x270] sm:$0xff] }
  0xab   : > { %v1057_v4 = vsel %vm1055_vm5, %v1036_v61, %v5888_v5  ;;  %v755_v5 = vrot.slane %v5977_v3, 1 }
  0xac   : > { %969 = vrot.lane.b32.xlu1 %v503_v59, %s5536_s18  ;;  %967 = vrot.lane.b32.xlu0 %v5806_v6, %s5536_s18 }
  0xad   : > { %4538 = vmatmul.mubr.msk.f32.vlgmr.msra.gmra.mrb[0].mxu0 %vm1665_vm11, %v1469_v8 }
  0xae   : > { %v5897_v10 = vpop.permute.xlu1 %524  ;;  %v771_v12 = vpop.permute.xlu0 %770  ;;  %4540 = vmatprep.mubr.msk.f32.mxu0 %vm5537_vm1, %v5538_v26 }
  0xaf   : > { %v1100_v11 = vsel %vm1097_vm7, %v1079_v46, %v771_v12 }
  0xb0   : > { %616 = vrot.lane.b32.xlu1 %v4070_v9, %s5528_s20  ;;  %423 = vrot.lane.b32.xlu0 %v4047_v48, %s5529_s21  ;;  %v4049_v48 = vld [vmem:[%s5642_s19 + $0x108] sm:$0x7] }
  0xb2   : > { %v833_v15 = vpop.permute.xlu1 %832  ;;  %v679_v16 = vpop.permute.xlu0 %678 }
  0xb3   : > { %v1121_v53 = vsel %vm1118_vm8, %v1100_v11, %v833_v15  ;;  %v1078_v56 = vsel %vm1076_vm6, %v1057_v4, %v679_v16 }
  0xb4   : > { %696 = vrot.lane.b32.xlu1 %v4090_v14, %s5530_s22  ;;  %534 = vrot.lane.b32.xlu0 %v5806_v6, %s5531_s23  ;;  %v506_v6 = vsel %vm485_vm0, %v504_v23, %v5919_v24 }
  0xb6   : > { %v5922_v27 = vpop.permute.xlu1 %604  ;;  %v5924_v28 = vpop.permute.xlu0 %411 }
  0xb8   : > { %614 = vrot.lane.b32.xlu1 %v5829_v18, %s5528_s20  ;;  %429 = vrot.lane.b32.xlu0 %v4050_v22, %s5529_s21 }
  0xba   : > { %v895_v33 = vpop.permute.xlu1 %894  ;;  %v769_v34 = vpop.permute.xlu0 %768 }
  0xbb   : > { %v1142_v42 = vsel %vm1139_vm9, %v1121_v53, %v895_v33  ;;  %v1099_v12 = vsel %vm1097_vm7, %v1078_v56, %v769_v34  ;;  %v756_v33 = vsel %vm485_vm0, %v754_v62, %v755_v5  ;;  %v1017_v56 = vsel %vm1013_vm3, %v5671_v13, %v5924_v28 }
  0xbc   : > { %540 = vrot.lane.b32.xlu1 %v506_v6, %s5531_s23  ;;  %786 = vrot.lane.b32.xlu0 %v753_v31, %s5534_s8 }
  0xbe   : > { %v5940_v40 = vpop.permute.xlu1 %684  ;;  %v5942_v41 = vpop.permute.xlu0 %522 }
  0xc0   : > { %848 = vrot.lane.b32.xlu1 %v5905_v17, %s7452_s16  ;;  %694 = vrot.lane.b32.xlu0 %v4089_v35, %s5530_s22 }
  0xc2   : > { %v958_v36 = vpop.permute.xlu1 %957  ;;  %v831_v50 = vpop.permute.xlu0 %830 }
  0xc3   : > { %v1163_v54 = vsel %vm1160_vm10, %v1142_v42, %v958_v36  ;;  %v6013_v36 = vld [vmem:[%s5642_s19 + $0x70] sm:$0xff] }
  0xc4   : > { %620 = vrot.lane.b32.xlu1 %v4072_v47, %s5528_s20  ;;  %427 = vrot.lane.b32.xlu0 %v4049_v48, %s5529_s21  ;;  %v1225_v59 = vcombine.high %v1163_v54, %v1163_v54  ;;  %v1232_v60 = vrot.slane %v1163_v54, %v5851_v37 }
  0xc6   : > { %v775_v55 = vpop.permute.xlu1 %774  ;;  %v5959_v57 = vpop.permute.xlu0 %602  ;;  %v5982_v14 = vrot.slane %v1225_v59, %v5851_v37  ;;  %v1240_v18 = vcombine.high %v1232_v60, %v1232_v60 }
  0xc8   : > { %910 = vrot.lane.b32.xlu1 %v4050_v22, %s7453_s17  ;;  %784 = vrot.lane.b32.xlu0 %v749_v25, %s5534_s8  ;;  %v1120_v25 = vsel %vm1118_vm8, %v1099_v12, %v831_v50  ;;  %v1471_v23 = vcombine.low %v1240_v18, %v5982_v14  ;;  %v1018_v50 = vsel %vm1013_vm3, %v5707_v29, %v5890_v7  ;;  %v4052_v7 = vld [vmem:[%s5642_s19 + $0x120] sm:$0xff] }
  0xc9   : > { %v1039_v54 = vsel %vm1034_vm4, %v1018_v50, %v5897_v10  ;;  %v1038_v18 = vsel %vm1034_vm4, %v1017_v56, %v5942_v41  ;;  %v4094_v50 = vld [vmem:[%s5642_s19 + $0x280] sm:$0xff] }
  0xca   : > { %v5974_v8 = vpop.permute.xlu1 %682  ;;  %v893_v9 = vpop.permute.xlu0 %892  ;;  %v1485_v44 = vrot.slane %v1471_v23, %v5851_v37  ;;  %v1059_v62 = vsel %vm1055_vm5, %v1038_v18, %v5959_v57 }
  0xcb   : > { %v1141_v15 = vsel %vm1139_vm9, %v1120_v25, %v893_v9  ;;  %v1080_v28 = vsel %vm1076_vm6, %v1059_v62, %v5974_v8  ;;  %v1241_v8 = vcombine.high %v5982_v14, %v5982_v14  ;;  %v4093_v14 = vld [vmem:[%s5642_s19 + $0x278] sm:$0x7] }
  0xcc   : > { %700 = vrot.lane.b32.xlu1 %v4092_v63, %s5530_s22  ;;  %538 = vrot.lane.b32.xlu0 %v5873_v51, %s5531_s23  ;;  %v6038_v63 = vld [vmem:[%s5642_s19 + $0x78] sm:$0x7] }
  0xcd   : > { %v6049_v4 = vrot.slane %v6038_v63, 1 }
  0xce   : > { %v956_v16 = vpop.permute.xlu1 %955  ;;  %v837_v21 = vpop.permute.xlu0 %836 }
  0xcf   : > { %v1162_v22 = vsel %vm1160_vm10, %v1141_v15, %v956_v16 }
  0xd0   : > { %v1224_v31 = vrot.slane %v1162_v22, %v5851_v37  ;;  %973 = vrot.lane.b32.xlu1 %v506_v6, %s5536_s18  ;;  %846 = vrot.lane.b32.xlu0 %v5861_v43, %s7452_s16  ;;  %v4091_v6 = vld [vmem:[%s5642_s19 + $0x268] sm:$0x7] }
  0xd2   : > { %v1470_v34 = vcombine.low %v1224_v31, %v1232_v60  ;;  %v5999_v35 = vpop.permute.xlu1 %417  ;;  %v6001_v38 = vpop.permute.xlu0 %415 }
  0xd4   : > { %v1478_v45 = vrot.slane %v1470_v34, %v5851_v37  ;;  %790 = vrot.lane.b32.xlu1 %v756_v33, %s5534_s8  ;;  %618 = vrot.lane.b32.xlu0 %v5911_v20, %s5528_s20  ;;  %v4074_v33 = vld [vmem:[%s5642_s19 + $0x1d0] sm:$0xff] }
  0xd6   : > { %v899_v46 = vpop.permute.xlu1 %898  ;;  %v773_v47 = vpop.permute.xlu0 %772  ;;  %v1486_v11 = vcombine.low %v1478_v45, %v1485_v44 }
  0xd7   : > { %v1101_v16 = vsel %vm1097_vm7, %v1080_v28, %v773_v47 }
  0xd8   : > { %698 = vrot.lane.b32.xlu1 %v4091_v6, %s5530_s22  ;;  %908 = vrot.lane.b32.xlu0 %v4049_v48, %s7453_s17  ;;  %v1060_v48 = vsel %vm1055_vm5, %v1039_v54, %v5922_v27 }
  0xd9   : > { %4541 = vmatmul.mubr.msk.f32.gmra.mrb[2].mxu0 %vm1665_vm11, %v1486_v11  ;;  %v1081_v29 = vsel %vm1076_vm6, %v1060_v48, %v5940_v40 }
  0xda   : > { %v6018_v53 = vpop.permute.xlu1 %528  ;;  %v6020_v42 = vpop.permute.xlu0 %526  ;;  %4543 = vmatprep.mubr.msk.f32.mxu0 %vm5537_vm1, %v5538_v26  ;;  %v1102_v59 = vsel %vm1097_vm7, %v1081_v29, %v775_v55  ;;  %v6109_v29 = vld [vmem:[%s5642_s19 + $0x1d8] sm:$0x7] }
  0xdb   : > { %v1123_v10 = vsel %vm1118_vm8, %v1102_v59, %v837_v21  ;;  %v4053_v59 = vld [vmem:[%s5642_s19 + $0x128] sm:$0x7] }
  0xdc   : > { %971 = vrot.lane.b32.xlu1 %v5873_v51, %s5536_s18  ;;  %852 = vrot.lane.b32.xlu0 %v6013_v36, %s7452_s16  ;;  %v1144_v27 = vsel %vm1139_vm9, %v1123_v10, %v899_v46  ;;  %v507_v51 = vrot.slane %v6013_v36, 1 }
  0xde   : > { %v962_v60 = vpop.permute.xlu1 %961  ;;  %v835_v61 = vpop.permute.xlu0 %834  ;;  %v509_v25 = vsel %vm485_vm0, %v507_v51, %v6049_v4  ;;  %v6123_v51 = vld [vmem:[%s5642_s19 + $0x88] sm:$0x7] }
  0xdf   : > { %v6046_v40 = vsel %vm1160_vm10, %v1144_v27, %v962_v60  ;;  %v758_v60 = vrot.slane %v6109_v29, 1  ;;  %v6120_v27 = vld [vmem:[%s5642_s19 + $0x80] sm:$0xff] }
  0xe0   : > { %433 = vrot.lane.b32.xlu1 %v4052_v7, %s5529_s21  ;;  %431 = vrot.lane.b32.xlu0 %v4051_v58, %s5529_s21  ;;  %v1256_v12 = vrot.slane %v6046_v40, %v5851_v37  ;;  %v510_v56 = vrot.slane %v6120_v27, 1  ;;  %v1249_v62 = vcombine.high %v6046_v40, %v6046_v40 }
  0xe2   : > { %v6051_v55 = vpop.permute.xlu1 %608  ;;  %v6053_v9 = vpop.permute.xlu0 %606  ;;  %v1264_v20 = vcombine.high %v1256_v12, %v1256_v12  ;;  %v1263_v40 = vrot.slane %v1249_v62, %v5851_v37 }
  0xe4   : > { %914 = vrot.lane.b32.xlu1 %v4052_v7, %s7453_s17  ;;  %788 = vrot.lane.b32.xlu0 %v752_v2, %s5534_s8  ;;  %v1122_v2 = vsel %vm1118_vm8, %v1101_v16, %v835_v61  ;;  %v1488_v23 = vcombine.low %v1256_v12, %v1264_v20  ;;  %v757_v7 = vrot.slane %v4074_v33, 1  ;;  %v6132_v12 = vrot.slane %v6123_v51, 1 }
  0xe5   : > { %v1020_v20 = vsel %vm1013_vm3, %v5757_v49, %v5999_v35 }
  0xe6   : > { %v6070_v15 = vpop.permute.xlu1 %686  ;;  %v897_v13 = vpop.permute.xlu0 %896  ;;  %v1502_v6 = vrot.slane %v1488_v23, %v5851_v37 }
  0xe7   : > { %v1143_v41 = vsel %vm1139_vm9, %v1122_v2, %v897_v13  ;;  %v512_v13 = vsel %vm485_vm0, %v510_v56, %v6132_v12  ;;  %v1019_v2 = vsel %vm1013_vm3, %v5710_v30, %v6001_v38 }
  0xe8   : > { %544 = vrot.lane.b32.xlu1 %v509_v25, %s5531_s23  ;;  %542 = vrot.lane.b32.xlu0 %v5919_v24, %s5531_s23 }
  0xea   : > { %v960_v57 = vpop.permute.xlu1 %959  ;;  %v6080_v21 = vpop.permute.xlu0 %688 }
  0xeb   : > { %v1164_v22 = vsel %vm1160_vm10, %v1143_v41, %v960_v57 }
  0xec   : > { %v1248_v31 = vrot.slane %v1164_v22, %v5851_v37  ;;  %977 = vrot.lane.b32.xlu1 %v509_v25, %s5536_s18  ;;  %850 = vrot.lane.b32.xlu0 %v5908_v19, %s7452_s16  ;;  %v1265_v22 = vcombine.high %v1263_v40, %v1263_v40 }
  0xee   : > { %v1487_v34 = vcombine.low %v1241_v8, %v1248_v31  ;;  %v6090_v44 = vpop.permute.xlu1 %421  ;;  %v6092_v45 = vpop.permute.xlu0 %419 }
  0xf0   : > { %v1495_v46 = vrot.slane %v1487_v34, %v5851_v37  ;;  %624 = vrot.lane.b32.xlu1 %v4074_v33, %s5528_s20  ;;  %622 = vrot.lane.b32.xlu0 %v5977_v3, %s5528_s20  ;;  %v1041_v3 = vsel %vm1034_vm4, %v1020_v20, %v6018_v53 }
  0xf1   : > { %v1062_v49 = vsel %vm1055_vm5, %v1041_v3, %v6051_v55  ;;  %v1021_v3 = vsel %vm1013_vm3, %v5766_v52, %v6092_v45 }
  0xf2   : > { %v779_v19 = vpop.permute.xlu1 %778  ;;  %v777_v47 = vpop.permute.xlu0 %776  ;;  %v1503_v11 = vcombine.low %v1495_v46, %v1502_v6  ;;  %v1083_v57 = vsel %vm1076_vm6, %v1062_v49, %v6080_v21  ;;  %v1504_v6 = vcombine.low %v1263_v40, %v1265_v22  ;;  %v1022_v40 = vsel %vm1013_vm3, %v5796_v0, %v6090_v44 }
  0xf3   : > { %v1104_v53 = vsel %vm1097_vm7, %v1083_v57, %v779_v19 }
  0xf4   : > { %702 = vrot.lane.b32.xlu1 %v4093_v14, %s5530_s22  ;;  %912 = vrot.lane.b32.xlu0 %v4051_v58, %s7453_s17  ;;  %v4054_v58 = vld [vmem:[%s5642_s19 + $0x130] sm:$0xff] }
  0xf5   : > { %4544 = vmatmul.mubr.msk.f32.gmra.mrb[4].mxu0 %vm1665_vm11, %v1503_v11 }
  0xf6   : > { %v6104_v54 = vpop.permute.xlu1 %532  ;;  %v6106_v48 = vpop.permute.xlu0 %530  ;;  %4546 = vmatprep.mubr.msk.f32.mxu0 %vm5537_vm1, %v5538_v26 }
  0xf7   : > { %v1042_v49 = vsel %vm1034_vm4, %v1021_v3, %v6106_v48 }
  0xf8   : > { %975 = vrot.lane.b32.xlu1 %v5919_v24, %s5536_s18  ;;  %704 = vrot.lane.b32.xlu0 %v4094_v50, %s5530_s22  ;;  %v759_v24 = vsel %vm485_vm0, %v757_v7, %v758_v60  ;;  %v1512_v50 = vrot.slane %v1504_v6, %v5851_v37 }
  0xfa   : > { %v841_v61 = vpop.permute.xlu1 %840  ;;  %v839_v10 = vpop.permute.xlu0 %838 }
  0xfc   : > { %437 = vrot.lane.b32.xlu1 %v4054_v58, %s5529_s21  ;;  %435 = vrot.lane.b32.xlu0 %v4053_v59, %s5529_s21 }
  0xfe   : > { %v6134_v18 = vpop.permute.xlu1 %612  ;;  %v6136_v25 = vpop.permute.xlu0 %610 }
  0xff   : > { %v1063_v52 = vsel %vm1055_vm5, %v1042_v49, %v6136_v25 }
 0x100   : > { %794 = vrot.lane.b32.xlu1 %v759_v24, %s5534_s8  ;;  %792 = vrot.lane.b32.xlu0 %v755_v5, %s5534_s8  ;;  %v1040_v5 = vsel %vm1034_vm4, %v1019_v2, %v6020_v42  ;;  %v1125_v42 = vsel %vm1118_vm8, %v1104_v53, %v841_v61  ;;  %v4096_v61 = vld [vmem:[%s5642_s19 + $0x290] sm:$0xff] }
 0x101   : > { %v1061_v30 = vsel %vm1055_vm5, %v1040_v5, %v6053_v9  ;;  %v4076_v9 = vld [vmem:[%s5642_s19 + $0x1e0] sm:$0xff]  ;;  %v1043_v5 = vsel %vm1034_vm4, %v1022_v40, %v6104_v54 }
 0x102   : > { %v903_v28 = vpop.permute.xlu1 %902  ;;  %v901_v16 = vpop.permute.xlu0 %900  ;;  %v1082_v41 = vsel %vm1076_vm6, %v1061_v30, %v6070_v15  ;;  %v1064_v44 = vsel %vm1055_vm5, %v1043_v5, %v6134_v18 }
 0x103   : > { %v1103_v23 = vsel %vm1097_vm7, %v1082_v41, %v777_v47  ;;  %v1146_v15 = vsel %vm1139_vm9, %v1125_v42, %v903_v28  ;;  %v6193_v28 = vld [vmem:[%s5642_s19 + $0x1e8] sm:$0x7]  ;;  %v6242_v42 = vld [vmem:[%s5642_s19 + $0x98] sm:$0x7] }
 0x104   : > { %548 = vrot.lane.b32.xlu1 %v512_v13, %s5531_s23  ;;  %546 = vrot.lane.b32.xlu0 %v6049_v4, %s5531_s23  ;;  %v1124_v55 = vsel %vm1118_vm8, %v1103_v23, %v839_v10  ;;  %v4095_v10 = vld [vmem:[%s5642_s19 + $0x288] sm:$0x7]  ;;  %v761_v20 = vrot.slane %v6193_v28, 1  ;;  %v6256_v6 = vrot.slane %v6242_v42, 1 }
 0x105   : > { %v1145_v21 = vsel %vm1139_vm9, %v1124_v55, %v901_v16  ;;  %v760_v16 = vrot.slane %v4076_v9, 1 }
 0x106   : > { %v693_v35 = vpop.permute.xlu1 %692  ;;  %v691_v38 = vpop.permute.xlu0 %690 }
 0x107   : > { %v762_v0 = vsel %vm485_vm0, %v760_v16, %v761_v20  ;;  %v1085_v54 = vsel %vm1076_vm6, %v1064_v44, %v693_v35  ;;  %v6237_v35 = vld [vmem:[%s5642_s19 + $0x90] sm:$0xff] }
 0x108   : > { %856 = vrot.lane.b32.xlu1 %v6120_v27, %s7452_s16  ;;  %854 = vrot.lane.b32.xlu0 %v6038_v63, %s7452_s16 }
 0x10a   : > { %v966_v8 = vpop.permute.xlu1 %965  ;;  %v964_v31 = vpop.permute.xlu0 %963 }
 0x10b   : > { %v1167_v33 = vsel %vm1160_vm10, %v1146_v15, %v966_v8  ;;  %v1166_v34 = vsel %vm1160_vm10, %v1145_v21, %v964_v31  ;;  %v513_v31 = vrot.slane %v6237_v35, 1 }
 0x10c   : > { %v1280_v46 = vrot.slane %v1167_v33, %v5851_v37  ;;  %v1272_v14 = vrot.slane %v1166_v34, %v5851_v37  ;;  %628 = vrot.lane.b32.xlu1 %v4076_v9, %s5528_s20  ;;  %626 = vrot.lane.b32.xlu0 %v6109_v29, %s5528_s20  ;;  %v4055_v34 = vld [vmem:[%s5642_s19 + $0x138] sm:$0x7] }
 0x10e   : > { %v1505_v19 = vcombine.low %v1272_v14, %v1280_v46  ;;  %v783_v47 = vpop.permute.xlu1 %782  ;;  %v781_v11 = vpop.permute.xlu0 %780  ;;  %v1288_v30 = vcombine.high %v1280_v46, %v1280_v46 }
 0x10f   : > { %v1106_v41 = vsel %vm1097_vm7, %v1085_v54, %v783_v47 }
 0x110   : > { %v1519_v7 = vrot.slane %v1505_v19, %v5851_v37  ;;  %918 = vrot.lane.b32.xlu1 %v4054_v58, %s7453_s17  ;;  %916 = vrot.lane.b32.xlu0 %v4053_v59, %s7453_s17  ;;  %v1273_v59 = vcombine.high %v1167_v33, %v1167_v33  ;;  %v4056_v33 = vld [vmem:[%s5642_s19 + $0x140] sm:$0xff] }
 0x112   : > { %v845_v24 = vpop.permute.xlu1 %844  ;;  %v843_v56 = vpop.permute.xlu0 %842  ;;  %v1520_v62 = vcombine.low %v1512_v50, %v1519_v7  ;;  %v1287_v48 = vrot.slane %v1273_v59, %v5851_v37 }
 0x113   : > { %v1127_v18 = vsel %vm1118_vm8, %v1106_v41, %v845_v24  ;;  %v515_v24 = vsel %vm485_vm0, %v513_v31, %v6256_v6  ;;  %v4058_v31 = vld [vmem:[%s5642_s19 + $0x150] sm:$0xff] }
 0x114   : > { %708 = vrot.lane.b32.xlu1 %v4096_v61, %s5530_s22  ;;  %706 = vrot.lane.b32.xlu0 %v4095_v10, %s5530_s22  ;;  %v1521_v55 = vcombine.low %v1288_v30, %v1287_v48 }
 0x115   : > { %4547 = vmatmul.mubr.msk.f32.gmra.mrb[6].mxu0 %vm1665_vm11, %v1520_v62 }
 0x116   : > { %v905_v2 = vpop.permute.xlu1 %904  ;;  %v6199_v58 = vpop.permute.xlu0 %425  ;;  %4549 = vmatprep.mubr.msk.f32.mxu0 %vm5537_vm1, %v5538_v26  ;;  %v1529_v50 = vrot.slane %v1521_v55, %v5851_v37 }
 0x118   : > { %981 = vrot.lane.b32.xlu1 %v512_v13, %s5536_s18  ;;  %979 = vrot.lane.b32.xlu0 %v6049_v4, %s5536_s18  ;;  %v1084_v13 = vsel %vm1076_vm6, %v1063_v52, %v691_v38 }
 0x119   : > { %v1105_v57 = vsel %vm1097_vm7, %v1084_v13, %v781_v11  ;;  %v4098_v13 = vld [vmem:[%s5642_s19 + $0x2a0] sm:$0xff] }
 0x11a   : > { %v6223_v45 = vpop.permute.xlu1 %536  ;;  %v907_v4 = vpop.permute.xlu0 %906  ;;  %v1126_v25 = vsel %vm1118_vm8, %v1105_v57, %v843_v56 }
 0x11b   : > { %v1147_v38 = vsel %vm1139_vm9, %v1126_v25, %v905_v2  ;;  %v1148_v22 = vsel %vm1139_vm9, %v1127_v18, %v907_v4  ;;  %v6292_v4 = vld [vmem:[%s5642_s19 + $0x1f8] sm:$0x7] }
 0x11c   : > { %798 = vrot.lane.b32.xlu1 %v762_v0, %s5534_s8  ;;  %796 = vrot.lane.b32.xlu0 %v758_v60, %s5534_s8  ;;  %v1289_v60 = vcombine.high %v1287_v48, %v1287_v48  ;;  %v4078_v0 = vld [vmem:[%s5642_s19 + $0x1f0] sm:$0xff]  ;;  %v764_v48 = vrot.slane %v6292_v4, 1 }
 0x11d   : > { %v763_v54 = vrot.slane %v4078_v0, 1 }
 0x11e   : > { %v970_v53 = vpop.permute.xlu1 %969  ;;  %v968_v23 = vpop.permute.xlu0 %967 }
 0x11f   : > { %v1169_v29 = vsel %vm1160_vm10, %v1148_v22, %v970_v53  ;;  %v1168_v9 = vsel %vm1160_vm10, %v1147_v38, %v968_v23  ;;  %v765_v57 = vsel %vm485_vm0, %v763_v54, %v764_v48  ;;  %v4117_v38 = vld [vmem:[%s7441_s3 + $0x80] sm:$0xff]  ;;  %v4118_v22 = vld [vmem:[%s7441_s3 + $0x88] sm:$0xff]  ;;  %v4097_v23 = vld [vmem:[%s5642_s19 + $0x298] sm:$0x7] }
 0x120   : > { %v1297_v15 = vcombine.high %v1169_v29, %v1169_v29  ;;  %v1304_v21 = vrot.slane %v1169_v29, %v5851_v37  ;;  %v1296_v8 = vrot.slane %v1168_v9, %v5851_v37  ;;  %860 = vrot.lane.b32.xlu1 %v6237_v35, %s7452_s16  ;;  %858 = vrot.lane.b32.xlu0 %v6123_v51, %s7452_s16  ;;  %v4119_v9 = vld [vmem:[%s7441_s3 + $0x90] sm:$0xff]  ;;  %v4126_v54 = vld [vmem:[%s7441_s3 + $0xc8] sm:$0xff] }
 0x121   : > { %v4992_v53 = vpack.c.bf16 %v4118_v22, %v4117_v38 }
 0x122   : > { %v1311_v46 = vrot.slane %v1297_v15, %v5851_v37  ;;  %v1312_v14 = vcombine.high %v1304_v21, %v1304_v21  ;;  %v1522_v19 = vcombine.low %v1289_v60, %v1296_v8  ;;  %v6259_v47 = vpop.permute.xlu1 %616  ;;  %v6261_v11 = vpop.permute.xlu0 %423  ;;  %v6324_v60 = vld [vmem:[%s5642_s19 + $0xa8] sm:$0x7]  ;;  %v4120_v15 = vld [vmem:[%s7441_s3 + $0x98] sm:$0xff] }
 0x123   : > { %4993 = vmatprep.subr.bf16.mxu0 %v4992_v53 }
 0x124   : > { %v1313_v7 = vcombine.high %v1311_v46, %v1311_v46  ;;  %v1538_v61 = vcombine.low %v1304_v21, %v1312_v14  ;;  %v1536_v10 = vrot.slane %v1522_v19, %v5851_v37  ;;  %922 = vrot.lane.b32.xlu1 %v4056_v33, %s7453_s17  ;;  %920 = vrot.lane.b32.xlu0 %v4055_v34, %s7453_s17  ;;  %v4121_v19 = vld [vmem:[%s7441_s3 + $0xa0] sm:$0xff] }
 0x125   : > { %4995 = vmatpush3.bf16.msra.mxu0 %v4992_v53  ;;  %v4996_v21 = vpack.c.bf16 %v4120_v15, %v4119_v9 }
 0x126   : > { %v1539_v56 = vcombine.low %v1311_v46, %v1313_v7  ;;  %v6269_v62 = vpop.permute.xlu1 %696  ;;  %v6271_v16 = vpop.permute.xlu0 %534  ;;  %v1537_v2 = vcombine.low %v1529_v50, %v1536_v10  ;;  %v1546_v59 = vrot.slane %v1538_v61, %v5851_v37  ;;  %v4122_v50 = vld [vmem:[%s7441_s3 + $0xa8] sm:$0xff] }
 0x127   : > { %4997 = vmatprep.subr.bf16.mxu0 %v4996_v21  ;;  %v5000_v61 = vpack.c.bf16 %v4122_v50, %v4121_v19  ;;  %v4130_v19 = vld [vmem:[%s7441_s3 + $0xe8] sm:$0xff] }
 0x128   : > { %v1553_v40 = vrot.slane %v1539_v56, %v5851_v37  ;;  %985 = vrot.lane.b32.xlu1 %v515_v24, %s5536_s18  ;;  %983 = vrot.lane.b32.xlu0 %v6132_v12, %s5536_s18 }
 0x129   : > { %4550 = vmatmul.mubr.msk.f32.gmra.mrb[8].mxu0 %vm1665_vm11, %v1537_v2 }
 0x12a   : > { %v6279_v3 = vpop.permute.xlu1 %614  ;;  %v6281_v5 = vpop.permute.xlu0 %429  ;;  %4552 = vmatprep.mubr.msk.f32.mxu0 %vm5537_vm1, %v5538_v26  ;;  %v1554_v49 = vcombine.low %v1546_v59, %v1553_v40  ;;  %4999 = vmatpush3.bf16.msra.mxu0 %v4996_v21  ;;  %v4057_v40 = vld [vmem:[%s5642_s19 + $0x148] sm:$0x7] }
 0x12b   : > { %5001 = vmatprep.subr.bf16.mxu0 %v5000_v61 }
 0x12c   : > { %552 = vrot.lane.b32.xlu1 %v515_v24, %s5531_s23  ;;  %441 = vrot.lane.b32.xlu0 %v4056_v33, %s5529_s21  ;;  %v951_v33 = vrot.slane %v6324_v60, 1 }
 0x12d   : > { %4553 = vmatmul.mubr.msk.f32.gmra.mrb[10].mxu0 %vm1665_vm11, %v1554_v49 }
 0x12e   : > { %v6289_v44 = vpop.permute.xlu1 %540  ;;  %v787_v52 = vpop.permute.xlu0 %786  ;;  %4555 = vmatprep.mubr.msk.f32.mxu0 %vm5537_vm1, %v5538_v26  ;;  %5003 = vmatpush3.bf16.msra.mxu0 %v5000_v61 }
 0x130   : > { %632 = vrot.lane.b32.xlu1 %v4078_v0, %s5528_s20  ;;  %439 = vrot.lane.b32.xlu0 %v4055_v34, %s5529_s21  ;;  %v1024_v34 = vsel %vm1013_vm3, %v5855_v39, %v6199_v58 }
 0x131   : > { %v1045_v7 = vsel %vm1034_vm4, %v1024_v34, %v6223_v45 }
 0x132   : > { %v849_v30 = vpop.permute.xlu1 %848  ;;  %v6300_v41 = vpop.permute.xlu0 %694  ;;  %v1066_v39 = vsel %vm1055_vm5, %v1045_v7, %v6259_v47  ;;  %v4123_v47 = vld [vmem:[%s7441_s3 + $0xb0] sm:$0xff] }
 0x133   : > { %v1087_v58 = vsel %vm1076_vm6, %v1066_v39, %v6269_v62 }
 0x134   : > { %712 = vrot.lane.b32.xlu1 %v4098_v13, %s5530_s22  ;;  %550 = vrot.lane.b32.xlu0 %v6132_v12, %s5531_s23  ;;  %v315_v12 = vld [vmem:[%s5642_s19 + $0xa0] sm:$0xff]  ;;  %v1108_v45 = vsel %vm1097_vm7, %v1087_v58, %v787_v52 }
 0x135   : > { %v950_v8 = vrot.slane %v315_v12, 1  ;;  %v4125_v52 = vld [vmem:[%s7441_s3 + $0xc0] sm:$0xff] }
 0x136   : > { %v6308_v18 = vpop.permute.xlu1 %620  ;;  %v6310_v25 = vpop.permute.xlu0 %427  ;;  %v5008_v13 = vpack.c.bf16 %v4126_v54, %v4125_v52  ;;  %v4182_v52 = vld [vmem:[%s7441_s3 + $0x210] sm:$0xff]  ;;  %v4183_v54 = vld [vmem:[%s7441_s3 + $0x218] sm:$0xff] }
 0x137   : > { %v952_v10 = vsel %vm485_vm0, %v950_v8, %v951_v33  ;;  %v4099_v8 = vld [vmem:[%s5642_s19 + $0x2a8] sm:$0x7] }
 0x138   : > { %802 = vrot.lane.b32.xlu1 %v765_v57, %s5534_s8  ;;  %630 = vrot.lane.b32.xlu0 %v6193_v28, %s5528_s20  ;;  %v4124_v28 = vld [vmem:[%s7441_s3 + $0xb8] sm:$0xff] }
 0x139   : > { %v5004_v62 = vpack.c.bf16 %v4124_v28, %v4123_v47 }
 0x13a   : > { %v911_v55 = vpop.permute.xlu1 %910  ;;  %v785_v29 = vpop.permute.xlu0 %784 }
 0x13b   : > { %5005 = vmatprep.subr.bf16.mxu0 %v5004_v62 }
 0x13c   : > { %864 = vrot.lane.b32.xlu1 %v315_v12, %s7452_s16  ;;  %710 = vrot.lane.b32.xlu0 %v4097_v23, %s5530_s22 }
 0x13d   : > { %5007 = vmatpush3.bf16.msra.mxu0 %v5004_v62 }
 0x13e   : > { %v6339_v46 = vpop.permute.xlu1 %700  ;;  %v6341_v14 = vpop.permute.xlu0 %538  ;;  %5009 = vmatprep.subr.bf16.mxu0 %v5008_v13 }
 0x140   : > { %926 = vrot.lane.b32.xlu1 %v4058_v31, %s7453_s17  ;;  %800 = vrot.lane.b32.xlu0 %v761_v20, %s5534_s8  ;;  %v1129_v20 = vsel %vm1118_vm8, %v1108_v45, %v849_v30  ;;  %v1023_v30 = vsel %vm1013_vm3, %v5799_v1, %v6261_v11  ;;  %v4127_v1 = vld [vmem:[%s7441_s3 + $0xd0] sm:$0xff]  ;;  %v4128_v11 = vld [vmem:[%s7441_s3 + $0xd8] sm:$0xff] }
 0x141   : > { %v1150_v2 = vsel %vm1139_vm9, %v1129_v20, %v911_v55  ;;  %v1044_v22 = vsel %vm1034_vm4, %v1023_v30, %v6271_v16  ;;  %5011 = vmatpush3.bf16.msra.mxu0 %v5008_v13  ;;  %v5012_v55 = vpack.c.bf16 %v4128_v11, %v4127_v1  ;;  %v4131_v45 = vld [vmem:[%s7441_s3 + $0xf0] sm:$0xff]  ;;  %v4059_v20 = vld [vmem:[%s5642_s19 + $0x158] sm:$0x7]  ;;  %v1026_v13 = vsel %vm1013_vm3, %v5905_v17, %v6281_v5 }
 0x142   : > { %v974_v24 = vpop.permute.xlu1 %973  ;;  %v847_v56 = vpop.permute.xlu0 %846  ;;  %v1065_v53 = vsel %vm1055_vm5, %v1044_v22, %v6279_v3  ;;  %v1047_v22 = vsel %vm1034_vm4, %v1026_v13, %v6289_v44  ;;  %v4187_v44 = vld [vmem:[%s7441_s3 + $0x238] sm:$0xff] }
 0x143   : > { %v1171_v59 = vsel %vm1160_vm10, %v1150_v2, %v974_v24  ;;  %v1086_v16 = vsel %vm1076_vm6, %v1065_v53, %v6300_v41  ;;  %5013 = vmatprep.subr.bf16.mxu0 %v5012_v55  ;;  %v4132_v24 = vld [vmem:[%s7441_s3 + $0xf8] sm:$0xff]  ;;  %v1068_v17 = vsel %vm1055_vm5, %v1047_v22, %v6308_v18 }
 0x144   : > { %989 = vrot.lane.b32.xlu1 %v952_v10, %s5536_s18  ;;  %862 = vrot.lane.b32.xlu0 %v6242_v42, %s7452_s16  ;;  %v1321_v57 = vcombine.high %v1171_v59, %v1171_v59  ;;  %v1328_v38 = vrot.slane %v1171_v59, %v5851_v37  ;;  %v1107_v9 = vsel %vm1097_vm7, %v1086_v16, %v785_v29  ;;  %v4129_v29 = vld [vmem:[%s7441_s3 + $0xe0] sm:$0xff]  ;;  %v4186_v16 = vld [vmem:[%s7441_s3 + $0x230] sm:$0xff] }
 0x145   : > { %v1128_v21 = vsel %vm1118_vm8, %v1107_v9, %v847_v56  ;;  %5015 = vmatpush3.bf16.msra.mxu0 %v5012_v55  ;;  %v5020_v56 = vpack.c.bf16 %v4132_v24, %v4131_v45  ;;  %v1089_v5 = vsel %vm1076_vm6, %v1068_v17, %v6339_v46 }
 0x146   : > { %v6376_v49 = vpop.permute.xlu1 %790  ;;  %v6378_v0 = vpop.permute.xlu0 %618  ;;  %v6409_v3 = vrot.slane %v1321_v57, %v5851_v37  ;;  %v1336_v15 = vcombine.high %v1328_v38, %v1328_v38  ;;  %v4184_v57 = vld [vmem:[%s7441_s3 + $0x220] sm:$0xff] }
 0x148   : > { %924 = vrot.lane.b32.xlu0 %v4057_v40, %s7453_s17  ;;  %987 = vrot.lane.b32.xlu1 %v6256_v6, %s5536_s18  ;;  %v1556_v7 = vcombine.low %v1336_v15, %v6409_v3  ;;  %v1337_v24 = vcombine.high %v6409_v3, %v6409_v3 }
 0x14a   : > { %v6397_v12 = vpop.permute.xlu1 %698  ;;  %v909_v23 = vpop.permute.xlu0 %908  ;;  %v1570_v47 = vrot.slane %v1556_v7, %v5851_v37 }
 0x14b   : > { %v1149_v31 = vsel %vm1139_vm9, %v1128_v21, %v909_v23  ;;  %v1110_v23 = vsel %vm1097_vm7, %v1089_v5, %v6376_v49  ;;  %v5132_v49 = vpack.c.bf16 %v4187_v44, %v4186_v16  ;;  %v1025_v21 = vsel %vm1013_vm3, %v5861_v43, %v6310_v25  ;;  %v4188_v25 = vld [vmem:[%s7441_s3 + $0x240] sm:$0xff] }
 0x14c   : > { %443 = vrot.lane.b32.xlu0 %v4057_v40, %s5529_s21  ;;  %554 = vrot.lane.b32.xlu1 %v6256_v6, %s5531_s23  ;;  %v5016_v6 = vpack.c.bf16 %v4130_v19, %v4129_v29  ;;  %v4180_v40 = vld [vmem:[%s7441_s3 + $0x200] sm:$0xff] }
 0x14e   : > { %v972_v34 = vpop.permute.xlu1 %971  ;;  %v853_v41 = vpop.permute.xlu0 %852  ;;  %5017 = vmatprep.subr.bf16.mxu0 %v5016_v6 }
 0x14f   : > { %v1170_v50 = vsel %vm1160_vm10, %v1149_v31, %v972_v34  ;;  %5019 = vmatpush3.bf16.msra.mxu0 %v5016_v6  ;;  %v1131_v18 = vsel %vm1118_vm8, %v1110_v23, %v853_v41  ;;  %v1046_v31 = vsel %vm1034_vm4, %v1025_v21, %v6341_v14  ;;  %v4189_v14 = vld [vmem:[%s7441_s3 + $0x248] sm:$0xff] }
 0x150   : > { %v1320_v61 = vrot.slane %v1170_v50, %v5851_v37  ;;  %634 = vrot.lane.b32.xlu0 %v6292_v4, %s5528_s20  ;;  %714 = vrot.lane.b32.xlu1 %v4099_v8, %s5530_s22  ;;  %v4181_v4 = vld [vmem:[%s7441_s3 + $0x208] sm:$0xff]  ;;  %v1067_v34 = vsel %vm1055_vm5, %v1046_v31, %v6378_v0  ;;  %v5136_v6 = vpack.c.bf16 %v4189_v14, %v4188_v25 }
 0x151   : > { %5021 = vmatprep.subr.bf16.mxu0 %v5020_v56  ;;  %v1088_v19 = vsel %vm1076_vm6, %v1067_v34, %v6397_v12 }
 0x152   : > { %v1555_v39 = vcombine.low %v1320_v61, %v1328_v38  ;;  %v6429_v58 = vpop.permute.xlu1 %433  ;;  %v6431_v10 = vpop.permute.xlu0 %431  ;;  %v4185_v38 = vld [vmem:[%s7441_s3 + $0x228] sm:$0xff] }
 0x153   : > { %5023 = vmatpush3.bf16.msra.mxu0 %v5020_v56  ;;  %v5128_v53 = vpack.c.bf16 %v4185_v38, %v4184_v57  ;;  %v4194_v57 = vld [vmem:[%s7441_s3 + $0x270] sm:$0xff]  ;;  %v4195_v38 = vld [vmem:[%s7441_s3 + $0x278] sm:$0xff]  ;;  %v1028_v21 = vsel %vm1013_vm3, %v6013_v36, %v6429_v58 }
 0x154   : > { %v1563_v28 = vrot.slane %v1555_v39, %v5851_v37  ;;  %804 = vrot.lane.b32.xlu0 %v764_v48, %s5534_s8  ;;  %866 = vrot.lane.b32.xlu1 %v6324_v60, %s7452_s16  ;;  %v5120_v48 = vpack.c.bf16 %v4181_v4, %v4180_v40  ;;  %v4192_v4 = vld [vmem:[%s7441_s3 + $0x260] sm:$0xff]  ;;  %v5148_v22 = vpack.c.bf16 %v4195_v38, %v4194_v57 }
 0x156   : > { %v915_v62 = vpop.permute.xlu1 %914  ;;  %v789_v2 = vpop.permute.xlu0 %788  ;;  %v1571_v59 = vcombine.low %v1563_v28, %v1570_v47  ;;  %5121 = vmatprep.subr.bf16.mxu1 %v5120_v48  ;;  %v4190_v47 = vld [vmem:[%s7441_s3 + $0x250] sm:$0xff]  ;;  %v4191_v28 = vld [vmem:[%s7441_s3 + $0x258] sm:$0xff] }
 0x157   : > { %5123 = vmatpush3.bf16.msra.mxu1 %v5120_v48  ;;  %v1152_v55 = vsel %vm1139_vm9, %v1131_v18, %v915_v62  ;;  %v1109_v50 = vsel %vm1097_vm7, %v1088_v19, %v789_v2  ;;  %v4193_v48 = vld [vmem:[%s7441_s3 + $0x268] sm:$0xff] }
 0x158   : > { %928 = vrot.lane.b32.xlu0 %v4059_v20, %s7453_s17  ;;  %4556 = vmatmul.mubr.msk.f32.gmra.mrb[12].mxu0 %vm1665_vm11, %v1571_v59  ;;  %v5140_v20 = vpack.c.bf16 %v4191_v28, %v4190_v47  ;;  %s7383_s17 = scalar_lea.hbm %s7445_s7, %s4283_s10 }
 0x159   : > { %991 = vrot.lane.b32.xlu1 %v951_v33, %s5536_s18  ;;  %4558 = vmatprep.mubr.msk.f32.mxu0 %vm5537_vm1, %v5538_v26  ;;  %v5124_v33 = vpack.c.bf16 %v4183_v54, %v4182_v52  ;;  %v5144_v52 = vpack.c.bf16 %v4193_v48, %v4192_v4  ;;  %s283_s18 = sand.u32 1, %s5510_s25  }
 0x15a   : > { %v6469_v30 = vpop.permute.xlu1 %544  ;;  %v6471_v60 = vpop.permute.xlu0 %542  ;;  %s4036_s20 = sshll.u32 %s283_s18, 6  ;;  %s7391_s27 = scalar_lea.sflag [#allocation3], %s283_s18 }
 0x15b   : > { %5125 = vmatprep.subr.bf16.mxu1 %v5124_v33  ;;  %s7370_s22 = scalar_lea.vmem [#allocation2], %s4036_s20 }
 0x15c   : > { %5127 = vmatpush3.bf16.msra.mxu1 %v5124_v33  ;;  %s3947_s21 = sshll.u32 %s7370_s22, 4  ;;  %s7385_s21 = int_to_ptr.vmem [resolvable:$true] %s3947_s21 }
 0x15d   : > { %5129 = vmatprep.subr.bf16.mxu1 %v5128_v53  ;;  %p5455_p1 = scmp.lt.s32.totalorder %s7385_s21, %s5453_s15 }
 0x15e   : > { %v978_v1 = vpop.permute.xlu1 %977  ;;  %v851_v11 = vpop.permute.xlu0 %850 }
 0x15f   : > { %v6496_v46 = vsel %vm1160_vm10, %v1152_v55, %v978_v1  ;;  %v1130_v0 = vsel %vm1118_vm8, %v1109_v50, %v851_v11 }
 0x160   : > { %v1352_v8 = vrot.slane %v6496_v46, %v5851_v37  ;;  %5131 = vmatpush3.bf16.msra.mxu1 %v5128_v53  ;;  %v1345_v16 = vcombine.high %v6496_v46, %v6496_v46 }
 0x161   : > { %5133 = vmatprep.subr.bf16.mxu1 %v5132_v49 }
 0x162   : > { %v6498_v9 = vpop.permute.xlu1 %624  ;;  %v6500_v15 = vpop.permute.xlu0 %622  ;;  %v1360_v43 = vcombine.high %v1352_v8, %v1352_v8  ;;  %v1359_v34 = vrot.slane %v1345_v16, %v5851_v37 }
 0x164   : > { %5135 = vmatpush3.bf16.msra.mxu1 %v5132_v49  ;;  %v1573_v45 = vcombine.low %v1352_v8, %v1360_v43  ;;  %v5431_v8 = vld [vmem:[%s5642_s19 + $0x68] sm:$0x7]  ;;  %v1361_v25 = vcombine.high %v1359_v34, %v1359_v34 }
 0x165   : > { %5137 = vmatprep.subr.bf16.mxu1 %v5136_v6  ;;  %v1027_v31 = vsel %vm1013_vm3, %v5431_v8, %v6431_v10 }
 0x166   : > { %v6511_v41 = vpop.permute.xlu1 %702  ;;  %v913_v29 = vpop.permute.xlu0 %912  ;;  %v1587_v3 = vrot.slane %v1573_v45, %v5851_v37  ;;  %v1048_v46 = vsel %vm1034_vm4, %v1027_v31, %v6471_v60 }
 0x167   : > { %v1151_v7 = vsel %vm1139_vm9, %v1130_v0, %v913_v29  ;;  %v1049_v29 = vsel %vm1034_vm4, %v1028_v21, %v6469_v30  ;;  %v1069_v50 = vsel %vm1055_vm5, %v1048_v46, %v6500_v15 }
 0x168   : > { %5139 = vmatpush3.bf16.msra.mxu1 %v5136_v6  ;;  %v1070_v19 = vsel %vm1055_vm5, %v1049_v29, %v6498_v9  ;;  %v1090_v58 = vsel %vm1076_vm6, %v1069_v50, %v6511_v41 }
 0x169   : > { %5141 = vmatprep.subr.bf16.mxu1 %v5140_v20 }
 0x16a   : > { %v976_v61 = vpop.permute.xlu1 %975  ;;  %v705_v39 = vpop.permute.xlu0 %704 }
 0x16b   : > { %v1172_v12 = vsel %vm1160_vm10, %v1151_v7, %v976_v61  ;;  %v1091_v10 = vsel %vm1076_vm6, %v1070_v19, %v705_v39  ;;  %v1589_v39 = vcombine.low %v1359_v34, %v1361_v25 }
 0x16c   : > { %v1344_v56 = vrot.slane %v1172_v12, %v5851_v37  ;;  %5143 = vmatpush3.bf16.msra.mxu1 %v5140_v20 }
 0x16d   : > { %5145 = vmatprep.subr.bf16.mxu1 %v5144_v52  ;;  %v1597_v28 = vrot.slane %v1589_v39, %v5851_v37 }
 0x16e   : > { %v1572_v62 = vcombine.low %v1337_v24, %v1344_v56  ;;  %v6534_v2 = vpop.permute.xlu1 %437  ;;  %v6536_v59 = vpop.permute.xlu0 %435 }
 0x16f   : > { %v1030_v48 = vsel %vm1013_vm3, %v6120_v27, %v6534_v2 }
 0x170   : > { %v1580_v40 = vrot.slane %v1572_v62, %v5851_v37  ;;  %5147 = vmatpush3.bf16.msra.mxu1 %v5144_v52  ;;  %v1029_v52 = vsel %vm1013_vm3, %v6038_v63, %v6536_v59 }
 0x171   : > { %5149 = vmatprep.subr.bf16.mxu1 %v5148_v22 }
 0x172   : > { %v795_v54 = vpop.permute.xlu1 %794  ;;  %v793_v13 = vpop.permute.xlu0 %792  ;;  %v1588_v33 = vcombine.low %v1580_v40, %v1587_v3 }
 0x173   : > { %v1112_v14 = vsel %vm1097_vm7, %v1091_v10, %v795_v54  ;;  %v1111_v30 = vsel %vm1097_vm7, %v1090_v58, %v793_v13 }
 0x174   : > { %4559 = vmatmul.mubr.msk.f32.gmra.mrb[14].mxu0 %vm1665_vm11, %v1588_v33  ;;  %5151 = vmatpush3.bf16.msra.mxu1 %v5148_v22 }
 0x175   : > { %4561 = vmatprep.mubr.msk.f32.mxu0 %vm5537_vm1, %v5538_v26 }
 0x176   : > { %v549_v17 = vpop.permute.xlu1 %548  ;;  %v547_v5 = vpop.permute.xlu0 %546 }
 0x177   : > { %v1051_v54 = vsel %vm1034_vm4, %v1030_v48, %v549_v17  ;;  %v1050_v13 = vsel %vm1034_vm4, %v1029_v52, %v547_v5 }
 0x17a   : > { %v857_v53 = vpop.permute.xlu1 %856  ;;  %v855_v23 = vpop.permute.xlu0 %854 }
 0x17b   : > { %v1133_v60 = vsel %vm1118_vm8, %v1112_v14, %v857_v53  ;;  %v1132_v0 = vsel %vm1118_vm8, %v1111_v30, %v855_v23 }
 0x17e   : > { %v629_v1 = vpop.permute.xlu1 %628  ;;  %v627_v11 = vpop.permute.xlu0 %626 }
 0x17f   : > { %v1072_v33 = vsel %vm1055_vm5, %v1051_v54, %v629_v1  ;;  %v1071_v57 = vsel %vm1055_vm5, %v1050_v13, %v627_v11 }
 0x180   : > { %v1762_v44 = vpop.f32.mrb[0].mxu0 }
 0x181   : > { %v4539_v18 = vpop.f32.mrb[1].mxu0 }
 0x182   : > { %v919_v55 = vpop.permute.xlu1 %918  ;;  %v917_v49 = vpop.permute.xlu0 %916 }
 0x183   : > { %v1154_v9 = vsel %vm1139_vm9, %v1133_v60, %v919_v55  ;;  %v1153_v15 = vsel %vm1139_vm9, %v1132_v0, %v917_v49 }
 0x186   : > { %v709_v43 = vpop.permute.xlu1 %708  ;;  %v707_v36 = vpop.permute.xlu0 %706 }
 0x187   : > { %v1093_v27 = vsel %vm1076_vm6, %v1072_v33, %v709_v43  ;;  %v1092_v2 = vsel %vm1076_vm6, %v1071_v57, %v707_v36 }
 0x18a   : > { %v982_v6 = vpop.permute.xlu1 %981  ;;  %v980_v7 = vpop.permute.xlu0 %979 }
 0x18b   : > { %v1175_v61 = vsel %vm1160_vm10, %v1154_v9, %v982_v6  ;;  %v1174_v41 = vsel %vm1160_vm10, %v1153_v15, %v980_v7 }
 0x18c   : > { %v1376_v12 = vrot.slane %v1175_v61, %v5851_v37  ;;  %v1368_v45 = vrot.slane %v1174_v41, %v5851_v37  ;;  %v1369_v4 = vcombine.high %v1175_v61, %v1175_v61 }
 0x18e   : > { %v1590_v24 = vcombine.low %v1368_v45, %v1376_v12  ;;  %v799_v56 = vpop.permute.xlu1 %798  ;;  %v797_v47 = vpop.permute.xlu0 %796  ;;  %v1383_v63 = vrot.slane %v1369_v4, %v5851_v37  ;;  %v1384_v59 = vcombine.high %v1376_v12, %v1376_v12 }
 0x18f   : > { %v1114_v17 = vsel %vm1097_vm7, %v1093_v27, %v799_v56  ;;  %v1113_v5 = vsel %vm1097_vm7, %v1092_v2, %v797_v47 }
 0x190   : > { %v1604_v20 = vrot.slane %v1590_v24, %v5851_v37  ;;  %v1606_v18 = vcombine.low %v1384_v59, %v1383_v63  ;;  %v1385_v31 = vcombine.high %v1383_v63, %v1383_v63 }
 0x192   : > { %v861_v62 = vpop.permute.xlu1 %860  ;;  %v859_v3 = vpop.permute.xlu0 %858  ;;  %v1605_v40 = vcombine.low %v1597_v28, %v1604_v20  ;;  %v1614_v36 = vrot.slane %v1606_v18, %v5851_v37 }
 0x193   : > { %v1135_v53 = vsel %vm1118_vm8, %v1114_v17, %v861_v62  ;;  %v1134_v23 = vsel %vm1118_vm8, %v1113_v5, %v859_v3 }
 0x194   : > { %4562 = vmatmul.mubr.msk.f32.gmra.mrb[16].mxu0 %vm1665_vm11, %v1605_v40 }
 0x195   : > { %4564 = vmatprep.mubr.msk.f32.mxu0 %vm5537_vm1, %v5538_v26 }
 0x196   : > { %v923_v38 = vpop.permute.xlu1 %922  ;;  %v921_v22 = vpop.permute.xlu0 %920 }
 0x197   : > { %v1156_v1 = vsel %vm1139_vm9, %v1135_v53, %v923_v38  ;;  %v1155_v11 = vsel %vm1139_vm9, %v1134_v23, %v921_v22 }
 0x19a   : > { %v986_v16 = vpop.permute.xlu1 %985  ;;  %v984_v44 = vpop.permute.xlu0 %983 }
 0x19b   : > { %v1177_v55 = vsel %vm1160_vm10, %v1156_v1, %v986_v16  ;;  %v1176_v49 = vsel %vm1160_vm10, %v1155_v11, %v984_v44 }
 0x19c   : > { %v1393_v21 = vcombine.high %v1177_v55, %v1177_v55  ;;  %v1400_v8 = vrot.slane %v1177_v55, %v5851_v37  ;;  %v1392_v34 = vrot.slane %v1176_v49, %v5851_v37 }
 0x19e   : > { %v1407_v29 = vrot.slane %v1393_v21, %v5851_v37  ;;  %v1408_v46 = vcombine.high %v1400_v8, %v1400_v8  ;;  %v1607_v19 = vcombine.low %v1385_v31, %v1392_v34  ;;  %v553_v50 = vpop.permute.xlu1 %552  ;;  %v442_v43 = vpop.permute.xlu0 %441 }
 0x19f   : > { %v1032_v24 = vsel %vm1013_vm3, %v6237_v35, %v442_v43 }
 0x1a0   : > { %v1409_v58 = vcombine.high %v1407_v29, %v1407_v29  ;;  %v1623_v10 = vcombine.low %v1400_v8, %v1408_v46  ;;  %v1621_v25 = vrot.slane %v1607_v19, %v5851_v37  ;;  %v1053_v28 = vsel %vm1034_vm4, %v1032_v24, %v553_v50 }
 0x1a2   : > { %v1624_v14 = vcombine.low %v1407_v29, %v1409_v58  ;;  %v633_v30 = vpop.permute.xlu1 %632  ;;  %v440_v60 = vpop.permute.xlu0 %439  ;;  %v1622_v0 = vcombine.low %v1614_v36, %v1621_v25  ;;  %v1631_v9 = vrot.slane %v1623_v10, %v5851_v37 }
 0x1a3   : > { %v1074_v20 = vsel %vm1055_vm5, %v1053_v28, %v633_v30  ;;  %v1031_v48 = vsel %vm1013_vm3, %v6123_v51, %v440_v60  ;;  %v6642_v51 = vld [vmem:[%s7440_s2] ss:$0 sm:$0xff] }
 0x1a4   : > { %v1638_v15 = vrot.slane %v1624_v14, %v5851_v37  ;;  %4565 = vmatmul.mubr.msk.f32.gmra.mrb[18].mxu0 %vm1665_vm11, %v1622_v0 }
 0x1a5   : > { %4567 = vmatprep.mubr.msk.f32.mxu0 %vm5537_vm1, %v5538_v26 }
 0x1a6   : > { %v713_v6 = vpop.permute.xlu1 %712  ;;  %v551_v7 = vpop.permute.xlu0 %550  ;;  %v1639_v61 = vcombine.low %v1631_v9, %v1638_v15 }
 0x1a7   : > { %v1095_v40 = vsel %vm1076_vm6, %v1074_v20, %v713_v6  ;;  %v1052_v54 = vsel %vm1034_vm4, %v1031_v48, %v551_v7  ;;  %v2077_v6 = vadd.s32 8, %v5840_v32 }
 0x1a8   : > { %4568 = vmatmul.mubr.msk.f32.gmra.mrb[20].mxu0 %vm1665_vm11, %v1639_v61 }
 0x1a9   : > { %4570 = vmatprep.mubr.msk.f32.mxu0 %vm5537_vm1, %v5538_v26 }
 0x1aa   : > { %v803_v41 = vpop.permute.xlu1 %802  ;;  %v631_v39 = vpop.permute.xlu0 %630 }
 0x1ab   : > { %v1116_v4 = vsel %vm1097_vm7, %v1095_v40, %v803_v41  ;;  %v1073_v57 = vsel %vm1055_vm5, %v1052_v54, %v631_v39  ;;  %v6674_v40 = vadd.s32 4294967295, %v5840_v32  ;;  %v6678_v54 = vrot.slane %v5538_v26, 1 }
 0x1ac   : > { %v1767_v12 = vpop.f32.mrb[2].mxu0 }
 0x1ad   : > { %v4542_v45 = vpop.f32.mrb[3].mxu0  ;;  %v1768_v11 = vadd.f32 %v6642_v51, %v1767_v12  ;;  %vm2110_vm13 = vcmp.ge.s32.totalorder %v6674_v40, 0  ;;  %v4250_v40 = vld [vmem:[%s7441_s3 + $0x3f8] sm:$0xff] }
 0x1ae   : > { %v865_v56 = vpop.permute.xlu1 %864  ;;  %v711_v47 = vpop.permute.xlu0 %710 }
 0x1af   : > { %v1137_v52 = vsel %vm1118_vm8, %v1116_v4, %v865_v56  ;;  %v1094_v22 = vsel %vm1076_vm6, %v1073_v57, %v711_v47  ;;  %v1827_v31 = vmax.f32 %v1768_v11, 0.0  ;;  %v6668_v56 = vadd.s32 4294967295, %v2077_v6 }
 0x1b1   : > { %v1869_v58 = vcombine.high %v1827_v31, %v1827_v31  ;;  %v1876_v10 = vrot.slane %v1827_v31, %v5851_v37  ;;  %vm2133_vm12 = vcmp.lt.s32.totalorder %v6668_v56, 8  ;;  %v4214_v56 = vld [vmem:[%s7441_s3 + $0x310] sm:$0xff] }
 0x1b2   : > { %v927_v62 = vpop.permute.xlu1 %926  ;;  %v801_v3 = vpop.permute.xlu0 %800 }
 0x1b3   : > { %v1158_v35 = vsel %vm1139_vm9, %v1137_v52, %v927_v62  ;;  %v1115_v63 = vsel %vm1097_vm7, %v1094_v22, %v801_v3  ;;  %v1883_v60 = vrot.slane %v1869_v58, %v5851_v37  ;;  %v1884_v0 = vcombine.high %v1876_v10, %v1876_v10 }
 0x1b5   : > { %v2218_v24 = vcombine.low %v1884_v0, %v1883_v60  ;;  %v1885_v28 = vcombine.high %v1883_v60, %v1883_v60 }
 0x1b6   : > { %v990_v13 = vpop.permute.xlu1 %989  ;;  %v863_v33 = vpop.permute.xlu0 %862 }
 0x1b7   : > { %v1179_v38 = vsel %vm1160_vm10, %v1158_v35, %v990_v13  ;;  %v1136_v5 = vsel %vm1118_vm8, %v1115_v63, %v863_v33  ;;  %v2226_v35 = vrot.slane %v2218_v24, %v5851_v37 }
 0x1b8   : > { %v1417_v27 = vcombine.high %v1179_v38, %v1179_v38  ;;  %v1424_v2 = vrot.slane %v1179_v38, %v5851_v37 }
 0x1ba   : > { %v1431_v59 = vrot.slane %v1417_v27, %v5851_v37  ;;  %v1432_v17 = vcombine.high %v1424_v2, %v1424_v2  ;;  %v925_v53 = vpop.permute.xlu0 %924  ;;  %v988_v23 = vpop.permute.xlu1 %987 }
 0x1bb   : > { %v1157_v1 = vsel %vm1139_vm9, %v1136_v5, %v925_v53 }
 0x1bc   : > { %v1178_v16 = vsel %vm1160_vm10, %v1157_v1, %v988_v23  ;;  %v1641_v44 = vcombine.low %v1432_v17, %v1431_v59  ;;  %v1433_v62 = vcombine.high %v1431_v59, %v1431_v59 }
 0x1bd   : > { %v1416_v18 = vrot.slane %v1178_v16, %v5851_v37 }
 0x1be   : > { %v444_v55 = vpop.permute.xlu0 %443  ;;  %v555_v49 = vpop.permute.xlu1 %554  ;;  %v1655_v29 = vrot.slane %v1641_v44, %v5851_v37 }
 0x1bf   : > { %v1640_v21 = vcombine.low %v1416_v18, %v1424_v2  ;;  %v1033_v8 = vsel %vm1013_vm3, %v6242_v42, %v444_v55  ;;  %v2474_v55 = vld [vmem:[%s7441_s3] sm:$0xff] }
 0x1c0   : > { %v1054_v34 = vsel %vm1034_vm4, %v1033_v8, %v555_v49  ;;  %v2475_v49 = vld [vmem:[%s7441_s3 + $0x8] sm:$0xff] }
 0x1c1   : > { %v1648_v46 = vrot.slane %v1640_v21, %v5851_v37  ;;  %v5024_v31 = vpack.c.bf16 %v2475_v49, %v2474_v55  ;;  %v4196_v55 = vld [vmem:[%s7441_s3 + $0x280] sm:$0xff]  ;;  %v4197_v49 = vld [vmem:[%s7441_s3 + $0x288] sm:$0xff] }
 0x1c2   : > { %v635_v19 = vpop.permute.xlu0 %634  ;;  %v715_v50 = vpop.permute.xlu1 %714 }
 0x1c3   : > { %v1075_v43 = vsel %vm1055_vm5, %v1054_v34, %v635_v19  ;;  %v1656_v36 = vcombine.low %v1648_v46, %v1655_v29  ;;  %5025 = vmatprep.subr.bf16.mxu0 %v5024_v31  ;;  %v2476_v19 = vld [vmem:[%s7441_s3 + $0x10] sm:$0xff] }
 0x1c4   : > { %v1096_v25 = vsel %vm1076_vm6, %v1075_v43, %v715_v50  ;;  %v2477_v50 = vld [vmem:[%s7441_s3 + $0x18] sm:$0xff] }
 0x1c5   : > { %4571 = vmatmul.mubr.msk.f32.gmra.mrb[22].mxu0 %vm1665_vm11, %v1656_v36  ;;  %v5028_v58 = vpack.c.bf16 %v2477_v50, %v2476_v19  ;;  %v4198_v19 = vld [vmem:[%s7441_s3 + $0x290] sm:$0xff]  ;;  %v4199_v50 = vld [vmem:[%s7441_s3 + $0x298] sm:$0xff] }
 0x1c6   : > { %v805_v42 = vpop.permute.xlu0 %804  ;;  %v867_v14 = vpop.permute.xlu1 %866  ;;  %4573 = vmatprep.mubr.msk.f32.mxu0 %vm5537_vm1, %v5538_v26 }
 0x1c7   : > { %v1117_v30 = vsel %vm1097_vm7, %v1096_v25, %v805_v42  ;;  %v2478_v42 = vld [vmem:[%s7441_s3 + $0x20] sm:$0xff] }
 0x1c8   : > { %v1138_v9 = vsel %vm1118_vm8, %v1117_v30, %v867_v14  ;;  %v1772_v15 = vpop.f32.mrb[4].mxu0  ;;  %v2479_v14 = vld [vmem:[%s7441_s3 + $0x28] sm:$0xff] }
 0x1c9   : > { %v1773_v7 = vadd.f32 %v6642_v51, %v1772_v15  ;;  %v4545_v61 = vpop.f32.mrb[5].mxu0  ;;  %v5032_v0 = vpack.c.bf16 %v2479_v14, %v2478_v42 }
 0x1ca   : > { %v929_v41 = vpop.permute.xlu0 %928 }
 0x1cb   : > { %v1828_v39 = vmax.f32 %v1773_v7, 0.0  ;;  %v1159_v12 = vsel %vm1139_vm9, %v1138_v9, %v929_v41  ;;  %v992_v45 = vpop.permute.xlu1 %991  ;;  %v2480_v41 = vld [vmem:[%s7441_s3 + $0x30] sm:$0xff] }
 0x1cc   : > { %v1180_v47 = vsel %vm1160_vm10, %v1159_v12, %v992_v45 }
 0x1cd   : > { %v1893_v20 = vrot.slane %v1828_v39, %v5851_v37  ;;  %v1440_v3 = vrot.slane %v1180_v47, %v5851_v37  ;;  %v1886_v53 = vcombine.high %v1828_v39, %v1828_v39  ;;  %v2481_v39 = vld [vmem:[%s7441_s3 + $0x38] sm:$0xff] }
 0x1ce   : > { %v5036_v12 = vpack.c.bf16 %v2481_v39, %v2480_v41  ;;  %v4202_v39 = vld [vmem:[%s7441_s3 + $0x2b0] sm:$0xff] }
 0x1cf   : > { %v1901_v4 = vcombine.high %v1893_v20, %v1893_v20  ;;  %v2219_v48 = vcombine.low %v1885_v28, %v1893_v20  ;;  %v1657_v52 = vcombine.low %v1433_v62, %v1440_v3  ;;  %v1900_v23 = vrot.slane %v1886_v53, %v5851_v37  ;;  %v2482_v28 = vld [vmem:[%s7441_s3 + $0x40] sm:$0xff]  ;;  %v2483_v20 = vld [vmem:[%s7441_s3 + $0x48] sm:$0xff] }
 0x1d0   : > { %v2487_v53 = vld [vmem:[%s7441_s3 + $0x68] sm:$0xff] }
 0x1d1   : > { %v2233_v13 = vrot.slane %v2219_v48, %v5851_v37  ;;  %v2241_v33 = vrot.slane %v1901_v4, %v5851_v37  ;;  %v1664_v57 = vrot.slane %v1657_v52, %v5851_v37  ;;  %v1902_v44 = vcombine.high %v1900_v23, %v1900_v23 }
 0x1d2   : > { %v5040_v4 = vpack.c.bf16 %v2483_v20, %v2482_v28  ;;  %v4204_v20 = vld [vmem:[%s7441_s3 + $0x2c0] sm:$0xff] }
 0x1d3   : > { %v6685_v32 = vcombine.low %v2226_v35, %v2233_v13  ;;  %v2457_v38 = vsel %vm2133_vm12, %v2241_v33, 0.0  ;;  %4574 = vmatmul.mubr.msk.f32.gmra.mrb[24].mxu0 %vm1665_vm11, %v1664_v57  ;;  %v2242_v34 = vcombine.low %v1900_v23, %v1902_v44  ;;  %v2484_v35 = vld [vmem:[%s7441_s3 + $0x50] sm:$0xff]  ;;  %v2485_v13 = vld [vmem:[%s7441_s3 + $0x58] sm:$0xff] }
 0x1d4   : > { %4608 = vmatprep.mubr.f32.mxu0 %v6678_v54  ;;  %v2510_v27 = vrot.slane %v2457_v38, 1  ;;  %v2770_v59 = vrot.slane %v2457_v38, 2 }
 0x1d5   : > { %v2456_v22 = vsel %vm2110_vm13, %v6685_v32, 0.0  ;;  %v2250_v10 = vrot.slane %v2242_v34, %v5851_v37 }
 0x1d6   : > { %v2509_v2 = vrot.slane %v2456_v22, 1  ;;  %v2769_v63 = vrot.slane %v2456_v22, 2 }
 0x1d8   : > { %v2511_v17 = vsel %vm485_vm0, %v2509_v2, %v2510_v27  ;;  %v6696_v5 = vsel %vm2765_vm14, %v2769_v63, %v2770_v59  ;;  %v5044_v27 = vpack.c.bf16 %v2485_v13, %v2484_v35 }
 0x1d9   : > { %4609 = vmatmul.mubr.f32.vlgmr.msra.gmra.mrb[26].mxu0 %v2511_v17  ;;  %4784 = vmatprep.mubr.f32.mxu1 %v2511_v17  ;;  %v2486_v17 = vld [vmem:[%s7441_s3 + $0x60] sm:$0xff] }
 0x1da   : > { %5027 = vmatpush3.bf16.msra.mxu0 %v5024_v31  ;;  %v2489_v31 = vld [vmem:[%s7441_s3 + $0x78] sm:$0xff] }
 0x1db   : > { %5029 = vmatprep.subr.bf16.mxu0 %v5028_v58 }
 0x1de   : > { %5031 = vmatpush3.bf16.msra.mxu0 %v5028_v58  ;;  %v5156_v58 = vpack.c.bf16 %v4199_v50, %v4198_v19 }
 0x1df   : > { %5033 = vmatprep.subr.bf16.mxu0 %v5032_v0 }
 0x1e2   : > { %5035 = vmatpush3.bf16.msra.mxu0 %v5032_v0 }
 0x1e3   : > { %5037 = vmatprep.subr.bf16.mxu0 %v5036_v12 }
 0x1e6   : > { %5039 = vmatpush3.bf16.msra.mxu0 %v5036_v12  ;;  %v4203_v12 = vld [vmem:[%s7441_s3 + $0x2b8] sm:$0xff] }
 0x1e7   : > { %5041 = vmatprep.subr.bf16.mxu0 %v5040_v4 }
 0x1e8   : > { %v1777_v1 = vpop.f32.mrb[6].mxu0 }
 0x1e9   : > { %v1778_v11 = vadd.f32 %v6642_v51, %v1777_v1  ;;  %v4548_v16 = vpop.f32.mrb[7].mxu0 }
 0x1ea   : > { %5043 = vmatpush3.bf16.msra.mxu0 %v5040_v4 }
 0x1eb   : > { %v1829_v18 = vmax.f32 %v1778_v11, 0.0  ;;  %5045 = vmatprep.subr.bf16.mxu0 %v5044_v27  ;;  %v5048_v11 = vpack.c.bf16 %v2487_v53, %v2486_v17 }
 0x1ed   : > { %v1903_v21 = vcombine.high %v1829_v18, %v1829_v18  ;;  %v1910_v8 = vrot.slane %v1829_v18, %v5851_v37 }
 0x1ee   : > { %5047 = vmatpush3.bf16.msra.mxu0 %v5044_v27 }
 0x1ef   : > { %v1917_v29 = vrot.slane %v1903_v21, %v5851_v37  ;;  %v1918_v46 = vcombine.high %v1910_v8, %v1910_v8  ;;  %5049 = vmatprep.subr.bf16.mxu0 %v5048_v11  ;;  %v5152_v21 = vpack.c.bf16 %v4197_v49, %v4196_v55 }
 0x1f1   : > { %v2243_v43 = vcombine.low %v1910_v8, %v1918_v46  ;;  %v2265_v36 = vrot.slane %v1917_v29, %v5851_v37  ;;  %v1919_v33 = vcombine.high %v1917_v29, %v1917_v29  ;;  %v2488_v8 = vld [vmem:[%s7441_s3 + $0x70] sm:$0xff]  ;;  %5153 = vmatprep.subr.bf16.mxu1 %v5152_v21 }
 0x1f2   : > { %5051 = vmatpush3.bf16.msra.mxu0 %v5048_v11  ;;  %v5052_v46 = vpack.c.bf16 %v2489_v31, %v2488_v8 }
 0x1f3   : > { %v2257_v25 = vrot.slane %v2243_v43, %v5851_v37  ;;  %v2459_v60 = vsel %vm2133_vm12, %v2265_v36, 0.0 }
 0x1f4   : > { %v2513_v6 = vrot.slane %v2459_v60, 1  ;;  %v2773_v61 = vrot.slane %v2459_v60, 2  ;;  %5053 = vmatprep.subr.bf16.mxu0 %v5052_v46 }
 0x1f5   : > { %v6723_v30 = vcombine.low %v2250_v10, %v2257_v25  ;;  %v4140_v10 = vld [vmem:[%s7441_s3 + $0x100] sm:$0xff]  ;;  %v4141_v25 = vld [vmem:[%s7441_s3 + $0x108] sm:$0xff] }
 0x1f6   : > { %v6799_v14 = vpack.c.bf16 %v4141_v25, %v4140_v10  ;;  %5055 = vmatpush3.bf16.msra.mxu0 %v5052_v46 }
 0x1f7   : > { %v2458_v9 = vsel %vm2110_vm13, %v6723_v30, 0.0 }
 0x1f8   : > { %v2512_v15 = vrot.slane %v2458_v9, 1  ;;  %v2772_v7 = vrot.slane %v2458_v9, 2  ;;  %5057 = vmatprep.subr.bf16.mxu0 %v6799_v14 }
 0x1fa   : > { %v6737_v45 = vsel %vm485_vm0, %v2512_v15, %v2513_v6  ;;  %v6740_v24 = vsel %vm2765_vm14, %v2772_v7, %v2773_v61  ;;  %v4200_v6 = vld [vmem:[%s7441_s3 + $0x2a0] sm:$0xff]  ;;  %v4201_v7 = vld [vmem:[%s7441_s3 + $0x2a8] sm:$0xff] }
 0x1fb   : > { %4611 = vmatprep.mubr.f32.mxu0 %v6737_v45  ;;  %4785 = vmatmul.mubr.f32.vlgmr.msra.gmra.mrb[0].mxu1 %v6737_v45  ;;  %v5160_v61 = vpack.c.bf16 %v4201_v7, %v4200_v6 }
 0x1fc   : > { %v1782_v47 = vpop.f32.mrb[8].mxu0  ;;  %5155 = vmatpush3.bf16.msra.mxu1 %v5152_v21 }
 0x1fd   : > { %v1783_v62 = vadd.f32 %v6642_v51, %v1782_v47  ;;  %v4551_v3 = vpop.f32.mrb[9].mxu0  ;;  %5157 = vmatprep.subr.bf16.mxu1 %v5156_v58  ;;  %v5164_v47 = vpack.c.bf16 %v4203_v12, %v4202_v39 }
 0x1ff   : > { %v1830_v48 = vmax.f32 %v1783_v62, 0.0  ;;  %v4205_v62 = vld [vmem:[%s7441_s3 + $0x2c8] sm:$0xff] }
 0x200   : > { %v1787_v52 = vpop.f32.mrb[10].mxu0  ;;  %5159 = vmatpush3.bf16.msra.mxu1 %v5156_v58  ;;  %v5168_v3 = vpack.c.bf16 %v4205_v62, %v4204_v20 }
 0x201   : > { %v1920_v57 = vcombine.high %v1830_v48, %v1830_v48  ;;  %v1927_v38 = vrot.slane %v1830_v48, %v5851_v37  ;;  %v4554_v22 = vpop.f32.mrb[11].mxu0  ;;  %v1788_v41 = vadd.f32 %v6642_v51, %v1787_v52  ;;  %5161 = vmatprep.subr.bf16.mxu1 %v5160_v61  ;;  %v4206_v48 = vld [vmem:[%s7441_s3 + $0x2d0] sm:$0xff]  ;;  %v4207_v52 = vld [vmem:[%s7441_s3 + $0x2d8] sm:$0xff] }
 0x202   : > { %v5172_v35 = vpack.c.bf16 %v4207_v52, %v4206_v48 }
 0x203   : > { %v1934_v2 = vrot.slane %v1920_v57, %v5851_v37  ;;  %v1935_v63 = vcombine.high %v1927_v38, %v1927_v38  ;;  %v2266_v59 = vcombine.low %v1919_v33, %v1927_v38  ;;  %v1831_v28 = vmax.f32 %v1788_v41, 0.0  ;;  %v4208_v33 = vld [vmem:[%s7441_s3 + $0x2e0] sm:$0xff]  ;;  %v4209_v57 = vld [vmem:[%s7441_s3 + $0x2e8] sm:$0xff] }
 0x204   : > { %5163 = vmatpush3.bf16.msra.mxu1 %v5160_v61  ;;  %v5176_v22 = vpack.c.bf16 %v4209_v57, %v4208_v33 }
 0x205   : > { %v1936_v23 = vcombine.high %v1934_v2, %v1934_v2  ;;  %v2267_v1 = vcombine.low %v1935_v63, %v1934_v2  ;;  %v2274_v16 = vrot.slane %v2266_v59, %v5851_v37  ;;  %5165 = vmatprep.subr.bf16.mxu1 %v5164_v47  ;;  %v1937_v4 = vcombine.high %v1831_v28, %v1831_v28  ;;  %v4210_v2 = vld [vmem:[%s7441_s3 + $0x2f0] sm:$0xff]  ;;  %v4211_v63 = vld [vmem:[%s7441_s3 + $0x2f8] sm:$0xff] }
 0x206   : > { %v1944_v38 = vrot.slane %v1831_v28, %v5851_v37  ;;  %v5180_v17 = vpack.c.bf16 %v4211_v63, %v4210_v2 }
 0x207   : > { %v2281_v44 = vrot.slane %v2267_v1, %v5851_v37  ;;  %v2289_v18 = vrot.slane %v1936_v23, %v5851_v37  ;;  %v1951_v13 = vrot.slane %v1937_v4, %v5851_v37  ;;  %v4212_v23 = vld [vmem:[%s7441_s3 + $0x300] sm:$0xff]  ;;  %v4213_v1 = vld [vmem:[%s7441_s3 + $0x308] sm:$0xff] }
 0x208   : > { %5167 = vmatpush3.bf16.msra.mxu1 %v5164_v47  ;;  %v1952_v59 = vcombine.high %v1944_v38, %v1944_v38 }
 0x209   : > { %v6780_v34 = vcombine.low %v2274_v16, %v2281_v44  ;;  %v2461_v29 = vsel %vm2133_vm12, %v2289_v18, 0.0  ;;  %5169 = vmatprep.subr.bf16.mxu1 %v5168_v3  ;;  %v1953_v27 = vcombine.high %v1951_v13, %v1951_v13  ;;  %v6855_v16 = vpack.c.bf16 %v4213_v1, %v4212_v23 }
 0x20a   : > { %v2516_v36 = vrot.slane %v2461_v29, 1  ;;  %v2776_v0 = vrot.slane %v2461_v29, 2  ;;  %v2290_v11 = vcombine.low %v1944_v38, %v1952_v59 }
 0x20b   : > { %v2460_v43 = vsel %vm2110_vm13, %v6780_v34, 0.0  ;;  %v2291_v53 = vcombine.low %v1951_v13, %v1953_v27 }
 0x20c   : > { %v2515_v42 = vrot.slane %v2460_v43, 1  ;;  %v2775_v60 = vrot.slane %v2460_v43, 2  ;;  %5171 = vmatpush3.bf16.msra.mxu1 %v5168_v3  ;;  %v2298_v55 = vrot.slane %v2290_v11, %v5851_v37 }
 0x20d   : > { %5173 = vmatprep.subr.bf16.mxu1 %v5172_v35  ;;  %v2305_v44 = vrot.slane %v2291_v53, %v5851_v37 }
 0x20e   : > { %v6802_v9 = vsel %vm485_vm0, %v2515_v42, %v2516_v36  ;;  %v6806_v15 = vsel %vm2765_vm14, %v2775_v60, %v2776_v0 }
 0x20f   : > { %4612 = vmatmul.mubr.f32.gmra.mrb[28].mxu0 %v6802_v9  ;;  %4787 = vmatprep.mubr.f32.mxu1 %v6802_v9  ;;  %v6861_v8 = vcombine.low %v2298_v55, %v2305_v44 }
 0x210   : > { %5175 = vmatpush3.bf16.msra.mxu1 %v5172_v35 }
 0x211   : > { %5177 = vmatprep.subr.bf16.mxu1 %v5176_v22  ;;  %v2462_v19 = vsel %vm2110_vm13, %v6861_v8, 0.0 }
 0x212   : > { %v2518_v43 = vrot.slane %v2462_v19, 1  ;;  %v2778_v58 = vrot.slane %v2462_v19, 2 }
 0x214   : > { %5179 = vmatpush3.bf16.msra.mxu1 %v5176_v22 }
 0x215   : > { %5181 = vmatprep.subr.bf16.mxu1 %v5180_v17 }
 0x218   : > { %5183 = vmatpush3.bf16.msra.mxu1 %v5180_v17 }
 0x219   : > { %5185 = vmatprep.subr.bf16.mxu1 %v6855_v16 }
 0x22b   : > { %v1792_v18 = vpop.f32.mrb[12].mxu0 }
 0x22c   : > { %v1793_v49 = vadd.f32 %v6642_v51, %v1792_v18  ;;  %v4557_v21 = vpop.f32.mrb[13].mxu0 }
 0x22e   : > { %v1832_v31 = vmax.f32 %v1793_v49, 0.0 }
 0x230   : > { %v1961_v29 = vrot.slane %v1832_v31, %v5851_v37  ;;  %v1954_v60 = vcombine.high %v1832_v31, %v1832_v31 }
 0x232   : > { %v2313_v46 = vrot.slane %v1961_v29, %v5851_v37  ;;  %v1968_v6 = vrot.slane %v1954_v60, %v5851_v37  ;;  %v1969_v7 = vcombine.high %v1961_v29, %v1961_v29 }
 0x234   : > { %v2463_v50 = vsel %vm2133_vm12, %v2313_v46, 0.0  ;;  %v2314_v12 = vcombine.low %v1969_v7, %v1968_v6  ;;  %v1970_v47 = vcombine.high %v1968_v6, %v1968_v6 }
 0x235   : > { %v2519_v36 = vrot.slane %v2463_v50, 1  ;;  %v2779_v10 = vrot.slane %v2463_v50, 2 }
 0x236   : > { %v2322_v3 = vrot.slane %v2314_v12, %v5851_v37 }
 0x237   : > { %v6871_v25 = vsel %vm485_vm0, %v2518_v43, %v2519_v36  ;;  %v6874_v42 = vsel %vm2765_vm14, %v2778_v58, %v2779_v10 }
 0x238   : > { %4614 = vmatprep.mubr.f32.mxu0 %v6871_v25  ;;  %4788 = vmatmul.mubr.f32.gmra.mrb[2].mxu1 %v6871_v25 }
 0x247   : > { %v1797_v0 = vpop.f32.mrb[14].mxu0 }
 0x248   : > { %v1798_v61 = vadd.f32 %v6642_v51, %v1797_v0  ;;  %v4560_v41 = vpop.f32.mrb[15].mxu0 }
 0x24a   : > { %v1833_v39 = vmax.f32 %v1798_v61, 0.0 }
 0x24c   : > { %v1978_v28 = vrot.slane %v1833_v39, %v5851_v37  ;;  %v1971_v63 = vcombine.high %v1833_v39, %v1833_v39 }
 0x24e   : > { %v1986_v20 = vcombine.high %v1978_v28, %v1978_v28  ;;  %v2315_v62 = vcombine.low %v1970_v47, %v1978_v28  ;;  %v1985_v59 = vrot.slane %v1971_v63, %v5851_v37 }
 0x250   : > { %v2329_v4 = vrot.slane %v2315_v62, %v5851_v37  ;;  %v2337_v48 = vrot.slane %v1986_v20, %v5851_v37  ;;  %v1987_v1 = vcombine.high %v1985_v59, %v1985_v59 }
 0x252   : > { %v6884_v52 = vcombine.low %v2322_v3, %v2329_v4  ;;  %v2465_v35 = vsel %vm2133_vm12, %v2337_v48, 0.0  ;;  %v2338_v55 = vcombine.low %v1985_v59, %v1987_v1  ;;  %v5432_v59 = vld [vmem:[%s5642_s19 + $0x220] sm:$0xff] }
 0x253   : > { %v2522_v57 = vrot.slane %v2465_v35, 1  ;;  %v2782_v22 = vrot.slane %v2465_v35, 2 }
 0x254   : > { %v2464_v13 = vsel %vm2110_vm13, %v6884_v52, 0.0  ;;  %v2346_v46 = vrot.slane %v2338_v55, %v5851_v37 }
 0x255   : > { %v2521_v33 = vrot.slane %v2464_v13, 1  ;;  %v2781_v38 = vrot.slane %v2464_v13, 2 }
 0x257   : > { %v6892_v27 = vsel %vm485_vm0, %v2521_v33, %v2522_v57  ;;  %v6895_v2 = vsel %vm2765_vm14, %v2781_v38, %v2782_v22 }
 0x258   : > { %4615 = vmatmul.mubr.f32.gmra.mrb[30].mxu0 %v6892_v27  ;;  %4790 = vmatprep.mubr.f32.mxu1 %v6892_v27 }
 0x267   : > { %v1802_v17 = vpop.f32.mrb[16].mxu0 }
 0x268   : > { %v1803_v53 = vadd.f32 %v6642_v51, %v1802_v17  ;;  %v4563_v23 = vpop.f32.mrb[17].mxu0  ;;  %v3743_v17 = vrot.slane %v5432_v59, 1 }
 0x269   : > { %v5433_v23 = vld [vmem:[%s5642_s19 + $0x228] sm:$0x7] }
 0x26a   : > { %v1834_v11 = vmax.f32 %v1803_v53, 0.0  ;;  %v3744_v1 = vrot.slane %v5433_v23, 1  ;;  %v4152_v23 = vld [vmem:[%s7441_s3 + $0x160] sm:$0xff] }
 0x26c   : > { %v1988_v44 = vcombine.high %v1834_v11, %v1834_v11  ;;  %v1995_v18 = vrot.slane %v1834_v11, %v5851_v37 }
 0x26e   : > { %v2002_v49 = vrot.slane %v1988_v44, %v5851_v37  ;;  %v2003_v21 = vcombine.high %v1995_v18, %v1995_v18 }
 0x270   : > { %v2339_v31 = vcombine.low %v1995_v18, %v2003_v21  ;;  %v2361_v29 = vrot.slane %v2002_v49, %v5851_v37  ;;  %v2004_v39 = vcombine.high %v2002_v49, %v2002_v49  ;;  %v4142_v49 = vld [vmem:[%s7441_s3 + $0x110] sm:$0xff]  ;;  %v4143_v21 = vld [vmem:[%s7441_s3 + $0x118] sm:$0xff] }
 0x272   : > { %v2353_v19 = vrot.slane %v2339_v31, %v5851_v37  ;;  %v6910_v43 = vsel %vm2133_vm12, %v2361_v29, 0.0  ;;  %v6960_v29 = vsel %vm485_vm0, %v3743_v17, %v3744_v1  ;;  %v4153_v1 = vld [vmem:[%s7441_s3 + $0x168] sm:$0xff] }
 0x273   : > { %v2525_v60 = vrot.slane %v6910_v43, 1 }
 0x274   : > { %v6906_v50 = vcombine.low %v2346_v46, %v2353_v19  ;;  %v5060_v46 = vpack.c.bf16 %v4143_v21, %v4142_v49  ;;  %v4154_v21 = vld [vmem:[%s7441_s3 + $0x170] sm:$0xff] }
 0x276   : > { %v6915_v36 = vsel %vm2110_vm13, %v6906_v50, 0.0 }
 0x277   : > { %v1807_v58 = vpop.f32.mrb[18].mxu0  ;;  %v2524_v10 = vrot.slane %v6915_v36, 1 }
 0x278   : > { %v1808_v0 = vadd.f32 %v6642_v51, %v1807_v58  ;;  %v4566_v6 = vpop.f32.mrb[19].mxu0  ;;  %v4144_v58 = vld [vmem:[%s7441_s3 + $0x120] sm:$0xff] }
 0x279   : > { %v6921_v7 = vsel %vm485_vm0, %v2524_v10, %v2525_v60  ;;  %v4145_v10 = vld [vmem:[%s7441_s3 + $0x128] sm:$0xff] }
 0x27a   : > { %v1835_v61 = vmax.f32 %v1808_v0, 0.0  ;;  %4617 = vmatprep.mubr.f32.mxu0 %v6921_v7  ;;  %4791 = vmatmul.mubr.f32.gmra.mrb[4].mxu1 %v6921_v7  ;;  %v5064_v0 = vpack.c.bf16 %v4145_v10, %v4144_v58 }
 0x27b   : > { %v1812_v41 = vpop.f32.mrb[20].mxu0 }
 0x27c   : > { %v2005_v12 = vcombine.high %v1835_v61, %v1835_v61  ;;  %v2012_v47 = vrot.slane %v1835_v61, %v5851_v37  ;;  %v4569_v28 = vpop.f32.mrb[21].mxu0  ;;  %v1813_v4 = vadd.f32 %v6642_v51, %v1812_v41  ;;  %v4146_v61 = vld [vmem:[%s7441_s3 + $0x130] sm:$0xff]  ;;  %v4147_v41 = vld [vmem:[%s7441_s3 + $0x138] sm:$0xff] }
 0x27d   : > { %v4149_v28 = vld [vmem:[%s7441_s3 + $0x148] sm:$0xff] }
 0x27e   : > { %v2019_v20 = vrot.slane %v2005_v12, %v5851_v37  ;;  %v2020_v62 = vcombine.high %v2012_v47, %v2012_v47  ;;  %v2362_v3 = vcombine.low %v2004_v39, %v2012_v47  ;;  %v1836_v38 = vmax.f32 %v1813_v4, 0.0  ;;  %v4148_v47 = vld [vmem:[%s7441_s3 + $0x140] sm:$0xff] }
 0x27f   : > { %v5068_v39 = vpack.c.bf16 %v4147_v41, %v4146_v61  ;;  %v5072_v4 = vpack.c.bf16 %v4149_v28, %v4148_v47  ;;  %v4156_v61 = vld [vmem:[%s7441_s3 + $0x180] sm:$0xff]  ;;  %v4157_v41 = vld [vmem:[%s7441_s3 + $0x188] sm:$0xff] }
 0x280   : > { %v2021_v48 = vcombine.high %v2019_v20, %v2019_v20  ;;  %v2363_v35 = vcombine.low %v2020_v62, %v2019_v20  ;;  %v2370_v13 = vrot.slane %v2362_v3, %v5851_v37  ;;  %v2022_v11 = vcombine.high %v1836_v38, %v1836_v38  ;;  %v4216_v28 = vld [vmem:[%s7441_s3 + $0x320] sm:$0xff] }
 0x281   : > { %v2029_v19 = vrot.slane %v1836_v38, %v5851_v37  ;;  %v7002_v62 = vrot.slane %v5538_v26, 2  ;;  %v5088_v47 = vpack.c.bf16 %v4157_v41, %v4156_v61  ;;  %v4167_v61 = vld [vmem:[%s7441_s3 + $0x1d8] sm:$0xff] }
 0x282   : > { %v2377_v33 = vrot.slane %v2363_v35, %v5851_v37  ;;  %v2385_v57 = vrot.slane %v2021_v48, %v5851_v37  ;;  %v2036_v31 = vrot.slane %v2022_v11, %v5851_v37 }
 0x283   : > { %v2037_v6 = vcombine.high %v2029_v19, %v2029_v19 }
 0x284   : > { %v6931_v22 = vcombine.low %v2370_v13, %v2377_v33  ;;  %v6935_v63 = vsel %vm2133_vm12, %v2385_v57, 0.0  ;;  %v2038_v60 = vcombine.high %v2036_v31, %v2036_v31  ;;  %v4150_v33 = vld [vmem:[%s7441_s3 + $0x150] sm:$0xff]  ;;  %v4151_v57 = vld [vmem:[%s7441_s3 + $0x158] sm:$0xff] }
 0x285   : > { %v2528_v18 = vrot.slane %v6935_v63, 1  ;;  %v2386_v12 = vcombine.low %v2029_v19, %v2037_v6 }
 0x286   : > { %v6941_v53 = vsel %vm2110_vm13, %v6931_v22, 0.0 }
 0x287   : > { %v2527_v44 = vrot.slane %v6941_v53, 1  ;;  %v2394_v48 = vrot.slane %v2386_v12, %v5851_v37 }
 0x289   : > { %v6947_v55 = vsel %vm485_vm0, %v2527_v44, %v2528_v18  ;;  %v5080_v18 = vpack.c.bf16 %v4153_v1, %v4152_v23  ;;  %v4220_v1 = vld [vmem:[%s7441_s3 + $0x340] sm:$0xff] }
 0x28a   : > { %4618 = vmatmul.mubr.f32.gmra.mrb[32].mxu0 %v6947_v55  ;;  %4793 = vmatprep.mubr.f32.mxu1 %v6947_v55 }
 0x28b   : > { %4652 = vmatprep.mubr.f32.mxu0 %v5538_v26 }
 0x28e   : > { %4653 = vmatmul.mubr.msk.f32.vlgmr.msra.gmra.mrb[26].mxu0 %vm2110_vm13, %v6685_v32 }
 0x28f   : > { %5059 = vmatpush3.bf16.msra.mxu0 %v6799_v14  ;;  %4655 = vmatprep.mubr.msk.f32.mxu0 %vm2110_vm13, %v6723_v30  ;;  %v2387_v14 = vcombine.low %v2036_v31, %v2038_v60  ;;  %v4155_v31 = vld [vmem:[%s7441_s3 + $0x178] sm:$0xff] }
 0x290   : > { %5061 = vmatprep.subr.bf16.mxu0 %v5060_v46  ;;  %v5084_v60 = vpack.c.bf16 %v4155_v31, %v4154_v21  ;;  %v4223_v31 = vld [vmem:[%s7441_s3 + $0x358] sm:$0xff] }
 0x291   : > { %v2401_v20 = vrot.slane %v2387_v14, %v5851_v37 }
 0x292   : > { %4656 = vmatmul.mubr.msk.f32.gmra.mrb[28].mxu0 %vm2110_vm13, %v6780_v34 }
 0x293   : > { %5063 = vmatpush3.bf16.msra.mxu0 %v5060_v46  ;;  %4658 = vmatprep.mubr.msk.f32.mxu0 %vm2110_vm13, %v6861_v8  ;;  %v7015_v38 = vcombine.low %v2394_v48, %v2401_v20  ;;  %v4217_v20 = vld [vmem:[%s7441_s3 + $0x328] sm:$0xff] }
 0x294   : > { %5065 = vmatprep.subr.bf16.mxu0 %v5064_v0  ;;  %v5192_v48 = vpack.c.bf16 %v4217_v20, %v4216_v28 }
 0x295   : > { %v2470_v44 = vsel %vm2110_vm13, %v7015_v38, 0.0 }
 0x296   : > { %4659 = vmatmul.mubr.msk.f32.gmra.mrb[30].mxu0 %vm2110_vm13, %v6884_v52  ;;  %v3060_v46 = vrot.slane %v2470_v44, 1  ;;  %v3194_v19 = vrot.slane %v2470_v44, 2 }
 0x297   : > { %5067 = vmatpush3.bf16.msra.mxu0 %v5064_v0  ;;  %4661 = vmatprep.mubr.msk.f32.mxu0 %vm2110_vm13, %v6906_v50  ;;  %v4215_v0 = vld [vmem:[%s7441_s3 + $0x318] sm:$0xff] }
 0x298   : > { %v1817_v3 = vpop.f32.mrb[22].mxu0  ;;  %5069 = vmatprep.subr.bf16.mxu0 %v5068_v39  ;;  %v5188_v12 = vpack.c.bf16 %v4215_v0, %v4214_v56  ;;  %v4225_v56 = vld [vmem:[%s7441_s3 + $0x368] sm:$0xff]  ;;  %v4166_v0 = vld [vmem:[%s7441_s3 + $0x1d0] sm:$0xff] }
 0x299   : > { %v1818_v35 = vadd.f32 %v6642_v51, %v1817_v3  ;;  %v4572_v13 = vpop.f32.mrb[23].mxu0  ;;  %v5076_v51 = vpack.c.bf16 %v4151_v57, %v4150_v33  ;;  %v4158_v3 = vld [vmem:[%s7441_s3 + $0x190] sm:$0xff]  ;;  %v4219_v33 = vld [vmem:[%s7441_s3 + $0x338] sm:$0xff]  ;;  %v2785_v57 = vrot.slane %v6910_v43, 2 }
 0x29a   : > { %4662 = vmatmul.mubr.msk.f32.gmra.mrb[32].mxu0 %vm2110_vm13, %v6931_v22 }
 0x29b   : > { %v1837_v59 = vmax.f32 %v1818_v35, 0.0  ;;  %5071 = vmatpush3.bf16.msra.mxu0 %v5068_v39  ;;  %4696 = vmatprep.mubr.f32.mxu0 %v7002_v62  ;;  %v2784_v35 = vrot.slane %v6915_v36, 2  ;;  %v4160_v36 = vld [vmem:[%s7441_s3 + $0x1a0] sm:$0xff] }
 0x29c   : > { %5073 = vmatprep.subr.bf16.mxu0 %v5072_v4 }
 0x29d   : > { %v2046_v17 = vrot.slane %v1837_v59, %v5851_v37  ;;  %v4161_v59 = vld [vmem:[%s7441_s3 + $0x1a8] sm:$0xff] }
 0x29e   : > { %v5096_v23 = vpack.c.bf16 %v4161_v59, %v4160_v36  ;;  %v4239_v59 = vld [vmem:[%s7441_s3 + $0x3a0] sm:$0xff] }
 0x29f   : > { %v2409_v11 = vrot.slane %v2046_v17, %v5851_v37  ;;  %5075 = vmatpush3.bf16.msra.mxu0 %v5072_v4  ;;  %v4159_v4 = vld [vmem:[%s7441_s3 + $0x198] sm:$0xff]  ;;  %v2788_v17 = vrot.slane %v6935_v63, 2 }
 0x2a0   : > { %5077 = vmatprep.subr.bf16.mxu0 %v5076_v51  ;;  %v5092_v13 = vpack.c.bf16 %v4159_v4, %v4158_v3  ;;  %v4163_v63 = vld [vmem:[%s7441_s3 + $0x1b8] sm:$0xff]  ;;  %v4235_v3 = vld [vmem:[%s7441_s3 + $0x380] sm:$0xff]  ;;  %v4236_v4 = vld [vmem:[%s7441_s3 + $0x388] sm:$0xff] }
 0x2a1   : > { %v2471_v49 = vsel %vm2133_vm12, %v2409_v11, 0.0  ;;  %v4162_v11 = vld [vmem:[%s7441_s3 + $0x1b0] sm:$0xff] }
 0x2a2   : > { %v3061_v37 = vrot.slane %v2471_v49, 1  ;;  %v3195_v58 = vrot.slane %v2471_v49, 2  ;;  %v4222_v49 = vld [vmem:[%s7441_s3 + $0x350] sm:$0xff]  ;;  %v5100_v21 = vpack.c.bf16 %v4163_v63, %v4162_v11  ;;  %v4244_v11 = vld [vmem:[%s7441_s3 + $0x3c8] sm:$0xff] }
 0x2a3   : > { %5079 = vmatpush3.bf16.msra.mxu0 %v5076_v51  ;;  %v2787_v51 = vrot.slane %v6941_v53, 2  ;;  %v4221_v53 = vld [vmem:[%s7441_s3 + $0x348] sm:$0xff]  ;;  %v4245_v63 = vld [vmem:[%s7441_s3 + $0x3d0] sm:$0xff] }
 0x2a4   : > { %5081 = vmatprep.subr.bf16.mxu0 %v5080_v18  ;;  %v7038_v10 = vsel %vm485_vm0, %v3060_v46, %v3061_v37  ;;  %v7047_v6 = vsel %vm2765_vm14, %v3194_v19, %v3195_v58  ;;  %v4164_v46 = vld [vmem:[%s7441_s3 + $0x1c0] sm:$0xff]  ;;  %v4165_v37 = vld [vmem:[%s7441_s3 + $0x1c8] sm:$0xff]  ;;  %v5204_v19 = vpack.c.bf16 %v4223_v31, %v4222_v49  ;;  %v5435_v49 = vld [vmem:[%s5642_s19 + $0x238] sm:$0x7] }
 0x2a5   : > { %4794 = vmatmul.mubr.f32.gmra.mrb[6].mxu1 %v7038_v10  ;;  %v7111_v44 = vsel %vm2765_vm14, %v2787_v51, %v2788_v17  ;;  %v5104_v58 = vpack.c.bf16 %v4165_v37, %v4164_v46  ;;  %v4240_v51 = vld [vmem:[%s7441_s3 + $0x3a8] sm:$0xff] }
 0x2a6   : > { %v1822_v14 = vpop.f32.mrb[24].mxu0  ;;  %4828 = vmatprep.mubr.f32.mxu1 %v6696_v5  ;;  %v5224_v17 = vpack.c.bf16 %v4240_v51, %v4239_v59  ;;  %v5437_v46 = vld [vmem:[%s5642_s19 + $0x248] sm:$0x7]  ;;  %v5440_v51 = vld [vmem:[%s5642_s19 + $0x260] sm:$0xff] }
 0x2a7   : > { %5083 = vmatpush3.bf16.msra.mxu0 %v5080_v18  ;;  %v4575_v39 = vpop.f32.mrb[25].mxu0  ;;  %v5200_v18 = vpack.c.bf16 %v4221_v53, %v4220_v1  ;;  %v5108_v14 = vpack.c.bf16 %v4167_v61, %v4166_v0  ;;  %v4242_v1 = vld [vmem:[%s7441_s3 + $0x3b8] sm:$0xff]  ;;  %v3750_v37 = vrot.slane %v5437_v46, 1 }
 0x2a8   : > { %5085 = vmatprep.subr.bf16.mxu0 %v5084_v60  ;;  %v4226_v39 = vld [vmem:[%s7441_s3 + $0x370] sm:$0xff] }
 0x2a9   : > { %4829 = vmatmul.mubr.f32.vlgmr.msra.gmra.mrb[0].mxu1 %v6740_v24 }
 0x2aa   : > { %5187 = vmatpush3.bf16.msra.mxu1 %v6855_v16  ;;  %4831 = vmatprep.mubr.f32.mxu1 %v6806_v15  ;;  %v4218_v16 = vld [vmem:[%s7441_s3 + $0x330] sm:$0xff] }
 0x2ab   : > { %5087 = vmatpush3.bf16.msra.mxu0 %v5084_v60  ;;  %5189 = vmatprep.subr.bf16.mxu1 %v5188_v12  ;;  %v5196_v43 = vpack.c.bf16 %v4219_v33, %v4218_v16  ;;  %v4224_v60 = vld [vmem:[%s7441_s3 + $0x360] sm:$0xff]  ;;  %v4237_v33 = vld [vmem:[%s7441_s3 + $0x390] sm:$0xff] }
 0x2ac   : > { %5089 = vmatprep.subr.bf16.mxu0 %v5088_v47  ;;  %v5208_v41 = vpack.c.bf16 %v4225_v56, %v4224_v60  ;;  %v5439_v56 = vld [vmem:[%s5642_s19 + $0x258] sm:$0x7] }
 0x2ad   : > { %4832 = vmatmul.mubr.f32.gmra.mrb[2].mxu1 %v6874_v42  ;;  %v3753_v0 = vrot.slane %v5439_v56, 1 }
 0x2ae   : > { %4697 = vmatmul.mubr.f32.vlgmr.msra.gmra.mrb[26].mxu0 %v6696_v5  ;;  %5191 = vmatpush3.bf16.msra.mxu1 %v5188_v12  ;;  %v7092_v5 = vsel %vm2765_vm14, %v2784_v35, %v2785_v57  ;;  %v4227_v12 = vld [vmem:[%s7441_s3 + $0x378] sm:$0xff] }
 0x2af   : > { %4699 = vmatprep.mubr.f32.mxu0 %v6740_v24  ;;  %5091 = vmatpush3.bf16.msra.mxu0 %v5088_v47  ;;  %v4168_v47 = vld [vmem:[%s7441_s3 + $0x1e0] sm:$0xff]  ;;  %v5212_v28 = vpack.c.bf16 %v4227_v12, %v4226_v39  ;;  %v4171_v35 = vld [vmem:[%s7441_s3 + $0x1f8] sm:$0xff]  ;;  %v4252_v12 = vld [vmem:[%s7441_s3 + $0x408] sm:$0xff] }
 0x2b0   : > { %4834 = vmatprep.mubr.f32.mxu1 %v6895_v2  ;;  %5193 = vmatprep.subr.bf16.mxu1 %v5192_v48  ;;  %v4238_v57 = vld [vmem:[%s7441_s3 + $0x398] sm:$0xff]  ;;  %v4251_v39 = vld [vmem:[%s7441_s3 + $0x400] sm:$0xff] }
 0x2b1   : > { %5093 = vmatprep.subr.bf16.mxu0 %v5092_v13  ;;  %4835 = vmatmul.mubr.f32.gmra.mrb[4].mxu1 %v7092_v5  ;;  %v5220_v36 = vpack.c.bf16 %v4238_v57, %v4237_v33  ;;  %v4262_v33 = vld [vmem:[%s7441_s3 + $0x458] sm:$0xff]  ;;  %v4264_v57 = vld [vmem:[%s7441_s3 + $0x468] sm:$0xff] }
 0x2b2   : > { %4700 = vmatmul.mubr.f32.gmra.mrb[28].mxu0 %v6806_v15  ;;  %5195 = vmatpush3.bf16.msra.mxu1 %v5192_v48  ;;  %v4170_v48 = vld [vmem:[%s7441_s3 + $0x1f0] sm:$0xff] }
 0x2b3   : > { %4702 = vmatprep.mubr.f32.mxu0 %v6874_v42  ;;  %5095 = vmatpush3.bf16.msra.mxu0 %v5092_v13  ;;  %v5216_v13 = vpack.c.bf16 %v4236_v4, %v4235_v3  ;;  %v5116_v16 = vpack.c.bf16 %v4171_v35, %v4170_v48  ;;  %v4255_v3 = vld [vmem:[%s7441_s3 + $0x420] sm:$0xff]  ;;  %v4256_v4 = vld [vmem:[%s7441_s3 + $0x428] sm:$0xff]  ;;  %v4257_v35 = vld [vmem:[%s7441_s3 + $0x430] sm:$0xff] }
 0x2b4   : > { %4837 = vmatprep.mubr.f32.mxu1 %v7111_v44  ;;  %5197 = vmatprep.subr.bf16.mxu1 %v5196_v43  ;;  %v5256_v48 = vpack.c.bf16 %v4256_v4, %v4255_v3 }
 0x2b5   : > { %5097 = vmatprep.subr.bf16.mxu0 %v5096_v23  ;;  %4838 = vmatmul.mubr.f32.gmra.mrb[6].mxu1 %v7047_v6 }
 0x2b6   : > { %4703 = vmatmul.mubr.f32.gmra.mrb[30].mxu0 %v6895_v2  ;;  %5199 = vmatpush3.bf16.msra.mxu1 %v5196_v43  ;;  %v7190_v43 = vld [vmem:[%s7443_s5] sm:$0xf] }
 0x2b7   : > { %4705 = vmatprep.mubr.f32.mxu0 %v7092_v5  ;;  %5099 = vmatpush3.bf16.msra.mxu0 %v5096_v23  ;;  %v4241_v23 = vld [vmem:[%s7441_s3 + $0x3b0] sm:$0xff] }
 0x2b8   : > { %4872 = vmatprep.mubr.msk.f32.mxu1 %vm2110_vm13, %v6723_v30  ;;  %5201 = vmatprep.subr.bf16.mxu1 %v5200_v18  ;;  %v5228_v53 = vpack.c.bf16 %v4242_v1, %v4241_v23  ;;  %v5441_v23 = vld [vmem:[%s5642_s19 + $0x268] sm:$0x7] }
 0x2b9   : > { %5101 = vmatprep.subr.bf16.mxu0 %v5100_v21  ;;  %v3756_v1 = vrot.slane %v5441_v23, 1 }
 0x2ba   : > { %4706 = vmatmul.mubr.f32.gmra.mrb[32].mxu0 %v7111_v44  ;;  %5203 = vmatpush3.bf16.msra.mxu1 %v5200_v18 }
 0x2bb   : > { %5103 = vmatpush3.bf16.msra.mxu0 %v5100_v21  ;;  %4740 = vmatprep.mubr.msk.f32.mxu0 %vm2110_vm13, %v6685_v32  ;;  %v4169_v32 = vld [vmem:[%s7441_s3 + $0x1e8] sm:$0xff]  ;;  %v5436_v21 = vld [vmem:[%s5642_s19 + $0x240] sm:$0xff] }
 0x2bc   : > { %5205 = vmatprep.subr.bf16.mxu1 %v5204_v19  ;;  %5105 = vmatprep.subr.bf16.mxu0 %v5104_v58  ;;  %v5112_v20 = vpack.c.bf16 %v4169_v32, %v4168_v47  ;;  %v3749_v31 = vrot.slane %v5436_v21, 1  ;;  %v5248_v47 = vpack.c.bf16 %v4252_v12, %v4251_v39  ;;  %v4253_v32 = vld [vmem:[%s7441_s3 + $0x410] sm:$0xff] }
 0x2be   : > { %5207 = vmatpush3.bf16.msra.mxu1 %v5204_v19 }
 0x2bf   : > { %5107 = vmatpush3.bf16.msra.mxu0 %v5104_v58  ;;  %5209 = vmatprep.subr.bf16.mxu1 %v5208_v41  ;;  %v5438_v58 = vld [vmem:[%s5642_s19 + $0x250] sm:$0xff] }
 0x2c0   : > { %5109 = vmatprep.subr.bf16.mxu0 %v5108_v14  ;;  %v3752_v60 = vrot.slane %v5438_v58, 1 }
 0x2c2   : > { %5211 = vmatpush3.bf16.msra.mxu1 %v5208_v41  ;;  %v3751_v41 = vsel %vm485_vm0, %v3749_v31, %v3750_v37 }
 0x2c3   : > { %5111 = vmatpush3.bf16.msra.mxu0 %v5108_v14  ;;  %5213 = vmatprep.subr.bf16.mxu1 %v5212_v28  ;;  %v4249_v14 = vld [vmem:[%s7441_s3 + $0x3f0] sm:$0xff] }
 0x2c4   : > { %5113 = vmatprep.subr.bf16.mxu0 %v5112_v20 }
 0x2c6   : > { %5215 = vmatpush3.bf16.msra.mxu1 %v5212_v28  ;;  %v4254_v28 = vld [vmem:[%s7441_s3 + $0x418] sm:$0xff] }
 0x2c7   : > { %5115 = vmatpush3.bf16.msra.mxu0 %v5112_v20  ;;  %5217 = vmatprep.subr.bf16.mxu1 %v5216_v13  ;;  %v5252_v20 = vpack.c.bf16 %v4254_v28, %v4253_v32 }
 0x2c8   : > { %5117 = vmatprep.subr.bf16.mxu0 %v5116_v16 }
 0x2c9   : > { %4873 = vmatmul.mubr.msk.f32.vlgmr.msra.gmra.mrb[0].mxu1 %vm2110_vm13, %v6780_v34 }
 0x2ca   : > { %4875 = vmatprep.mubr.msk.f32.mxu1 %vm2110_vm13, %v6861_v8  ;;  %5219 = vmatpush3.bf16.msra.mxu1 %v5216_v13  ;;  %v4258_v13 = vld [vmem:[%s7441_s3 + $0x438] sm:$0xff] }
 0x2cb   : > { %5119 = vmatpush3.bf16.msra.mxu0 %v5116_v16  ;;  %5221 = vmatprep.subr.bf16.mxu1 %v5220_v36  ;;  %v4260_v16 = vld [vmem:[%s7441_s3 + $0x448] sm:$0xff] }
 0x2cc   : > { %4972 = vmatprep.subr.msk.mxu0 %vm1692_vm2, %v7190_v43 }
 0x2cd   : > { %4876 = vmatmul.mubr.msk.f32.gmra.mrb[2].mxu1 %vm2110_vm13, %v6884_v52 }
 0x2ce   : > { %4741 = vmatmul.mubr.msk.f32.vlgmr.msra.gmra.mrb[26].mxu0 %vm2110_vm13, %v6723_v30  ;;  %4878 = vmatprep.mubr.msk.f32.mxu1 %vm2110_vm13, %v6906_v50  ;;  %v4243_v30 = vld [vmem:[%s7441_s3 + $0x3c0] sm:$0xff] }
 0x2cf   : > { %5223 = vmatpush3.bf16.msra.mxu1 %v5220_v36  ;;  %4743 = vmatprep.mubr.msk.f32.mxu0 %vm2110_vm13, %v6780_v34  ;;  %v5232_v34 = vpack.c.bf16 %v4244_v11, %v4243_v30  ;;  %v5443_v30 = vld [vmem:[%s5642_s19 + $0x278] sm:$0x7]  ;;  %v5444_v11 = vld [vmem:[%s5642_s19 + $0x280] sm:$0xff] }
 0x2d0   : > { %5225 = vmatprep.subr.bf16.mxu1 %v5224_v17  ;;  %4973 = vmatpush3.msk.msra.mxu0 %vm1692_vm2, %v7190_v43 }
 0x2d1   : > { %4879 = vmatmul.mubr.msk.f32.gmra.mrb[4].mxu1 %vm2110_vm13, %v6931_v22 }
 0x2d2   : > { %4744 = vmatmul.mubr.msk.f32.gmra.mrb[28].mxu0 %vm2110_vm13, %v6861_v8  ;;  %4881 = vmatprep.mubr.msk.f32.mxu1 %vm2110_vm13, %v7015_v38  ;;  %v4246_v8 = vld [vmem:[%s7441_s3 + $0x3d8] sm:$0xff] }
 0x2d3   : > { %5227 = vmatpush3.bf16.msra.mxu1 %v5224_v17  ;;  %4746 = vmatprep.mubr.msk.f32.mxu0 %vm2110_vm13, %v6884_v52  ;;  %v5434_v52 = vld [vmem:[%s5642_s19 + $0x230] sm:$0xff]  ;;  %v5236_v19 = vpack.c.bf16 %v4246_v8, %v4245_v63  ;;  %v3755_v17 = vrot.slane %v5440_v51, 1 }
 0x2d4   : > { %5229 = vmatprep.subr.bf16.mxu1 %v5228_v53  ;;  %v3746_v18 = vrot.slane %v5434_v52, 1  ;;  %v5446_v63 = vld [vmem:[%s5642_s19 + $0x290] sm:$0xff]  ;;  %v5447_v52 = vld [vmem:[%s5642_s19 + $0x298] sm:$0x7] }
 0x2d5   : > { %4882 = vmatmul.mubr.f32.gmra.mrb[6].mxu1 %v5538_v26  ;;  %v3747_v26 = vrot.slane %v5435_v49, 1  ;;  %v3764_v8 = vrot.slane %v5446_v63, 1 }
 0x2d6   : > { %4747 = vmatmul.mubr.msk.f32.gmra.mrb[30].mxu0 %vm2110_vm13, %v6906_v50  ;;  %4916 = vmatprep.mubr.f32.mxu1 %v6737_v45  ;;  %v4247_v45 = vld [vmem:[%s7441_s3 + $0x3e0] sm:$0xff]  ;;  %v4248_v50 = vld [vmem:[%s7441_s3 + $0x3e8] sm:$0xff] }
 0x2d7   : > { %5231 = vmatpush3.bf16.msra.mxu1 %v5228_v53  ;;  %4749 = vmatprep.mubr.msk.f32.mxu0 %vm2110_vm13, %v6931_v22  ;;  %v3748_v22 = vsel %vm485_vm0, %v3746_v18, %v3747_v26  ;;  %v5240_v61 = vpack.c.bf16 %v4248_v50, %v4247_v45  ;;  %v5442_v53 = vld [vmem:[%s5642_s19 + $0x270] sm:$0xff]  ;;  %v3765_v18 = vrot.slane %v5447_v52, 1 }
 0x2d8   : > { %5233 = vmatprep.subr.bf16.mxu1 %v5232_v34 }
 0x2da   : > { %4750 = vmatmul.mubr.msk.f32.gmra.mrb[32].mxu0 %vm2110_vm13, %v7015_v38  ;;  %v3754_v38 = vsel %vm485_vm0, %v3752_v60, %v3753_v0 }
 0x2db   : > { %5235 = vmatpush3.bf16.msra.mxu1 %v5232_v34  ;;  %4974 = vmatprep.mubr.msk.f32.mxu0 %vm1013_vm3, %v6960_v29  ;;  %v5244_v29 = vpack.c.bf16 %v4250_v40, %v4249_v14  ;;  %v5445_v34 = vld [vmem:[%s5642_s19 + $0x288] sm:$0x7]  ;;  %s5448_s19 = scalar_lea.vmem %s7385_s21, 1024 }
 0x2dc   : > { %5237 = vmatprep.subr.bf16.mxu1 %v5236_v19  ;;  %p5449_p12 = scmp.ne.s32.totalorder %s7385_s21, %s5448_s19  ;;  %p5456_p2 = scmp.lt.s32.totalorder %s5454_s30, %s5448_s19 }
 0x2de   : > { %4975 = vmatmul.mubr.msk.f32.vlgmr.msra.gmra.mrb[34].mxu0 %vm1013_vm3, %v3748_v22  ;;  %p5450_p13 = pnand %p5449_p12, %p5622_p4  ;;  %p5457_p3 = por %p5456_p2, %p5455_p1 }
 0x2df   : > { %5239 = vmatpush3.bf16.msra.mxu1 %v5236_v19  ;;  %4977 = vmatprep.mubr.msk.f32.mxu0 %vm1013_vm3, %v3751_v41  ;;  %v4267_v41 = vld [vmem:[%s7442_s4] ss:$0 sm:$0xff] }
 0x2e0   : > { %5241 = vmatprep.subr.bf16.mxu1 %v5240_v61  ;;  %p5451_p0 = pneg %p5450_p13 }
 0x2e2   : > { %4978 = vmatmul.mubr.msk.f32.gmra.mrb[36].mxu0 %vm1013_vm3, %v3754_v38  ;;  %p5458_p5 = pnand %p5457_p3, %p5451_p0 }
 0x2e3   : > { %5243 = vmatpush3.bf16.msra.mxu1 %v5240_v61 }
 0x2e4   : > { %5245 = vmatprep.subr.bf16.mxu1 %v5244_v29 }
 0x2e7   : > { %5247 = vmatpush3.bf16.msra.mxu1 %v5244_v29  ;;  %v4277_v29 = vld [vmem:[%s7444_s6] ss:$0 sm:$0xff] }
 0x2e8   : > { %5249 = vmatprep.subr.bf16.mxu1 %v5248_v47 }
 0x2ea   : > { %4917 = vmatmul.mubr.f32.vlgmr.msra.gmra.mrb[0].mxu1 %v6802_v9  ;;  %v5260_v9 = vpack.c.bf16 %v4258_v13, %v4257_v35 }
 0x2eb   : > { %4919 = vmatprep.mubr.f32.mxu1 %v6871_v25  ;;  %5251 = vmatpush3.bf16.msra.mxu1 %v5248_v47  ;;  %v4259_v25 = vld [vmem:[%s7441_s3 + $0x440] sm:$0xff] }
 0x2ec   : > { %5253 = vmatprep.subr.bf16.mxu1 %v5252_v20 }
 0x2ee   : > { %4920 = vmatmul.mubr.f32.gmra.mrb[2].mxu1 %v6892_v27  ;;  %v5264_v27 = vpack.c.bf16 %v4260_v16, %v4259_v25 }
 0x2ef   : > { %4922 = vmatprep.mubr.f32.mxu1 %v6921_v7  ;;  %5255 = vmatpush3.bf16.msra.mxu1 %v5252_v20  ;;  %v4261_v7 = vld [vmem:[%s7441_s3 + $0x450] sm:$0xff] }
 0x2f0   : > { %5257 = vmatprep.subr.bf16.mxu1 %v5256_v48 }
 0x2f2   : > { %4923 = vmatmul.mubr.f32.gmra.mrb[4].mxu1 %v6947_v55  ;;  %v5268_v55 = vpack.c.bf16 %v4262_v33, %v4261_v7 }
 0x2f3   : > { %4925 = vmatprep.mubr.f32.mxu1 %v7038_v10  ;;  %5259 = vmatpush3.bf16.msra.mxu1 %v5256_v48  ;;  %v4263_v10 = vld [vmem:[%s7441_s3 + $0x460] sm:$0xff] }
 0x2f4   : > { %5261 = vmatprep.subr.bf16.mxu1 %v5260_v9  ;;  %v5272_v36 = vpack.c.bf16 %v4264_v57, %v4263_v10 }
 0x2f6   : > { %4926 = vmatmul.mubr.f32.gmra.mrb[6].mxu1 %v6678_v54  ;;  %v4265_v54 = vld [vmem:[%s7441_s3 + $0x470] sm:$0xff] }
 0x2f7   : > { %5263 = vmatpush3.bf16.msra.mxu1 %v5260_v9  ;;  %4960 = vmatprep.mubr.f32.mxu1 %v6740_v24  ;;  %v4266_v24 = vld [vmem:[%s7441_s3 + $0x478] sm:$0xff] }
 0x2f8   : > { %5265 = vmatprep.subr.bf16.mxu1 %v5264_v27  ;;  %v5276_v59 = vpack.c.bf16 %v4266_v24, %v4265_v54 }
 0x2fb   : > { %5267 = vmatpush3.bf16.msra.mxu1 %v5264_v27 }
 0x2fc   : > { %5269 = vmatprep.subr.bf16.mxu1 %v5268_v55 }
 0x2ff   : > { %5271 = vmatpush3.bf16.msra.mxu1 %v5268_v55 }
 0x300   : > { %5273 = vmatprep.subr.bf16.mxu1 %v5272_v36 }
 0x303   : > { %5275 = vmatpush3.bf16.msra.mxu1 %v5272_v36 }
 0x304   : > { %5277 = vmatprep.subr.bf16.mxu1 %v5276_v59 }
 0x307   : > { %5279 = vmatpush3.bf16.msra.mxu1 %v5276_v59 }
 0x308   : > { %5280 = vmatprep.subr.msk.mxu1 %vm1692_vm2, %v7190_v43 }
 0x30a   : > { %4961 = vmatmul.mubr.f32.vlgmr.msra.gmra.mrb[0].mxu1 %v6806_v15  ;;  %v3758_v15 = vrot.slane %v5442_v53, 1 }
 0x30b   : > { %4963 = vmatprep.mubr.f32.mxu1 %v6874_v42  ;;  %5281 = vmatpush3.msk.msra.mxu1 %vm1692_vm2, %v7190_v43  ;;  %v3759_v42 = vrot.slane %v5443_v30, 1  ;;  %v3761_v43 = vrot.slane %v5444_v11, 1 }
 0x30e   : > { %4964 = vmatmul.mubr.f32.gmra.mrb[2].mxu1 %v6895_v2  ;;  %v3762_v2 = vrot.slane %v5445_v34, 1 }
 0x30f   : > { %4966 = vmatprep.mubr.f32.mxu1 %v7092_v5  ;;  %v3757_v5 = vsel %vm485_vm0, %v3755_v17, %v3756_v1 }
 0x310   : > { %v3763_v49 = vsel %vm485_vm0, %v3761_v43, %v3762_v2 }
 0x312   : > { %4967 = vmatmul.mubr.f32.gmra.mrb[4].mxu1 %v7111_v44  ;;  %v3760_v44 = vsel %vm485_vm0, %v3758_v15, %v3759_v42 }
 0x313   : > { %4969 = vmatprep.mubr.f32.mxu1 %v7047_v6  ;;  %v3766_v6 = vsel %vm485_vm0, %v3764_v8, %v3765_v18 }
 0x316   : > { %4970 = vmatmul.mubr.f32.gmra.mrb[6].mxu1 %v7002_v62 }
 0x317   : > { %4980 = vmatprep.mubr.msk.f32.mxu1 %vm1013_vm3, %v3757_v5 }
 0x31a   : > { %4981 = vmatmul.mubr.msk.f32.vlgmr.msra.gmra.mrb[4].mxu1 %vm1013_vm3, %v3760_v44 }
 0x31b   : > { %4983 = vmatprep.mubr.msk.f32.mxu1 %vm1013_vm3, %v3763_v49 }
 0x31e   : > { %4984 = vmatmul.mubr.msk.f32.gmra.mrb[6].mxu1 %vm1013_vm3, %v3766_v6 }
 0x3a1   : > { %v4742_v26 = vpop.f32.mrb[26].mxu0 }
 0x3a2   : > { %v3011_v62 = vpop.f32.mrb[27].mxu0 }
 0x3a5   : > { %v4745_v21 = vpop.f32.mrb[28].mxu0 }
 0x3a6   : > { %v3021_v31 = vpop.f32.mrb[29].mxu0 }
 0x3a9   : > { %v4748_v46 = vpop.f32.mrb[30].mxu0 }
 0x3aa   : > { %v3031_v37 = vpop.f32.mrb[31].mxu0  ;;  %v5294_v10 = vadd.f32 %v4748_v46, %v4267_v41 }
 0x3ab   : > { %v5296_v57 = vadd.f32 %v4267_v41, %v3031_v37 }
 0x3ad   : > { %v4751_v19 = vpop.f32.mrb[32].mxu0 }
 0x3ae   : > { %v3041_v45 = vpop.f32.mrb[33].mxu0  ;;  %v5298_v51 = vadd.f32 %v4751_v19, %v4267_v41 }
 0x3af   : > { %v5300_v23 = vadd.f32 %v4267_v41, %v3041_v45 }
 0x3b1   : > { %v4976_v50 = vpop.f32.mrb[34].mxu0 }
 0x3b2   : > { %v3853_v22 = vpop.f32.mrb[35].mxu0 }
 0x3b5   : > { %v4979_v58 = vpop.f32.mrb[36].mxu0 }
 0x3b6   : > { %v3863_v60 = vpop.f32.mrb[37].mxu0 }
 0x3dd   : > { %v4962_v56 = vpop.f32.mrb[0].mxu1 }
 0x3de   : > { %v5282_v0 = vadd.f32 %v4962_v56, %v4742_v26  ;;  %v3681_v61 = vpop.f32.mrb[1].mxu1 }
 0x3df   : > { %v5285_v14 = vadd.f32 %v3681_v61, %v3011_v62 }
 0x3e0   : > { %v5283_v40 = vadd.f32 %v5282_v0, %v4267_v41 }
 0x3e1   : > { %v4965_v38 = vpop.f32.mrb[2].mxu1  ;;  %v5286_v39 = vadd.f32 %v5285_v14, %v4267_v41 }
 0x3e2   : > { %v5288_v12 = vadd.f32 %v4965_v38, %v4745_v21  ;;  %v5284_v47 = vadd.f32 %v5283_v40, %v4976_v50  ;;  %v3691_v32 = vpop.f32.mrb[3].mxu1 }
 0x3e3   : > { %v5291_v28 = vadd.f32 %v3691_v32, %v3021_v31  ;;  %v5287_v20 = vadd.f32 %v5286_v39, %v3853_v22 }
 0x3e4   : > { %v3908_v3 = vadd.f32 %v5284_v47, %v4277_v29  ;;  %v5289_v4 = vadd.f32 %v5288_v12, %v4267_v41 }
 0x3e5   : > { %v3907_v48 = vadd.f32 %v5287_v20, %v4277_v29  ;;  %v5292_v35 = vadd.f32 %v5291_v28, %v4267_v41 }
 0x3e6   : > { %v3916_v13 = vmax.f32 %v3908_v3, 0.0  ;;  %v5290_v9 = vadd.f32 %v5289_v4, %v4979_v58 }
 0x3e7   : > { %v3915_v25 = vmax.f32 %v3907_v48, 0.0  ;;  %v5293_v16 = vadd.f32 %v5292_v35, %v3863_v60 }
 0x3e8   : > { %3924 = vst [vmem:[%s7370_s22 + $0x8] sm:$0xff] %v3916_v13  ;;  %v3910_v27 = vadd.f32 %v5290_v9, %v4277_v29 }
 0x3e9   : > { %3923 = vst [vmem:[%s7370_s22] sm:$0xff] %v3915_v25  ;;  %v3909_v7 = vadd.f32 %v5293_v16, %v4277_v29 }
 0x3ea   : > { %v3918_v33 = vmax.f32 %v3910_v27, 0.0 }
 0x3eb   : > { %v3917_v55 = vmax.f32 %v3909_v7, 0.0 }
 0x3ec   : > { %3926 = vst [vmem:[%s7370_s22 + $0x18] sm:$0xff] %v3918_v33 }
 0x3ed   : > { %3925 = vst [vmem:[%s7370_s22 + $0x10] sm:$0xff] %v3917_v55  ;;  %v4982_v36 = vpop.f32.mrb[4].mxu1 }
 0x3ee   : > { %v5295_v54 = vadd.f32 %v5294_v10, %v4982_v36  ;;  %v3873_v24 = vpop.f32.mrb[5].mxu1 }
 0x3ef   : > { %v5297_v59 = vadd.f32 %v5296_v57, %v3873_v24 }
 0x3f0   : > { %v3912_v17 = vadd.f32 %v5295_v54, %v4277_v29 }
 0x3f1   : > { %v3911_v1 = vadd.f32 %v5297_v59, %v4277_v29  ;;  %v4985_v53 = vpop.f32.mrb[6].mxu1 }
 0x3f2   : > { %v3920_v15 = vmax.f32 %v3912_v17, 0.0  ;;  %v5299_v30 = vadd.f32 %v5298_v51, %v4985_v53  ;;  %v3883_v42 = vpop.f32.mrb[7].mxu1 }
 0x3f3   : > { %v3919_v11 = vmax.f32 %v3911_v1, 0.0  ;;  %v5301_v43 = vadd.f32 %v5300_v23, %v3883_v42 }
 0x3f4   : > { %3928 = vst [vmem:[%s7370_s22 + $0x28] sm:$0xff] %v3920_v15  ;;  %v3914_v34 = vadd.f32 %v5299_v30, %v4277_v29 }
 0x3f5   : > { %3927 = vst [vmem:[%s7370_s22 + $0x20] sm:$0xff] %v3919_v11  ;;  %v3913_v2 = vadd.f32 %v5301_v43, %v4277_v29 }
 0x3f6   : > { %v3922_v5 = vmax.f32 %v3914_v34, 0.0 }
 0x3f7   : > { %v3921_v63 = vmax.f32 %v3913_v2, 0.0 }
 0x3f8   : > { %3930 = vst [vmem:[%s7370_s22 + $0x38] sm:$0xff] %v3922_v5 }
 0x3f9   : > { %3929 = vst [vmem:[%s7370_s22 + $0x30] sm:$0xff] %v3921_v63 }
 0x3fa   : > { %5461 = shalt.err (!%p5458_p5)
}
 0x3fb   : > { %s5462_s18 = scalar_lea.hbm %s7383_s17, 1024  ;;  %s5466_s10 = scalar_lea.hbm %s7445_s7, 2048 }
 0x3fc   : > { %p5463_p6 = scmp.ne.s32.totalorder %s7383_s17, %s5462_s18  ;;  %p5467_p10 = scmp.lt.u32.totalorder %s7383_s17, %s7445_s7 }
 0x3fd   : > { %p5468_p11 = scmp.lt.u32.totalorder %s5466_s10, %s5462_s18  ;;  %p5470_p13 = scmp.lt.u32.totalorder %s5462_s18, %s7383_s17 }
 0x3fe   : > { %p5464_p7 = pnand %p5463_p6, %p5622_p4 }
 0x3ff   : > { %p5469_p12 = por %p5468_p11, %p5467_p10 }
 0x400   : > { %p5465_p9 = pneg %p5464_p7 }
 0x401   : > { %p5471_p0 = por %p5470_p13, %p5469_p12 }
 0x403   : > { %p5472_p1 = pnand %p5471_p0, %p5465_p9 }
 0x405   : > { %5475 = shalt.err (!%p5472_p1)
}
 0x406   : > { %s5541_s19 = smov 128  }
 0x407   : > { %5363 = dma.vmem_to_hbm [thread:$0]  (%p5622_p4), %s7385_s21, 1024, %s7383_s17, %s7391_s27, %s5541_s19, %s5541_s19, %s5531_s23  }
 0x408 PF: > { %p5369_p2 = scmp.ge.s32.totalorder %s5526_s29, 2  ;;  %s3962_s12 = sand.u32 1, %s5506_s24  }
 0x409   : > { %s3963_s15 = scalar_lea.sflag [#allocation3], %s3962_s12 }
 0x40a   : > { %p5366_p3 = pnand %p5369_p2, %p5629_p8 }
 0x40c   : > { %5501 = dma.done.wait (!%p5366_p3), %s3963_s15, 1024  }
 0x40d   : > { %5503 = vsyncadd (!%p5366_p3), %s3963_s15, 4294966272  ;;  %s20_s29 = sadd.s32 1, %s5526_s29   ;;  %s7454_s24 = smov %s5510_s25 }
 0x40e   : > { %p17_p5 = scmp.ge.s32.totalorder %s20_s29, 4   ;;  %s7455_s25 = smov %s5514_s26 }
 0x40f   : > { %s7456_s26 = smov %s5635_s14  ;;  %s7457_s27 = smov %s5522_s28 }
 0x410   : > { %s7458_s28 = smov %s7460_s9  ;;  %19 = sbr.rel (!%p17_p5) target bundleno = 4 (0x4), region = 95 }
 0x417   :  { %3968 = vsyncpa [#allocation3], 1 }
 0x418   :  { %3970 = vsyncpa [#allocation3 + $0x1], 1 }

</bundles_post_ra>
